<compile_context>
chip_gen: v6e
topology: v6e:2x2x1
jax: 0.10.0
libtpu: 0.0.40
codegen_flags: <defaults>
</compile_context>

<pallas_src>
import math

import jax
import jax.numpy as jnp
from jax import lax
from jax.experimental import pallas as pl
from jax.experimental.pallas import tpu as pltpu

# ----------------------------- config ---------------------------------------
IMAGE_H = IMAGE_W = 64
PATCH_H = PATCH_W = 8
NUM_PATCHES = (IMAGE_H // PATCH_H) * (IMAGE_W // PATCH_W)   # 64
PATCH_DIM = PATCH_H * PATCH_W                               # 64
EMBED_DIM = NUM_PATCHES                                     # 64 (required by module's pos-embed broadcast)
NUM_HEADS = 4
HEAD_DIM = EMBED_DIM // NUM_HEADS                           # 16
INTERMEDIATE = 128
NUM_LAYERS = 2                                              # kept for documentation (see note above)
NUM_CLASSES = 10
SEQ = NUM_PATCHES + 1                                       # 65
SEQ_PAD = 72                                                # next multiple of 8 (sublane aligned)
BATCH = 2
LN_EPS = 1e-5
FINAL_LN_EPS = float(EMBED_DIM)   # nn.LayerNorm(D, D): 2nd positional arg is eps (module quirk)

# packed (1, D) parameter rows, padded to a multiple of 8 sublanes
NUM_VEC_ROWS = 16
(_R_BPE, _R_BO, _R_B2,
 _R_LN1G, _R_LN1B, _R_LN2G, _R_LN2B,
 _R_LNFG, _R_LNFB,
 _R_CLS, _R_MASK, _R_POSCLS) = range(12)


# --------------------------- in-kernel helpers -------------------------------
def _layernorm(x, g, b, eps):
    mu = jnp.mean(x, axis=-1, keepdims=True)
    var = jnp.mean((x - mu) ** 2, axis=-1, keepdims=True)
    return (x - mu) * lax.rsqrt(var + eps) * g + b


def _erf(x):
    # Abramowitz & Stegun 7.1.26 polynomial, |err| < 1.5e-7 (float32-accurate).
    a1, a2, a3, a4, a5 = 0.254829592, -0.284496736, 1.421413741, -1.453152027, 1.061405429
    p = 0.3275911
    ax = jnp.abs(x)
    t = 1.0 / (1.0 + p * ax)
    poly = ((((a5 * t + a4) * t + a3) * t + a2) * t + a1) * t
    y = 1.0 - poly * jnp.exp(-ax * ax)
    return jnp.where(x < 0, -y, y)


def _gelu_exact(x):
    return 0.5 * x * (1.0 + _erf(x * (1.0 / math.sqrt(2.0))))


# ------------------------------- fused kernel --------------------------------
def fused_forward_kernel(labels_ref,                      # SMEM (B,) int32 (scalar prefetch)
                         patch_ref,                       # (1, Np, P)
                         wpe_ref, pos_t_ref, maskw_ref, vecs_ref,
                         wqkv_ref, bqkv_ref, wo_ref,
                         w1_ref, b1_ref, w2_ref,
                         wc_ref, bc_ref,
                         logits_ref, loss_ref):
    b = pl.program_id(0)
    D = EMBED_DIM

    def vec(i):                                           # (1, D) packed parameter row
        return vecs_ref[i:i + 1, :]

    # ---- BeitEmbeddings ------------------------------------------------------
    patches = patch_ref[0]                                                  # (Np, P)
    emb = jnp.dot(patches, wpe_ref[...],
                  preferred_element_type=jnp.float32) + vec(_R_BPE)         # (Np, D)
    emb = emb + pos_t_ref[...]        # transposed patch pos-embed (module broadcast quirk)
    w = maskw_ref[...]                                                      # (Np, D) 0/1
    emb = emb * (1.0 - w) + vec(_R_MASK) * w
    cls = vec(_R_CLS) + vec(_R_POSCLS)                                      # (1, D)
    pad = jnp.zeros((SEQ_PAD - SEQ, D), jnp.float32)
    x = jnp.concatenate([cls, emb, pad], axis=0)                            # (SEQ_PAD, D)

    # ---- BeitLayer (single application; all NUM_LAYERS iterations of the
    #      encoder are identical because the weight-shared layer is re-applied
    #      to the ORIGINAL embeddings and only the last output is kept) -------
    xn = _layernorm(x, vec(_R_LN1G), vec(_R_LN1B), LN_EPS)
    qkv = jnp.dot(xn, wqkv_ref[...],
                  preferred_element_type=jnp.float32) + bqkv_ref[...]       # (SEQ_PAD, 3D)

    scale = 1.0 / math.sqrt(HEAD_DIM)
    key_valid = lax.broadcasted_iota(jnp.int32, (1, SEQ_PAD), 1) < SEQ      # mask pad keys

    attn = jnp.zeros((SEQ_PAD, D), jnp.float32)
    for h in range(NUM_HEADS):                            # static 4-way unroll
        lo = h * HEAD_DIM
        qh = qkv[:, lo:lo + HEAD_DIM]
        kh = qkv[:, D + lo:D + lo + HEAD_DIM]
        vh = qkv[:, 2 * D + lo:2 * D + lo + HEAD_DIM]
        # contract last dims of q and k (no explicit .T / relayout)
        s = lax.dot_general(qh, kh, (((1,), (1,)), ((), ())),
                            preferred_element_type=jnp.float32) * scale      # (SP, SP)
        s = jnp.where(key_valid, s, -1e30)
        s = s - jnp.max(s, axis=-1, keepdims=True)
        e = jnp.exp(s)
        a = e / jnp.sum(e, axis=-1, keepdims=True)
        ctx_h = jnp.dot(a, vh, preferred_element_type=jnp.float32)           # (SP, hd)
        # distribute the output projection per head: sum_h ctx_h @ wo[h*hd:(h+1)*hd]
        attn = attn + jnp.dot(ctx_h, wo_ref[lo:lo + HEAD_DIM, :],
                              preferred_element_type=jnp.float32)
    attn = attn + vec(_R_BO)

    h1 = attn + x                                                            # residual 1
    h1n = _layernorm(h1, vec(_R_LN2G), vec(_R_LN2B), LN_EPS)
    ff = _gelu_exact(jnp.dot(h1n, w1_ref[...],
                             preferred_element_type=jnp.float32) + b1_ref[...])
    hidden = jnp.dot(ff, w2_ref[...],
                     preferred_element_type=jnp.float32) + vec(_R_B2) + h1   # (SP, D)

    # ---- classification head (LayerNorm is per-token -> only CLS row needed) -
    cls_h = hidden[0:1, :]                                                   # (1, D)
    y = _layernorm(cls_h, vec(_R_LNFG), vec(_R_LNFB), FINAL_LN_EPS)
    logits = jnp.dot(y, wc_ref[...], preferred_element_type=jnp.float32) + bc_ref[...]
    logits_ref[0] = logits                                                   # (1, NC)

    # per-example cross entropy (mean over batch is glue)
    m = jnp.max(logits, axis=-1, keepdims=True)
    lse = jnp.log(jnp.sum(jnp.exp(logits - m), axis=-1, keepdims=True)) + m
    logp = logits - lse
    lab = labels_ref[b]
    onehot = (lax.broadcasted_iota(jnp.int32, (1, NUM_CLASSES), 1) == lab
              ).astype(jnp.float32)
    loss_ref[0] = -jnp.sum(onehot * logp, axis=-1, keepdims=True)            # (1, 1)


# --------------------------- pallas_call wrapper ------------------------------
def run_fused_forward(labels, patches, w_pe, pos_t, mask_w, vecs,
                      wqkv, bqkv, wo, w1, b1, w2, wc, bc):
    B = patches.shape[0]
    grid_spec = pltpu.PrefetchScalarGridSpec(
        num_scalar_prefetch=1,            # labels -> SMEM
        grid=(B,),
        in_specs=[
            pl.BlockSpec((1, NUM_PATCHES, PATCH_DIM), lambda b, lab: (b, 0, 0)),
            pl.BlockSpec((PATCH_DIM, EMBED_DIM), lambda b, lab: (0, 0)),
            pl.BlockSpec((NUM_PATCHES, EMBED_DIM), lambda b, lab: (0, 0)),
            pl.BlockSpec((NUM_PATCHES, EMBED_DIM), lambda b, lab: (0, 0)),
            pl.BlockSpec((NUM_VEC_ROWS, EMBED_DIM), lambda b, lab: (0, 0)),
            pl.BlockSpec((EMBED_DIM, 3 * EMBED_DIM), lambda b, lab: (0, 0)),
            pl.BlockSpec((1, 3 * EMBED_DIM), lambda b, lab: (0, 0)),
            pl.BlockSpec((EMBED_DIM, EMBED_DIM), lambda b, lab: (0, 0)),
            pl.BlockSpec((EMBED_DIM, INTERMEDIATE), lambda b, lab: (0, 0)),
            pl.BlockSpec((1, INTERMEDIATE), lambda b, lab: (0, 0)),
            pl.BlockSpec((INTERMEDIATE, EMBED_DIM), lambda b, lab: (0, 0)),
            pl.BlockSpec((EMBED_DIM, NUM_CLASSES), lambda b, lab: (0, 0)),
            pl.BlockSpec((1, NUM_CLASSES), lambda b, lab: (0, 0)),
        ],
        out_specs=(
            pl.BlockSpec((1, 1, NUM_CLASSES), lambda b, lab: (b, 0, 0)),
            pl.BlockSpec((1, 1, 1), lambda b, lab: (b, 0, 0)),
        ),
    )
    logits3, loss3 = pl.pallas_call(
        fused_forward_kernel,
        grid_spec=grid_spec,
        out_shape=(jax.ShapeDtypeStruct((B, 1, NUM_CLASSES), jnp.float32),
                   jax.ShapeDtypeStruct((B, 1, 1), jnp.float32)),
        compiler_params=pltpu.CompilerParams(
            dimension_semantics=("parallel",)),   # batch axis -> both TCs on v7x
    )(labels, patches, w_pe, pos_t, mask_w, vecs,
      wqkv, bqkv, wo, w1, b1, w2, wc, bc)
    return logits3[:, 0, :], loss3[:, 0, 0]


# ------------------------------- model glue -----------------------------------
def init_params(key):
    ks = jax.random.split(key, 12)

    def lin(k, fan_in, fan_out):
        kw, kb = jax.random.split(k)
        w = jax.random.normal(kw, (fan_in, fan_out), jnp.float32) * 0.02
        b = jax.random.normal(kb, (1, fan_out), jnp.float32) * 0.02
        return w, b

    p = {}
    p["w_pe"], p["b_pe"] = lin(ks[0], PATCH_DIM, EMBED_DIM)
    p["cls_token"] = jax.random.normal(ks[1], (1, EMBED_DIM), jnp.float32) * 0.02
    p["mask_token"] = jax.random.normal(ks[2], (1, EMBED_DIM), jnp.float32) * 0.02
    p["pos"] = jax.random.normal(ks[3], (1, SEQ, EMBED_DIM), jnp.float32) * 0.02
    wq, bq = lin(ks[4], EMBED_DIM, EMBED_DIM)
    wk, bk = lin(ks[5], EMBED_DIM, EMBED_DIM)
    wv, bv = lin(ks[6], EMBED_DIM, EMBED_DIM)
    # fuse the three 64-wide projections into one 192-wide MXU push
    p["wqkv"] = jnp.concatenate([wq, wk, wv], axis=1)
    p["bqkv"] = jnp.concatenate([bq, bk, bv], axis=1)
    p["wo"], p["bo"] = lin(ks[7], EMBED_DIM, EMBED_DIM)
    p["ln1_g"] = jnp.ones((1, EMBED_DIM), jnp.float32)
    p["ln1_b"] = jnp.zeros((1, EMBED_DIM), jnp.float32)
    p["ln2_g"] = jnp.ones((1, EMBED_DIM), jnp.float32)
    p["ln2_b"] = jnp.zeros((1, EMBED_DIM), jnp.float32)
    p["w1"], p["b1"] = lin(ks[8], EMBED_DIM, INTERMEDIATE)
    p["w2"], p["b2"] = lin(ks[9], INTERMEDIATE, EMBED_DIM)
    p["lnf_g"] = jnp.ones((1, EMBED_DIM), jnp.float32)
    p["lnf_b"] = jnp.zeros((1, EMBED_DIM), jnp.float32)
    p["wc"], p["bc"] = lin(ks[10], EMBED_DIM, NUM_CLASSES)
    return p


@jax.jit
def beit_forward(params, image, labels, mask_key):
    B, H, W = image.shape
    nh, nw = H // PATCH_H, W // PATCH_W
    # Rearrange 'b (h p1) (w p2) -> b (h w) (p1 p2)'   (glue reshape, not compute)
    patches = image.reshape(B, nh, PATCH_H, nw, PATCH_W)
    patches = patches.transpose(0, 1, 3, 2, 4).reshape(B, nh * nw, PATCH_H * PATCH_W)

    pos = params["pos"]
    # view/permute/interpolate(identity)/flatten collapses to the transposed
    # patch position-embedding (module's broadcast quirk) -- parameter glue only.
    pos_t = jnp.transpose(pos[0, 1:, :])          # (Np, D), valid since Np == D
    pos_cls = pos[0, :1, :]                       # (1, D)

    # bool_masked_pos: random 0/1 over the Np patch tokens, shared across batch.
    mask_w = jax.random.randint(mask_key, (NUM_PATCHES, 1), 0, 2).astype(jnp.float32)
    mask_w = jnp.broadcast_to(mask_w, (NUM_PATCHES, EMBED_DIM))

    # Pack all (1, D) parameter rows into a single operand (order == _R_* indices).
    rows = [params["b_pe"], params["bo"], params["b2"],
            params["ln1_g"], params["ln1_b"], params["ln2_g"], params["ln2_b"],
            params["lnf_g"], params["lnf_b"],
            params["cls_token"], params["mask_token"], pos_cls]
    vecs = jnp.concatenate(
        rows + [jnp.zeros((NUM_VEC_ROWS - len(rows), EMBED_DIM), jnp.float32)], axis=0)

    # NOTE: BeitEncoder.forward applies the weight-shared layer NUM_LAYERS times
    # to the ORIGINAL embeddings, keeping only the last (identical) output, so a
    # single application reproduces the module's result exactly.
    logits, per_example_nll = run_fused_forward(
        labels.astype(jnp.int32), patches, params["w_pe"], pos_t, mask_w, vecs,
        params["wqkv"], params["bqkv"], params["wo"],
        params["w1"], params["b1"], params["w2"], params["wc"], params["bc"])

    loss = jnp.mean(per_example_nll)              # CrossEntropyLoss mean reduction
    return logits, loss


if __name__ == "__main__":
    key = jax.random.PRNGKey(0)
    pkey, ikey, lkey, mkey = jax.random.split(key, 4)
    params = init_params(pkey)
    image = jax.random.normal(ikey, (BATCH, IMAGE_H, IMAGE_W), jnp.float32)
    expected = jax.random.randint(lkey, (BATCH,), 0, NUM_CLASSES).astype(jnp.int32)

    logits, loss = beit_forward(params, image, expected, mkey)
    jax.block_until_ready((logits, loss))
    assert logits.shape == (BATCH, NUM_CLASSES)
    assert loss.shape == ()
    print("KERNEL_OK")
</pallas_src>

<mosaic_0001>
module attributes {stable_mosaic.version = 11 : i64} {
  func.func @fused_forward_kernel(%arg0: i32, %arg1: memref<2xi32, #tpu.memory_space<smem>>, %arg2: memref<1x64x64xf32, #tpu.memory_space<vmem>>, %arg3: memref<64x64xf32, #tpu.memory_space<vmem>>, %arg4: memref<64x64xf32, #tpu.memory_space<vmem>>, %arg5: memref<64x64xf32, #tpu.memory_space<vmem>>, %arg6: memref<16x64xf32, #tpu.memory_space<vmem>>, %arg7: memref<64x192xf32, #tpu.memory_space<vmem>>, %arg8: memref<1x192xf32, #tpu.memory_space<vmem>>, %arg9: memref<64x64xf32, #tpu.memory_space<vmem>>, %arg10: memref<64x128xf32, #tpu.memory_space<vmem>>, %arg11: memref<1x128xf32, #tpu.memory_space<vmem>>, %arg12: memref<128x64xf32, #tpu.memory_space<vmem>>, %arg13: memref<64x10xf32, #tpu.memory_space<vmem>>, %arg14: memref<1x10xf32, #tpu.memory_space<vmem>>, %arg15: memref<1x1x10xf32, #tpu.memory_space<vmem>>, %arg16: memref<1x1x1xf32, #tpu.memory_space<vmem>>) attributes {dimension_semantics = [#tpu.dimension_semantics<parallel>], iteration_bounds = array<i64: 2>, scalar_prefetch = 1 : i64, scratch_operands = 0 : i64, tpu.core_type = #tpu.core_type<tc>, window_params = [{transform_indices = @transform_0, window_bounds = array<i64: 1, 64, 64>}, {pipeline_mode = #tpu.pipeline_mode<synchronous>, transform_indices = @transform_1, window_bounds = array<i64: 64, 64>}, {pipeline_mode = #tpu.pipeline_mode<synchronous>, transform_indices = @transform_2, window_bounds = array<i64: 64, 64>}, {pipeline_mode = #tpu.pipeline_mode<synchronous>, transform_indices = @transform_3, window_bounds = array<i64: 64, 64>}, {pipeline_mode = #tpu.pipeline_mode<synchronous>, transform_indices = @transform_4, window_bounds = array<i64: 16, 64>}, {pipeline_mode = #tpu.pipeline_mode<synchronous>, transform_indices = @transform_5, window_bounds = array<i64: 64, 192>}, {pipeline_mode = #tpu.pipeline_mode<synchronous>, transform_indices = @transform_6, window_bounds = array<i64: 1, 192>}, {pipeline_mode = #tpu.pipeline_mode<synchronous>, transform_indices = @transform_7, window_bounds = array<i64: 64, 64>}, {pipeline_mode = #tpu.pipeline_mode<synchronous>, transform_indices = @transform_8, window_bounds = array<i64: 64, 128>}, {pipeline_mode = #tpu.pipeline_mode<synchronous>, transform_indices = @transform_9, window_bounds = array<i64: 1, 128>}, {pipeline_mode = #tpu.pipeline_mode<synchronous>, transform_indices = @transform_10, window_bounds = array<i64: 128, 64>}, {pipeline_mode = #tpu.pipeline_mode<synchronous>, transform_indices = @transform_11, window_bounds = array<i64: 64, 10>}, {pipeline_mode = #tpu.pipeline_mode<synchronous>, transform_indices = @transform_12, window_bounds = array<i64: 1, 10>}, {transform_indices = @transform_13, window_bounds = array<i64: 1, 1, 10>}, {transform_indices = @transform_14, window_bounds = array<i64: 1, 1, 1>}]} {
    %c0 = arith.constant 0 : index
    %c0_0 = arith.constant 0 : index
    %c0_1 = arith.constant 0 : index
    %0 = vector.load %arg2[%c0, %c0_0, %c0_1] : memref<1x64x64xf32, #tpu.memory_space<vmem>>, vector<1x64x64xf32>
    %1 = vector.shape_cast %0 : vector<1x64x64xf32> to vector<64x64xf32>
    %c0_2 = arith.constant 0 : index
    %c0_3 = arith.constant 0 : index
    %2 = vector.load %arg3[%c0_2, %c0_3] : memref<64x64xf32, #tpu.memory_space<vmem>>, vector<64x64xf32>
    %cst = arith.constant dense<0.000000e+00> : vector<64x64xf32>
    %3 = tpu.matmul %1, %2, %cst {dimension_numbers = #tpu.dot_dimension_numbers<[1], [0], [0], [1], [0, 0, 1, 1], [], []>} : vector<64x64xf32>, vector<64x64xf32>, vector<64x64xf32> -> vector<64x64xf32>
    %c0_4 = arith.constant 0 : index
    %c0_5 = arith.constant 0 : index
    %4 = vector.load %arg6[%c0_4, %c0_5] : memref<16x64xf32, #tpu.memory_space<vmem>>, vector<1x64xf32>
    %5 = vector.broadcast %4 : vector<1x64xf32> to vector<64x64xf32>
    %6 = arith.addf %3, %5 : vector<64x64xf32>
    %c0_6 = arith.constant 0 : index
    %c0_7 = arith.constant 0 : index
    %7 = vector.load %arg4[%c0_6, %c0_7] : memref<64x64xf32, #tpu.memory_space<vmem>>, vector<64x64xf32>
    %8 = arith.addf %6, %7 : vector<64x64xf32>
    %c0_8 = arith.constant 0 : index
    %c0_9 = arith.constant 0 : index
    %9 = vector.load %arg5[%c0_8, %c0_9] : memref<64x64xf32, #tpu.memory_space<vmem>>, vector<64x64xf32>
    %cst_10 = arith.constant 1.000000e+00 : f32
    %10 = vector.broadcast %cst_10 : f32 to vector<64x64xf32>
    %11 = arith.subf %10, %9 : vector<64x64xf32>
    %12 = arith.mulf %8, %11 : vector<64x64xf32>
    %c10 = arith.constant 10 : index
    %c0_11 = arith.constant 0 : index
    %13 = vector.load %arg6[%c10, %c0_11] : memref<16x64xf32, #tpu.memory_space<vmem>>, vector<1x64xf32>
    %14 = vector.broadcast %13 : vector<1x64xf32> to vector<64x64xf32>
    %15 = arith.mulf %14, %9 : vector<64x64xf32>
    %16 = arith.addf %12, %15 : vector<64x64xf32>
    %c9 = arith.constant 9 : index
    %c0_12 = arith.constant 0 : index
    %17 = vector.load %arg6[%c9, %c0_12] : memref<16x64xf32, #tpu.memory_space<vmem>>, vector<1x64xf32>
    %c11 = arith.constant 11 : index
    %c0_13 = arith.constant 0 : index
    %18 = vector.load %arg6[%c11, %c0_13] : memref<16x64xf32, #tpu.memory_space<vmem>>, vector<1x64xf32>
    %19 = arith.addf %17, %18 : vector<1x64xf32>
    %cst_14 = arith.constant 0.000000e+00 : f32
    %20 = vector.broadcast %cst_14 : f32 to vector<7x64xf32>
    %21 = tpu.concatenate %19, %16, %20 in 0 : vector<1x64xf32>, vector<64x64xf32>, vector<7x64xf32> -> vector<72x64xf32>
    %c3 = arith.constant 3 : index
    %c0_15 = arith.constant 0 : index
    %22 = vector.load %arg6[%c3, %c0_15] : memref<16x64xf32, #tpu.memory_space<vmem>>, vector<1x64xf32>
    %c4 = arith.constant 4 : index
    %c0_16 = arith.constant 0 : index
    %23 = vector.load %arg6[%c4, %c0_16] : memref<16x64xf32, #tpu.memory_space<vmem>>, vector<1x64xf32>
    %cst_17 = arith.constant dense<0.000000e+00> : vector<72xf32>
    %24 = vector.multi_reduction <add>, %21, %cst_17 [1] : vector<72x64xf32> to vector<72xf32>
    %25 = vector.shape_cast %24 : vector<72xf32> to vector<72x1xf32>
    %cst_18 = arith.constant 6.400000e+01 : f32
    %26 = vector.broadcast %cst_18 : f32 to vector<72x1xf32>
    %27 = arith.divf %25, %26 : vector<72x1xf32>
    %28 = vector.broadcast %27 : vector<72x1xf32> to vector<72x64xf32>
    %29 = arith.subf %21, %28 : vector<72x64xf32>
    %30 = arith.mulf %29, %29 : vector<72x64xf32>
    %cst_19 = arith.constant dense<0.000000e+00> : vector<72xf32>
    %31 = vector.multi_reduction <add>, %30, %cst_19 [1] : vector<72x64xf32> to vector<72xf32>
    %32 = vector.shape_cast %31 : vector<72xf32> to vector<72x1xf32>
    %cst_20 = arith.constant 6.400000e+01 : f32
    %33 = vector.broadcast %cst_20 : f32 to vector<72x1xf32>
    %34 = arith.divf %32, %33 : vector<72x1xf32>
    %35 = vector.broadcast %27 : vector<72x1xf32> to vector<72x64xf32>
    %36 = arith.subf %21, %35 : vector<72x64xf32>
    %cst_21 = arith.constant 9.99999974E-6 : f32
    %37 = vector.broadcast %cst_21 : f32 to vector<72x1xf32>
    %38 = arith.addf %34, %37 : vector<72x1xf32>
    %39 = math.rsqrt %38 : vector<72x1xf32>
    %40 = vector.broadcast %39 : vector<72x1xf32> to vector<72x64xf32>
    %41 = arith.mulf %36, %40 : vector<72x64xf32>
    %42 = vector.broadcast %22 : vector<1x64xf32> to vector<72x64xf32>
    %43 = arith.mulf %41, %42 : vector<72x64xf32>
    %44 = vector.broadcast %23 : vector<1x64xf32> to vector<72x64xf32>
    %45 = arith.addf %43, %44 : vector<72x64xf32>
    %c0_22 = arith.constant 0 : index
    %c0_23 = arith.constant 0 : index
    %46 = vector.load %arg7[%c0_22, %c0_23] : memref<64x192xf32, #tpu.memory_space<vmem>>, vector<64x192xf32>
    %cst_24 = arith.constant dense<0.000000e+00> : vector<72x192xf32>
    %47 = tpu.matmul %45, %46, %cst_24 {dimension_numbers = #tpu.dot_dimension_numbers<[1], [0], [0], [1], [0, 0, 1, 1], [], []>} : vector<72x64xf32>, vector<64x192xf32>, vector<72x192xf32> -> vector<72x192xf32>
    %c0_25 = arith.constant 0 : index
    %c0_26 = arith.constant 0 : index
    %48 = vector.load %arg8[%c0_25, %c0_26] : memref<1x192xf32, #tpu.memory_space<vmem>>, vector<1x192xf32>
    %49 = vector.broadcast %48 : vector<1x192xf32> to vector<72x192xf32>
    %50 = arith.addf %47, %49 : vector<72x192xf32>
    %51 = tpu.iota {dimensions = array<i32: 1>} : vector<1x72xi32>
    %c65_i32 = arith.constant 65 : i32
    %52 = vector.broadcast %c65_i32 : i32 to vector<1x72xi32>
    %53 = arith.cmpi slt, %51, %52 : vector<1x72xi32>
    %cst_27 = arith.constant 0.000000e+00 : f32
    %54 = vector.broadcast %cst_27 : f32 to vector<72x64xf32>
    %55 = vector.extract_strided_slice %50 {offsets = [0, 0], sizes = [72, 16], strides = [1, 1]} : vector<72x192xf32> to vector<72x16xf32>
    %56 = vector.extract_strided_slice %50 {offsets = [0, 64], sizes = [72, 16], strides = [1, 1]} : vector<72x192xf32> to vector<72x16xf32>
    %57 = vector.extract_strided_slice %50 {offsets = [0, 128], sizes = [72, 16], strides = [1, 1]} : vector<72x192xf32> to vector<72x16xf32>
    %cst_28 = arith.constant dense<0.000000e+00> : vector<72x72xf32>
    %58 = tpu.matmul %55, %56, %cst_28 {dimension_numbers = #tpu.dot_dimension_numbers<[1], [1], [0], [0], [0, 0, 1, 0], [], []>} : vector<72x16xf32>, vector<72x16xf32>, vector<72x72xf32> -> vector<72x72xf32>
    %cst_29 = arith.constant 2.500000e-01 : f32
    %59 = vector.broadcast %cst_29 : f32 to vector<72x72xf32>
    %60 = arith.mulf %58, %59 : vector<72x72xf32>
    %cst_30 = arith.constant -1.000000e+30 : f32
    %61 = vector.shape_cast %53 : vector<1x72xi1> to vector<1x72xi1>
    %62 = vector.broadcast %61 : vector<1x72xi1> to vector<72x72xi1>
    %63 = vector.broadcast %cst_30 : f32 to vector<72x72xf32>
    %64 = arith.select %62, %60, %63 : vector<72x72xi1>, vector<72x72xf32>
    %cst_31 = arith.constant dense<0xFF800000> : vector<72xf32>
    %65 = vector.multi_reduction <maximumf>, %64, %cst_31 [1] : vector<72x72xf32> to vector<72xf32>
    %66 = vector.shape_cast %65 : vector<72xf32> to vector<72x1xf32>
    %67 = vector.broadcast %66 : vector<72x1xf32> to vector<72x72xf32>
    %68 = arith.subf %64, %67 : vector<72x72xf32>
    %69 = math.exp %68 : vector<72x72xf32>
    %cst_32 = arith.constant dense<0.000000e+00> : vector<72xf32>
    %70 = vector.multi_reduction <add>, %69, %cst_32 [1] : vector<72x72xf32> to vector<72xf32>
    %71 = vector.shape_cast %70 : vector<72xf32> to vector<72x1xf32>
    %72 = vector.broadcast %71 : vector<72x1xf32> to vector<72x72xf32>
    %73 = arith.divf %69, %72 : vector<72x72xf32>
    %cst_33 = arith.constant dense<0.000000e+00> : vector<72x16xf32>
    %74 = tpu.matmul %73, %57, %cst_33 {dimension_numbers = #tpu.dot_dimension_numbers<[1], [0], [0], [1], [0, 0, 1, 1], [], []>} : vector<72x72xf32>, vector<72x16xf32>, vector<72x16xf32> -> vector<72x16xf32>
    %c0_34 = arith.constant 0 : index
    %c0_35 = arith.constant 0 : index
    %75 = vector.load %arg9[%c0_34, %c0_35] : memref<64x64xf32, #tpu.memory_space<vmem>>, vector<16x64xf32>
    %cst_36 = arith.constant dense<0.000000e+00> : vector<72x64xf32>
    %76 = tpu.matmul %74, %75, %cst_36 {dimension_numbers = #tpu.dot_dimension_numbers<[1], [0], [0], [1], [0, 0, 1, 1], [], []>} : vector<72x16xf32>, vector<16x64xf32>, vector<72x64xf32> -> vector<72x64xf32>
    %77 = arith.addf %54, %76 : vector<72x64xf32>
    %78 = vector.extract_strided_slice %50 {offsets = [0, 16], sizes = [72, 16], strides = [1, 1]} : vector<72x192xf32> to vector<72x16xf32>
    %79 = vector.extract_strided_slice %50 {offsets = [0, 80], sizes = [72, 16], strides = [1, 1]} : vector<72x192xf32> to vector<72x16xf32>
    %80 = vector.extract_strided_slice %50 {offsets = [0, 144], sizes = [72, 16], strides = [1, 1]} : vector<72x192xf32> to vector<72x16xf32>
    %cst_37 = arith.constant dense<0.000000e+00> : vector<72x72xf32>
    %81 = tpu.matmul %78, %79, %cst_37 {dimension_numbers = #tpu.dot_dimension_numbers<[1], [1], [0], [0], [0, 0, 1, 0], [], []>} : vector<72x16xf32>, vector<72x16xf32>, vector<72x72xf32> -> vector<72x72xf32>
    %cst_38 = arith.constant 2.500000e-01 : f32
    %82 = vector.broadcast %cst_38 : f32 to vector<72x72xf32>
    %83 = arith.mulf %81, %82 : vector<72x72xf32>
    %cst_39 = arith.constant -1.000000e+30 : f32
    %84 = vector.shape_cast %53 : vector<1x72xi1> to vector<1x72xi1>
    %85 = vector.broadcast %84 : vector<1x72xi1> to vector<72x72xi1>
    %86 = vector.broadcast %cst_39 : f32 to vector<72x72xf32>
    %87 = arith.select %85, %83, %86 : vector<72x72xi1>, vector<72x72xf32>
    %cst_40 = arith.constant dense<0xFF800000> : vector<72xf32>
    %88 = vector.multi_reduction <maximumf>, %87, %cst_40 [1] : vector<72x72xf32> to vector<72xf32>
    %89 = vector.shape_cast %88 : vector<72xf32> to vector<72x1xf32>
    %90 = vector.broadcast %89 : vector<72x1xf32> to vector<72x72xf32>
    %91 = arith.subf %87, %90 : vector<72x72xf32>
    %92 = math.exp %91 : vector<72x72xf32>
    %cst_41 = arith.constant dense<0.000000e+00> : vector<72xf32>
    %93 = vector.multi_reduction <add>, %92, %cst_41 [1] : vector<72x72xf32> to vector<72xf32>
    %94 = vector.shape_cast %93 : vector<72xf32> to vector<72x1xf32>
    %95 = vector.broadcast %94 : vector<72x1xf32> to vector<72x72xf32>
    %96 = arith.divf %92, %95 : vector<72x72xf32>
    %cst_42 = arith.constant dense<0.000000e+00> : vector<72x16xf32>
    %97 = tpu.matmul %96, %80, %cst_42 {dimension_numbers = #tpu.dot_dimension_numbers<[1], [0], [0], [1], [0, 0, 1, 1], [], []>} : vector<72x72xf32>, vector<72x16xf32>, vector<72x16xf32> -> vector<72x16xf32>
    %c16 = arith.constant 16 : index
    %c0_43 = arith.constant 0 : index
    %98 = vector.load %arg9[%c16, %c0_43] : memref<64x64xf32, #tpu.memory_space<vmem>>, vector<16x64xf32>
    %cst_44 = arith.constant dense<0.000000e+00> : vector<72x64xf32>
    %99 = tpu.matmul %97, %98, %cst_44 {dimension_numbers = #tpu.dot_dimension_numbers<[1], [0], [0], [1], [0, 0, 1, 1], [], []>} : vector<72x16xf32>, vector<16x64xf32>, vector<72x64xf32> -> vector<72x64xf32>
    %100 = arith.addf %77, %99 : vector<72x64xf32>
    %101 = vector.extract_strided_slice %50 {offsets = [0, 32], sizes = [72, 16], strides = [1, 1]} : vector<72x192xf32> to vector<72x16xf32>
    %102 = vector.extract_strided_slice %50 {offsets = [0, 96], sizes = [72, 16], strides = [1, 1]} : vector<72x192xf32> to vector<72x16xf32>
    %103 = vector.extract_strided_slice %50 {offsets = [0, 160], sizes = [72, 16], strides = [1, 1]} : vector<72x192xf32> to vector<72x16xf32>
    %cst_45 = arith.constant dense<0.000000e+00> : vector<72x72xf32>
    %104 = tpu.matmul %101, %102, %cst_45 {dimension_numbers = #tpu.dot_dimension_numbers<[1], [1], [0], [0], [0, 0, 1, 0], [], []>} : vector<72x16xf32>, vector<72x16xf32>, vector<72x72xf32> -> vector<72x72xf32>
    %cst_46 = arith.constant 2.500000e-01 : f32
    %105 = vector.broadcast %cst_46 : f32 to vector<72x72xf32>
    %106 = arith.mulf %104, %105 : vector<72x72xf32>
    %cst_47 = arith.constant -1.000000e+30 : f32
    %107 = vector.shape_cast %53 : vector<1x72xi1> to vector<1x72xi1>
    %108 = vector.broadcast %107 : vector<1x72xi1> to vector<72x72xi1>
    %109 = vector.broadcast %cst_47 : f32 to vector<72x72xf32>
    %110 = arith.select %108, %106, %109 : vector<72x72xi1>, vector<72x72xf32>
    %cst_48 = arith.constant dense<0xFF800000> : vector<72xf32>
    %111 = vector.multi_reduction <maximumf>, %110, %cst_48 [1] : vector<72x72xf32> to vector<72xf32>
    %112 = vector.shape_cast %111 : vector<72xf32> to vector<72x1xf32>
    %113 = vector.broadcast %112 : vector<72x1xf32> to vector<72x72xf32>
    %114 = arith.subf %110, %113 : vector<72x72xf32>
    %115 = math.exp %114 : vector<72x72xf32>
    %cst_49 = arith.constant dense<0.000000e+00> : vector<72xf32>
    %116 = vector.multi_reduction <add>, %115, %cst_49 [1] : vector<72x72xf32> to vector<72xf32>
    %117 = vector.shape_cast %116 : vector<72xf32> to vector<72x1xf32>
    %118 = vector.broadcast %117 : vector<72x1xf32> to vector<72x72xf32>
    %119 = arith.divf %115, %118 : vector<72x72xf32>
    %cst_50 = arith.constant dense<0.000000e+00> : vector<72x16xf32>
    %120 = tpu.matmul %119, %103, %cst_50 {dimension_numbers = #tpu.dot_dimension_numbers<[1], [0], [0], [1], [0, 0, 1, 1], [], []>} : vector<72x72xf32>, vector<72x16xf32>, vector<72x16xf32> -> vector<72x16xf32>
    %c32 = arith.constant 32 : index
    %c0_51 = arith.constant 0 : index
    %121 = vector.load %arg9[%c32, %c0_51] : memref<64x64xf32, #tpu.memory_space<vmem>>, vector<16x64xf32>
    %cst_52 = arith.constant dense<0.000000e+00> : vector<72x64xf32>
    %122 = tpu.matmul %120, %121, %cst_52 {dimension_numbers = #tpu.dot_dimension_numbers<[1], [0], [0], [1], [0, 0, 1, 1], [], []>} : vector<72x16xf32>, vector<16x64xf32>, vector<72x64xf32> -> vector<72x64xf32>
    %123 = arith.addf %100, %122 : vector<72x64xf32>
    %124 = vector.extract_strided_slice %50 {offsets = [0, 48], sizes = [72, 16], strides = [1, 1]} : vector<72x192xf32> to vector<72x16xf32>
    %125 = vector.extract_strided_slice %50 {offsets = [0, 112], sizes = [72, 16], strides = [1, 1]} : vector<72x192xf32> to vector<72x16xf32>
    %126 = vector.extract_strided_slice %50 {offsets = [0, 176], sizes = [72, 16], strides = [1, 1]} : vector<72x192xf32> to vector<72x16xf32>
    %cst_53 = arith.constant dense<0.000000e+00> : vector<72x72xf32>
    %127 = tpu.matmul %124, %125, %cst_53 {dimension_numbers = #tpu.dot_dimension_numbers<[1], [1], [0], [0], [0, 0, 1, 0], [], []>} : vector<72x16xf32>, vector<72x16xf32>, vector<72x72xf32> -> vector<72x72xf32>
    %cst_54 = arith.constant 2.500000e-01 : f32
    %128 = vector.broadcast %cst_54 : f32 to vector<72x72xf32>
    %129 = arith.mulf %127, %128 : vector<72x72xf32>
    %cst_55 = arith.constant -1.000000e+30 : f32
    %130 = vector.shape_cast %53 : vector<1x72xi1> to vector<1x72xi1>
    %131 = vector.broadcast %130 : vector<1x72xi1> to vector<72x72xi1>
    %132 = vector.broadcast %cst_55 : f32 to vector<72x72xf32>
    %133 = arith.select %131, %129, %132 : vector<72x72xi1>, vector<72x72xf32>
    %cst_56 = arith.constant dense<0xFF800000> : vector<72xf32>
    %134 = vector.multi_reduction <maximumf>, %133, %cst_56 [1] : vector<72x72xf32> to vector<72xf32>
    %135 = vector.shape_cast %134 : vector<72xf32> to vector<72x1xf32>
    %136 = vector.broadcast %135 : vector<72x1xf32> to vector<72x72xf32>
    %137 = arith.subf %133, %136 : vector<72x72xf32>
    %138 = math.exp %137 : vector<72x72xf32>
    %cst_57 = arith.constant dense<0.000000e+00> : vector<72xf32>
    %139 = vector.multi_reduction <add>, %138, %cst_57 [1] : vector<72x72xf32> to vector<72xf32>
    %140 = vector.shape_cast %139 : vector<72xf32> to vector<72x1xf32>
    %141 = vector.broadcast %140 : vector<72x1xf32> to vector<72x72xf32>
    %142 = arith.divf %138, %141 : vector<72x72xf32>
    %cst_58 = arith.constant dense<0.000000e+00> : vector<72x16xf32>
    %143 = tpu.matmul %142, %126, %cst_58 {dimension_numbers = #tpu.dot_dimension_numbers<[1], [0], [0], [1], [0, 0, 1, 1], [], []>} : vector<72x72xf32>, vector<72x16xf32>, vector<72x16xf32> -> vector<72x16xf32>
    %c48 = arith.constant 48 : index
    %c0_59 = arith.constant 0 : index
    %144 = vector.load %arg9[%c48, %c0_59] : memref<64x64xf32, #tpu.memory_space<vmem>>, vector<16x64xf32>
    %cst_60 = arith.constant dense<0.000000e+00> : vector<72x64xf32>
    %145 = tpu.matmul %143, %144, %cst_60 {dimension_numbers = #tpu.dot_dimension_numbers<[1], [0], [0], [1], [0, 0, 1, 1], [], []>} : vector<72x16xf32>, vector<16x64xf32>, vector<72x64xf32> -> vector<72x64xf32>
    %146 = arith.addf %123, %145 : vector<72x64xf32>
    %c1 = arith.constant 1 : index
    %c0_61 = arith.constant 0 : index
    %147 = vector.load %arg6[%c1, %c0_61] : memref<16x64xf32, #tpu.memory_space<vmem>>, vector<1x64xf32>
    %148 = vector.broadcast %147 : vector<1x64xf32> to vector<72x64xf32>
    %149 = arith.addf %146, %148 : vector<72x64xf32>
    %150 = arith.addf %149, %21 : vector<72x64xf32>
    %c5 = arith.constant 5 : index
    %c0_62 = arith.constant 0 : index
    %151 = vector.load %arg6[%c5, %c0_62] : memref<16x64xf32, #tpu.memory_space<vmem>>, vector<1x64xf32>
    %c6 = arith.constant 6 : index
    %c0_63 = arith.constant 0 : index
    %152 = vector.load %arg6[%c6, %c0_63] : memref<16x64xf32, #tpu.memory_space<vmem>>, vector<1x64xf32>
    %cst_64 = arith.constant dense<0.000000e+00> : vector<72xf32>
    %153 = vector.multi_reduction <add>, %150, %cst_64 [1] : vector<72x64xf32> to vector<72xf32>
    %154 = vector.shape_cast %153 : vector<72xf32> to vector<72x1xf32>
    %cst_65 = arith.constant 6.400000e+01 : f32
    %155 = vector.broadcast %cst_65 : f32 to vector<72x1xf32>
    %156 = arith.divf %154, %155 : vector<72x1xf32>
    %157 = vector.broadcast %156 : vector<72x1xf32> to vector<72x64xf32>
    %158 = arith.subf %150, %157 : vector<72x64xf32>
    %159 = arith.mulf %158, %158 : vector<72x64xf32>
    %cst_66 = arith.constant dense<0.000000e+00> : vector<72xf32>
    %160 = vector.multi_reduction <add>, %159, %cst_66 [1] : vector<72x64xf32> to vector<72xf32>
    %161 = vector.shape_cast %160 : vector<72xf32> to vector<72x1xf32>
    %cst_67 = arith.constant 6.400000e+01 : f32
    %162 = vector.broadcast %cst_67 : f32 to vector<72x1xf32>
    %163 = arith.divf %161, %162 : vector<72x1xf32>
    %164 = vector.broadcast %156 : vector<72x1xf32> to vector<72x64xf32>
    %165 = arith.subf %150, %164 : vector<72x64xf32>
    %cst_68 = arith.constant 9.99999974E-6 : f32
    %166 = vector.broadcast %cst_68 : f32 to vector<72x1xf32>
    %167 = arith.addf %163, %166 : vector<72x1xf32>
    %168 = math.rsqrt %167 : vector<72x1xf32>
    %169 = vector.broadcast %168 : vector<72x1xf32> to vector<72x64xf32>
    %170 = arith.mulf %165, %169 : vector<72x64xf32>
    %171 = vector.broadcast %151 : vector<1x64xf32> to vector<72x64xf32>
    %172 = arith.mulf %170, %171 : vector<72x64xf32>
    %173 = vector.broadcast %152 : vector<1x64xf32> to vector<72x64xf32>
    %174 = arith.addf %172, %173 : vector<72x64xf32>
    %c0_69 = arith.constant 0 : index
    %c0_70 = arith.constant 0 : index
    %175 = vector.load %arg10[%c0_69, %c0_70] : memref<64x128xf32, #tpu.memory_space<vmem>>, vector<64x128xf32>
    %cst_71 = arith.constant dense<0.000000e+00> : vector<72x128xf32>
    %176 = tpu.matmul %174, %175, %cst_71 {dimension_numbers = #tpu.dot_dimension_numbers<[1], [0], [0], [1], [0, 0, 1, 1], [], []>} : vector<72x64xf32>, vector<64x128xf32>, vector<72x128xf32> -> vector<72x128xf32>
    %c0_72 = arith.constant 0 : index
    %c0_73 = arith.constant 0 : index
    %177 = vector.load %arg11[%c0_72, %c0_73] : memref<1x128xf32, #tpu.memory_space<vmem>>, vector<1x128xf32>
    %178 = vector.broadcast %177 : vector<1x128xf32> to vector<72x128xf32>
    %179 = arith.addf %176, %178 : vector<72x128xf32>
    %cst_74 = arith.constant 5.000000e-01 : f32
    %180 = vector.broadcast %cst_74 : f32 to vector<72x128xf32>
    %181 = arith.mulf %180, %179 : vector<72x128xf32>
    %cst_75 = arith.constant 0.707106769 : f32
    %182 = vector.broadcast %cst_75 : f32 to vector<72x128xf32>
    %183 = arith.mulf %179, %182 : vector<72x128xf32>
    %184 = math.absf %183 : vector<72x128xf32>
    %cst_76 = arith.constant 0.327591091 : f32
    %185 = vector.broadcast %cst_76 : f32 to vector<72x128xf32>
    %186 = arith.mulf %185, %184 : vector<72x128xf32>
    %cst_77 = arith.constant 1.000000e+00 : f32
    %187 = vector.broadcast %cst_77 : f32 to vector<72x128xf32>
    %188 = arith.addf %187, %186 : vector<72x128xf32>
    %cst_78 = arith.constant 1.000000e+00 : f32
    %189 = vector.broadcast %cst_78 : f32 to vector<72x128xf32>
    %190 = arith.divf %189, %188 : vector<72x128xf32>
    %cst_79 = arith.constant 1.06140542 : f32
    %191 = vector.broadcast %cst_79 : f32 to vector<72x128xf32>
    %192 = arith.mulf %191, %190 : vector<72x128xf32>
    %cst_80 = arith.constant -1.45315206 : f32
    %193 = vector.broadcast %cst_80 : f32 to vector<72x128xf32>
    %194 = arith.addf %192, %193 : vector<72x128xf32>
    %195 = arith.mulf %194, %190 : vector<72x128xf32>
    %cst_81 = arith.constant 1.42141378 : f32
    %196 = vector.broadcast %cst_81 : f32 to vector<72x128xf32>
    %197 = arith.addf %195, %196 : vector<72x128xf32>
    %198 = arith.mulf %197, %190 : vector<72x128xf32>
    %cst_82 = arith.constant -0.284496725 : f32
    %199 = vector.broadcast %cst_82 : f32 to vector<72x128xf32>
    %200 = arith.addf %198, %199 : vector<72x128xf32>
    %201 = arith.mulf %200, %190 : vector<72x128xf32>
    %cst_83 = arith.constant 0.254829586 : f32
    %202 = vector.broadcast %cst_83 : f32 to vector<72x128xf32>
    %203 = arith.addf %201, %202 : vector<72x128xf32>
    %204 = arith.mulf %203, %190 : vector<72x128xf32>
    %cst_84 = arith.constant 0.000000e+00 : f32
    %205 = vector.broadcast %cst_84 : f32 to vector<72x128xf32>
    %206 = arith.subf %205, %184 : vector<72x128xf32>
    %207 = arith.mulf %206, %184 : vector<72x128xf32>
    %208 = math.exp %207 : vector<72x128xf32>
    %209 = arith.mulf %204, %208 : vector<72x128xf32>
    %cst_85 = arith.constant 1.000000e+00 : f32
    %210 = vector.broadcast %cst_85 : f32 to vector<72x128xf32>
    %211 = arith.subf %210, %209 : vector<72x128xf32>
    %cst_86 = arith.constant 0.000000e+00 : f32
    %212 = vector.broadcast %cst_86 : f32 to vector<72x128xf32>
    %213 = arith.cmpf olt, %183, %212 : vector<72x128xf32>
    %cst_87 = arith.constant 0.000000e+00 : f32
    %214 = vector.broadcast %cst_87 : f32 to vector<72x128xf32>
    %215 = arith.subf %214, %211 : vector<72x128xf32>
    %216 = arith.select %213, %215, %211 : vector<72x128xi1>, vector<72x128xf32>
    %cst_88 = arith.constant 1.000000e+00 : f32
    %217 = vector.broadcast %cst_88 : f32 to vector<72x128xf32>
    %218 = arith.addf %217, %216 : vector<72x128xf32>
    %219 = arith.mulf %181, %218 : vector<72x128xf32>
    %c0_89 = arith.constant 0 : index
    %c0_90 = arith.constant 0 : index
    %220 = vector.load %arg12[%c0_89, %c0_90] : memref<128x64xf32, #tpu.memory_space<vmem>>, vector<128x64xf32>
    %cst_91 = arith.constant dense<0.000000e+00> : vector<72x64xf32>
    %221 = tpu.matmul %219, %220, %cst_91 {dimension_numbers = #tpu.dot_dimension_numbers<[1], [0], [0], [1], [0, 0, 1, 1], [], []>} : vector<72x128xf32>, vector<128x64xf32>, vector<72x64xf32> -> vector<72x64xf32>
    %c2 = arith.constant 2 : index
    %c0_92 = arith.constant 0 : index
    %222 = vector.load %arg6[%c2, %c0_92] : memref<16x64xf32, #tpu.memory_space<vmem>>, vector<1x64xf32>
    %223 = vector.broadcast %222 : vector<1x64xf32> to vector<72x64xf32>
    %224 = arith.addf %221, %223 : vector<72x64xf32>
    %225 = arith.addf %224, %150 : vector<72x64xf32>
    %226 = vector.extract_strided_slice %225 {offsets = [0, 0], sizes = [1, 64], strides = [1, 1]} : vector<72x64xf32> to vector<1x64xf32>
    %c7 = arith.constant 7 : index
    %c0_93 = arith.constant 0 : index
    %227 = vector.load %arg6[%c7, %c0_93] : memref<16x64xf32, #tpu.memory_space<vmem>>, vector<1x64xf32>
    %c8 = arith.constant 8 : index
    %c0_94 = arith.constant 0 : index
    %228 = vector.load %arg6[%c8, %c0_94] : memref<16x64xf32, #tpu.memory_space<vmem>>, vector<1x64xf32>
    %cst_95 = arith.constant dense<0.000000e+00> : vector<1xf32>
    %229 = vector.multi_reduction <add>, %226, %cst_95 [1] : vector<1x64xf32> to vector<1xf32>
    %230 = vector.shape_cast %229 : vector<1xf32> to vector<1x1xf32>
    %cst_96 = arith.constant 6.400000e+01 : f32
    %231 = vector.broadcast %cst_96 : f32 to vector<1x1xf32>
    %232 = arith.divf %230, %231 : vector<1x1xf32>
    %233 = vector.broadcast %232 : vector<1x1xf32> to vector<1x64xf32>
    %234 = arith.subf %226, %233 : vector<1x64xf32>
    %235 = arith.mulf %234, %234 : vector<1x64xf32>
    %cst_97 = arith.constant dense<0.000000e+00> : vector<1xf32>
    %236 = vector.multi_reduction <add>, %235, %cst_97 [1] : vector<1x64xf32> to vector<1xf32>
    %237 = vector.shape_cast %236 : vector<1xf32> to vector<1x1xf32>
    %cst_98 = arith.constant 6.400000e+01 : f32
    %238 = vector.broadcast %cst_98 : f32 to vector<1x1xf32>
    %239 = arith.divf %237, %238 : vector<1x1xf32>
    %240 = vector.broadcast %232 : vector<1x1xf32> to vector<1x64xf32>
    %241 = arith.subf %226, %240 : vector<1x64xf32>
    %cst_99 = arith.constant 6.400000e+01 : f32
    %242 = vector.broadcast %cst_99 : f32 to vector<1x1xf32>
    %243 = arith.addf %239, %242 : vector<1x1xf32>
    %244 = math.rsqrt %243 : vector<1x1xf32>
    %245 = vector.broadcast %244 : vector<1x1xf32> to vector<1x64xf32>
    %246 = arith.mulf %241, %245 : vector<1x64xf32>
    %247 = arith.mulf %246, %227 : vector<1x64xf32>
    %248 = arith.addf %247, %228 : vector<1x64xf32>
    %c0_100 = arith.constant 0 : index
    %c0_101 = arith.constant 0 : index
    %249 = vector.load %arg13[%c0_100, %c0_101] : memref<64x10xf32, #tpu.memory_space<vmem>>, vector<64x10xf32>
    %cst_102 = arith.constant dense<0.000000e+00> : vector<1x10xf32>
    %250 = tpu.matmul %248, %249, %cst_102 {dimension_numbers = #tpu.dot_dimension_numbers<[1], [0], [0], [1], [0, 0, 1, 1], [], []>} : vector<1x64xf32>, vector<64x10xf32>, vector<1x10xf32> -> vector<1x10xf32>
    %c0_103 = arith.constant 0 : index
    %c0_104 = arith.constant 0 : index
    %251 = vector.load %arg14[%c0_103, %c0_104] : memref<1x10xf32, #tpu.memory_space<vmem>>, vector<1x10xf32>
    %252 = arith.addf %250, %251 : vector<1x10xf32>
    %c0_105 = arith.constant 0 : index
    %c0_106 = arith.constant 0 : index
    %c0_107 = arith.constant 0 : index
    %253 = vector.load %arg15[%c0_105, %c0_106, %c0_107] : memref<1x1x10xf32, #tpu.memory_space<vmem>>, vector<1x1x10xf32>
    %254 = vector.shape_cast %253 : vector<1x1x10xf32> to vector<1x10xf32>
    %255 = vector.shape_cast %252 : vector<1x10xf32> to vector<1x1x10xf32>
    tpu.vector_store %arg15[%c0_105, %c0_106, %c0_107], %255 {strides = array<i32>} : memref<1x1x10xf32, #tpu.memory_space<vmem>>, vector<1x1x10xf32>,
    %cst_108 = arith.constant dense<0xFF800000> : vector<1xf32>
    %256 = vector.multi_reduction <maximumf>, %252, %cst_108 [1] : vector<1x10xf32> to vector<1xf32>
    %257 = vector.shape_cast %256 : vector<1xf32> to vector<1x1xf32>
    %258 = vector.broadcast %257 : vector<1x1xf32> to vector<1x10xf32>
    %259 = arith.subf %252, %258 : vector<1x10xf32>
    %260 = math.exp %259 : vector<1x10xf32>
    %cst_109 = arith.constant dense<0.000000e+00> : vector<1xf32>
    %261 = vector.multi_reduction <add>, %260, %cst_109 [1] : vector<1x10xf32> to vector<1xf32>
    %262 = vector.shape_cast %261 : vector<1xf32> to vector<1x1xf32>
    %263 = math.log %262 : vector<1x1xf32>
    %264 = arith.addf %263, %257 : vector<1x1xf32>
    %265 = vector.broadcast %264 : vector<1x1xf32> to vector<1x10xf32>
    %266 = arith.subf %252, %265 : vector<1x10xf32>
    %267 = arith.index_cast %arg0 : i32 to index
    %268 = memref.load %arg1[%267] : memref<2xi32, #tpu.memory_space<smem>>
    %269 = tpu.iota {dimensions = array<i32: 1>} : vector<1x10xi32>
    %270 = vector.broadcast %268 : i32 to vector<1x10xi32>
    %271 = arith.cmpi eq, %269, %270 : vector<1x10xi32>
    %272 = arith.extui %271 : vector<1x10xi1> to vector<1x10xi32>
    %273 = arith.sitofp %272 : vector<1x10xi32> to vector<1x10xf32>
    %274 = arith.mulf %273, %266 : vector<1x10xf32>
    %cst_110 = arith.constant dense<0.000000e+00> : vector<1xf32>
    %275 = vector.multi_reduction <add>, %274, %cst_110 [1] : vector<1x10xf32> to vector<1xf32>
    %276 = vector.shape_cast %275 : vector<1xf32> to vector<1x1xf32>
    %cst_111 = arith.constant 0.000000e+00 : f32
    %277 = vector.broadcast %cst_111 : f32 to vector<1x1xf32>
    %278 = arith.subf %277, %276 : vector<1x1xf32>
    %c0_112 = arith.constant 0 : index
    %c0_113 = arith.constant 0 : index
    %c0_114 = arith.constant 0 : index
    %279 = vector.load %arg16[%c0_112, %c0_113, %c0_114] : memref<1x1x1xf32, #tpu.memory_space<vmem>>, vector<1x1x1xf32>
    %280 = vector.shape_cast %279 : vector<1x1x1xf32> to vector<1x1xf32>
    %281 = vector.shape_cast %278 : vector<1x1xf32> to vector<1x1x1xf32>
    tpu.vector_store %arg16[%c0_112, %c0_113, %c0_114], %281 {strides = array<i32>} : memref<1x1x1xf32, #tpu.memory_space<vmem>>, vector<1x1x1xf32>,
    return
  }
  func.func @transform_0(%arg0: i32, %arg1: memref<2xi32, #tpu.memory_space<smem>>) -> (i32, i32, i32) {
    %c0_i32 = arith.constant 0 : i32
    %c0_i32_0 = arith.constant 0 : i32
    %c0_i32_1 = arith.constant 0 : i32
    return %arg0, %c0_i32, %c0_i32_0 : i32, i32, i32
  }
  func.func @transform_1(%arg0: i32, %arg1: memref<2xi32, #tpu.memory_space<smem>>) -> (i32, i32) {
    %c0_i32 = arith.constant 0 : i32
    %c0_i32_0 = arith.constant 0 : i32
    %c0_i32_1 = arith.constant 0 : i32
    return %c0_i32, %c0_i32_0 : i32, i32
  }
  func.func @transform_2(%arg0: i32, %arg1: memref<2xi32, #tpu.memory_space<smem>>) -> (i32, i32) {
    %c0_i32 = arith.constant 0 : i32
    %c0_i32_0 = arith.constant 0 : i32
    %c0_i32_1 = arith.constant 0 : i32
    return %c0_i32, %c0_i32_0 : i32, i32
  }
  func.func @transform_3(%arg0: i32, %arg1: memref<2xi32, #tpu.memory_space<smem>>) -> (i32, i32) {
    %c0_i32 = arith.constant 0 : i32
    %c0_i32_0 = arith.constant 0 : i32
    %c0_i32_1 = arith.constant 0 : i32
    return %c0_i32, %c0_i32_0 : i32, i32
  }
  func.func @transform_4(%arg0: i32, %arg1: memref<2xi32, #tpu.memory_space<smem>>) -> (i32, i32) {
    %c0_i32 = arith.constant 0 : i32
    %c0_i32_0 = arith.constant 0 : i32
    %c0_i32_1 = arith.constant 0 : i32
    return %c0_i32, %c0_i32_0 : i32, i32
  }
  func.func @transform_5(%arg0: i32, %arg1: memref<2xi32, #tpu.memory_space<smem>>) -> (i32, i32) {
    %c0_i32 = arith.constant 0 : i32
    %c0_i32_0 = arith.constant 0 : i32
    %c0_i32_1 = arith.constant 0 : i32
    return %c0_i32, %c0_i32_0 : i32, i32
  }
  func.func @transform_6(%arg0: i32, %arg1: memref<2xi32, #tpu.memory_space<smem>>) -> (i32, i32) {
    %c0_i32 = arith.constant 0 : i32
    %c0_i32_0 = arith.constant 0 : i32
    %c0_i32_1 = arith.constant 0 : i32
    return %c0_i32, %c0_i32_0 : i32, i32
  }
  func.func @transform_7(%arg0: i32, %arg1: memref<2xi32, #tpu.memory_space<smem>>) -> (i32, i32) {
    %c0_i32 = arith.constant 0 : i32
    %c0_i32_0 = arith.constant 0 : i32
    %c0_i32_1 = arith.constant 0 : i32
    return %c0_i32, %c0_i32_0 : i32, i32
  }
  func.func @transform_8(%arg0: i32, %arg1: memref<2xi32, #tpu.memory_space<smem>>) -> (i32, i32) {
    %c0_i32 = arith.constant 0 : i32
    %c0_i32_0 = arith.constant 0 : i32
    %c0_i32_1 = arith.constant 0 : i32
    return %c0_i32, %c0_i32_0 : i32, i32
  }
  func.func @transform_9(%arg0: i32, %arg1: memref<2xi32, #tpu.memory_space<smem>>) -> (i32, i32) {
    %c0_i32 = arith.constant 0 : i32
    %c0_i32_0 = arith.constant 0 : i32
    %c0_i32_1 = arith.constant 0 : i32
    return %c0_i32, %c0_i32_0 : i32, i32
  }
  func.func @transform_10(%arg0: i32, %arg1: memref<2xi32, #tpu.memory_space<smem>>) -> (i32, i32) {
    %c0_i32 = arith.constant 0 : i32
    %c0_i32_0 = arith.constant 0 : i32
    %c0_i32_1 = arith.constant 0 : i32
    return %c0_i32, %c0_i32_0 : i32, i32
  }
  func.func @transform_11(%arg0: i32, %arg1: memref<2xi32, #tpu.memory_space<smem>>) -> (i32, i32) {
    %c0_i32 = arith.constant 0 : i32
    %c0_i32_0 = arith.constant 0 : i32
    %c0_i32_1 = arith.constant 0 : i32
    return %c0_i32, %c0_i32_0 : i32, i32
  }
  func.func @transform_12(%arg0: i32, %arg1: memref<2xi32, #tpu.memory_space<smem>>) -> (i32, i32) {
    %c0_i32 = arith.constant 0 : i32
    %c0_i32_0 = arith.constant 0 : i32
    %c0_i32_1 = arith.constant 0 : i32
    return %c0_i32, %c0_i32_0 : i32, i32
  }
  func.func @transform_13(%arg0: i32, %arg1: memref<2xi32, #tpu.memory_space<smem>>) -> (i32, i32, i32) {
    %c0_i32 = arith.constant 0 : i32
    %c0_i32_0 = arith.constant 0 : i32
    %c0_i32_1 = arith.constant 0 : i32
    return %arg0, %c0_i32, %c0_i32_0 : i32, i32, i32
  }
  func.func @transform_14(%arg0: i32, %arg1: memref<2xi32, #tpu.memory_space<smem>>) -> (i32, i32, i32) {
    %c0_i32 = arith.constant 0 : i32
    %c0_i32_0 = arith.constant 0 : i32
    %c0_i32_1 = arith.constant 0 : i32
    return %arg0, %c0_i32, %c0_i32_0 : i32, i32, i32
  }
}

</mosaic_0001>

<bundles_post_ra>
// kernel: beit_forward.1
= control target key start
LH: loop header
LB: loop body
LE: loop exit
PB: predicated region body
PF: predicated region fallthrough
CT: control target
= control target key end

     0   :  { %s7935_s0 = inlined_call_operand.vmem [shape: s32[2], index: 0, kind: input, shape index: {}]   ;;  %s7936_s1 = inlined_call_operand.vmem [shape: f32[2,64,64], index: 1, kind: input, shape index: {}]   ;;  %s7937_s2 = inlined_call_operand.vmem [shape: f32[64,64], index: 2, kind: input, shape index: {}]   ;;  %s7938_s3 = inlined_call_operand.vmem [shape: f32[64,64], index: 3, kind: input, shape index: {}]   ;;  %s7939_s4 = inlined_call_operand.vmem [shape: f32[64,64], index: 4, kind: input, shape index: {}]   ;;  %s7940_s5 = inlined_call_operand.vmem [shape: f32[16,64], index: 5, kind: input, shape index: {}]   ;;  %s7941_s6 = inlined_call_operand.vmem [shape: f32[64,192], index: 6, kind: input, shape index: {}]   ;;  %s7942_s7 = inlined_call_operand.vmem [shape: f32[1,192], index: 7, kind: input, shape index: {}]   ;;  %s7943_s8 = inlined_call_operand.vmem [shape: f32[64,64], index: 8, kind: input, shape index: {}]   ;;  %s7944_s9 = inlined_call_operand.vmem [shape: f32[64,128], index: 9, kind: input, shape index: {}]   ;;  %s7945_s10 = inlined_call_operand.vmem [shape: f32[1,128], index: 10, kind: input, shape index: {}]   ;;  %s7946_s11 = inlined_call_operand.vmem [shape: f32[128,64], index: 11, kind: input, shape index: {}]   ;;  %s7947_s12 = inlined_call_operand.vmem [shape: f32[64,10], index: 12, kind: input, shape index: {}]   ;;  %s7948_s13 = inlined_call_operand.vmem [shape: f32[1,10], index: 13, kind: input, shape index: {}]   ;;  %s7949_s14 = inlined_call_operand.hbm [shape: f32[2,1,10], index: 14, kind: output, shape index: {0}]   ;;  %s7950_s15 = inlined_call_operand.vmem [shape: f32[2,1,1], index: 15, kind: output, shape index: {1}]  }
   0x1   :  { %7967 = sst [smem:[#allocation22_spill]] %s7936_s1  ;;  %s21_s20 = sshll.u32 %s7935_s0, 4  ;;  %s22_s20 = int_to_ptr.vmem [resolvable:$true] %s21_s20 }
   0x2   :  { %7968 = sst [smem:[#allocation23_spill]] %s7937_s2  ;;  %s5714_s21 = scalar_lea.vmem %s22_s20, 16 }
   0x3   :  { %p5715_p0 = scmp.ne.s32.totalorder %s22_s20, %s5714_s21  ;;  %p5719_p1 = scmp.lt.s32.totalorder %s22_s20, %s22_s20 }
   0x4   :  { %p5720_p2 = scmp.lt.s32.totalorder %s5714_s21, %s5714_s21 }
   0x6   :  { %p5721_p3 = por %p5720_p2, %p5719_p1 }
   0x8   :  { %p5722_p4 = pnand %p5721_p3, %p5715_p0 }
   0xa   :  { %5725 = shalt.err (!%p5722_p4)  }
   0xb   :  { %s5790_s22 = smov [#allocation3]  }
   0xc   :  { %24 = dma.vmem_to_smem %s22_s20, 16, %s5790_s22, [#allocation2] }
   0xd   :  { %5768 = dma.done.wait [#allocation2], 16 }
   0xe   :  { %5769 = vsyncadd [#allocation2], 4294967280 }
   0xf   :  { %26 = sfence }
  0x10   :  { %27 = vsyncpa [#allocation5], 0 }
  0x11   :  { %29 = vsyncpa [#allocation5 + $0x1], 0  ;;  %s5884_s23 = smov 0   ;;  %s5886_s24 = smov 0  }
  0x12   :  { %s5888_s0 = smov 0   ;;  %s5890_s25 = smov 0  }
  0x13 LB: > { %7969 = sst [smem:[#allocation8_spill]] %s5784_s0  ;;  %s5905_s26 = sadd.s32 4294967295, %s5788_s25   ;;  %s5788_s25 = sphi %s5890_s25, %s7999_s25   ;;  %s5784_s0 = sphi %s5888_s0, %s8001_s0   ;;  %s5780_s24 = sphi %s5886_s24, %s8003_s24   ;;  %s5776_s23 = sphi %s5884_s23, %s8002_s23  }
  0x14   : > { %s4364_s27 = sadd.s32 4294967294, %s5788_s25   ;;  %s5909_s28 = sadd.s32 1, %s5788_s25  }
  0x15   : > { %7970 = sst [smem:[#allocation9_spill]] %s5909_s28  ;;  %s320_s29 = sadd.s32 1, %s5784_s0 }
  0x16   : > { %s317_s30 = ssub.s32 %s5788_s25, %s5909_s28  ;;  %p330_p5 = scmp.ne.s32.totalorder %s5784_s0, %s5780_s24 }
  0x17   : > { %p318_p6 = scmp.eq.s32.totalorder %s317_s30, 0  ;;  %p331_p7 = scmp.eq.s32.totalorder %s5905_s26, 1 }
  0x18   : > { %p336_p8 = scmp.ne.s32.totalorder %s5780_s24, %s5776_s23  ;;  %p337_p9 = scmp.eq.s32.totalorder %s4364_s27, 1 }
  0x19   : > { %s5920_s16 = scalar_select %p318_p6, %s5784_s0, %s320_s29  }
  0x1a   : > { %p5922_p10 = por %p331_p7, %p330_p5  ;;  %p5926_p11 = por %p337_p9, %p336_p8 }
  0x1b   : > { %7971 = sst [smem:[#allocation10_spill]] %s5920_s16  ;;  %p4367_p12 = scmp.ge.s32.totalorder %s5788_s25, 1 }
  0x1c   : > { %s7973_s18 = scalar_select %p5926_p11, 1, 0 }
  0x1d   : > { %p425_p13 = scmp.lt.s32.totalorder %s5788_s25, 3 }
  0x1e   : > { %7974 = sst [smem:[#allocation11_spill]] %s7973_s18 }
  0x1f   : > { %p426_p0 = pnand %p4367_p12, %p425_p13 }
  0x21   : > { %429 = sbr.rel (%p426_p0) target bundleno = 5039 (0x13af), region = 72 }
  0x26   : > { %s7975_s2 = sld [smem:[#allocation23_spill]]  ;;  %p473_p1 = scmp.lt.s32.totalorder %s5905_s26, 1  ;;  %vm502_vm0 = vcmask 523264   ;;  %v5975_v16 = vld [vmem:[%s7940_s5] ss:$0 sm:$0xff]  ;;  %v649_v17 = vld [vmem:[%s7939_s4 + $0x8] sm:$0xff] }
  0x27   : > { %s7976_s1 = sld [smem:[#allocation22_spill]]  ;;  %v633_v19 = vld [vmem:[%s7938_s3 + $0x8] sm:$0xff]  ;;  %v648_v20 = vld [vmem:[%s7939_s4] sm:$0xff]  ;;  %v657_v22 = vsub.f32 1.0, %v649_v17  ;;  %v651_v25 = vld [vmem:[%s7939_s4 + $0x18] sm:$0xff]  ;;  %vm704_vm1 = vcmask 1040384  }
  0x28   : > { %s5943_s30 = scalar_select %p473_p1, %s5905_s26, 1  ;;  %v632_v24 = vld [vmem:[%s7938_s3] sm:$0xff]  ;;  %v5996_v27 = vld [vmem:[%s7940_s5 + $0xa] ss:$0 sm:$0xff]  ;;  %v656_v29 = vsub.f32 1.0, %v648_v20  ;;  %v635_v31 = vld [vmem:[%s7938_s3 + $0x18] sm:$0xff] }
  0x29   : > { %v650_v32 = vld [vmem:[%s7939_s4 + $0x10] sm:$0xff]  ;;  %v659_v35 = vsub.f32 1.0, %v651_v25  ;;  %v653_v36 = vld [vmem:[%s7939_s4 + $0x28] sm:$0xff]  ;;  %v677_v37 = vmul.f32 %v5996_v27, %v648_v20  ;;  %v678_v41 = vmul.f32 %v5996_v27, %v649_v17  ;;  %v652_v48 = vld [vmem:[%s7939_s4 + $0x20] sm:$0xff]  ;;  %v680_v49 = vmul.f32 %v5996_v27, %v651_v25  ;;  %s5793_s28 = smov 48   ;;  %s5795_s18 = smov 112  }
  0x2a   : > { %s4554_s16 = sshll.u32 %s5943_s30, 6  ;;  %v693_v38 = vld [vmem:[%s7940_s5 + $0x9] sm:$0x1]  ;;  %v694_v39 = vld [vmem:[%s7940_s5 + $0xb] sm:$0x1]  ;;  %v634_v43 = vld [vmem:[%s7938_s3 + $0x10] sm:$0xff] }
  0x2b   : > { %v658_v47 = vsub.f32 1.0, %v650_v32  ;;  %v637_v51 = vld [vmem:[%s7938_s3 + $0x28] sm:$0xff]  ;;  %v661_v52 = vsub.f32 1.0, %v653_v36  ;;  %v695_v53 = vadd.f32 %v694_v39, %v693_v38  ;;  %v654_v57 = vld [vmem:[%s7939_s4 + $0x30] sm:$0xff]  ;;  %v636_v61 = vld [vmem:[%s7938_s3 + $0x20] sm:$0xff]  ;;  %v660_v62 = vsub.f32 1.0, %v652_v48 }
  0x2c   : > { %v496_v0 = vld [vmem:[%s7975_s2 + $0x38] sm:$0xff]  ;;  %v495_v1 = vld [vmem:[%s7975_s2 + $0x30] sm:$0xff]  ;;  %v494_v2 = vld [vmem:[%s7975_s2 + $0x28] sm:$0xff]  ;;  %vm5794_vm2 = vmmov 0   ;;  %vm1081_vm3 = vcmask 130048   ;;  %vm1248_vm5 = vcmask 588800  }
  0x2d   : > { %4810 = vmatprep.subr.mxu0 %v496_v0  ;;  %v493_v3 = vld [vmem:[%s7975_s2 + $0x20] sm:$0xff]  ;;  %s477_s0 = scalar_lea.vmem %s7976_s1, %s4554_s16  ;;  %v492_v4 = vld [vmem:[%s7975_s2 + $0x18] sm:$0xff]  ;;  %v491_v6 = vld [vmem:[%s7975_s2 + $0x10] sm:$0xff]  ;;  %s5796_s21 = smov 32   ;;  %vm4146_vm7 = vcmask 516096  }
  0x2e   : > { %4811 = vmatpush3.msra.mxu0 %v496_v0  ;;  %v481_v5 = vld [vmem:[%s477_s0] sm:$0xff]  ;;  %v490_v7 = vld [vmem:[%s7975_s2 + $0x8] sm:$0xff]  ;;  %v483_v10 = vld [vmem:[%s477_s0 + $0x10] sm:$0xff]  ;;  %v679_v0 = vmul.f32 %v5996_v27, %v650_v32  ;;  %s5797_s22 = smov 96   ;;  %s4259_s27 = sld [smem:[#allocation3 + %s5905_s26]] }
  0x2f   : > { %4812 = vmatprep.subr.mxu0 %v495_v1  ;;  %4826 = vmatprep.mubr.msk.f32.mxu0 %vm502_vm0, %v481_v5  ;;  %v489_v8 = vld [vmem:[%s7975_s2] sm:$0xff]  ;;  %v482_v9 = vld [vmem:[%s477_s0 + $0x8] sm:$0xff]  ;;  %v484_v11 = vld [vmem:[%s477_s0 + $0x18] sm:$0xff]  ;;  %s4551_s29 = sshll.u32 %s5905_s26, 4 }
  0x30   : > { %4813 = vmatpush3.msra.mxu0 %v495_v1  ;;  %v485_v12 = vld [vmem:[%s477_s0 + $0x20] sm:$0xff]  ;;  %v486_v13 = vld [vmem:[%s477_s0 + $0x28] sm:$0xff]  ;;  %v487_v14 = vld [vmem:[%s477_s0 + $0x30] sm:$0xff] }
  0x31   : > { %4814 = vmatprep.subr.mxu0 %v494_v2  ;;  %v488_v15 = vld [vmem:[%s477_s0 + $0x38] sm:$0xff]  ;;  %s5792_s0 = smov 64  }
  0x32   : > { %4815 = vmatpush3.msra.mxu0 %v494_v2  ;;  %v655_v63 = vld [vmem:[%s7939_s4 + $0x38] sm:$0xff] }
  0x33   : > { %4816 = vmatprep.subr.mxu0 %v493_v3 }
  0x34   : > { %4817 = vmatpush3.msra.mxu0 %v493_v3  ;;  %v682_v3 = vmul.f32 %v5996_v27, %v653_v36 }
  0x35   : > { %4818 = vmatprep.subr.mxu0 %v492_v4 }
  0x36   : > { %4819 = vmatpush3.msra.mxu0 %v492_v4 }
  0x37   : > { %4820 = vmatprep.subr.mxu0 %v491_v6 }
  0x38   : > { %4821 = vmatpush3.msra.mxu0 %v491_v6 }
  0x39   : > { %4822 = vmatprep.subr.mxu0 %v490_v7 }
  0x3a   : > { %4823 = vmatpush3.msra.mxu0 %v490_v7  ;;  %v639_v7 = vld [vmem:[%s7938_s3 + $0x38] sm:$0xff] }
  0x3b   : > { %4824 = vmatprep.subr.mxu0 %v489_v8 }
  0x3c   : > { %4825 = vmatpush3.msra.mxu0 %v489_v8  ;;  %v662_v8 = vsub.f32 1.0, %v654_v57 }
  0x3d   : > { %4827 = vmatmul.mubr.msk.f32.vlgmr.msra.gmra.mxu0 %vm502_vm0, %v482_v9 }
  0x3e   : > { %4829 = vmatprep.mubr.msk.f32.mxu0 %vm502_vm0, %v483_v10  ;;  %v681_v10 = vmul.f32 %v5996_v27, %v652_v48 }
  0x41   : > { %4830 = vmatmul.mubr.msk.f32.gmra.mxu0 %vm502_vm0, %v484_v11 }
  0x42   : > { %4832 = vmatprep.mubr.msk.f32.mxu0 %vm502_vm0, %v485_v12 }
  0x45   : > { %4833 = vmatmul.mubr.msk.f32.gmra.mxu0 %vm502_vm0, %v486_v13 }
  0x46   : > { %4835 = vmatprep.mubr.msk.f32.mxu0 %vm502_vm0, %v487_v14  ;;  %v663_v14 = vsub.f32 1.0, %v655_v63 }
  0x49   : > { %4836 = vmatmul.mubr.msk.f32.gmra.mxu0 %vm502_vm0, %v488_v15  ;;  %v684_v15 = vmul.f32 %v5996_v27, %v655_v63 }
  0xfd   : > { %v4828_v18 = vpop.f32.mrf.mxu0 }
  0xfe   : > { %v599_v21 = vadd.f32 %v4828_v18, %v5975_v16  ;;  %v638_v18 = vld [vmem:[%s7938_s3 + $0x30] sm:$0xff] }
  0xff   : > { %v593_v23 = vpop.f32.mrf.mxu0 }
 0x100   : > { %v641_v26 = vadd.f32 %v633_v19, %v599_v21  ;;  %v594_v28 = vadd.f32 %v5975_v16, %v593_v23 }
 0x101   : > { %v4831_v30 = vpop.f32.mrf.mxu0 }
 0x102   : > { %v640_v33 = vadd.f32 %v632_v24, %v594_v28  ;;  %v609_v34 = vadd.f32 %v4831_v30, %v5975_v16  ;;  %v665_v40 = vmul.f32 %v657_v22, %v641_v26  ;;  %v683_v30 = vmul.f32 %v5996_v27, %v654_v57 }
 0x103   : > { %v603_v42 = vpop.f32.mrf.mxu0 }
 0x104   : > { %v664_v44 = vmul.f32 %v656_v29, %v640_v33  ;;  %v643_v45 = vadd.f32 %v635_v31, %v609_v34  ;;  %v604_v46 = vadd.f32 %v5975_v16, %v603_v42  ;;  %v686_v59 = vadd.f32 %v678_v41, %v665_v40 }
 0x105   : > { %v4834_v50 = vpop.f32.mrf.mxu0 }
 0x106   : > { %v667_v54 = vmul.f32 %v659_v35, %v643_v45  ;;  %v642_v55 = vadd.f32 %v634_v43, %v604_v46  ;;  %v619_v56 = vadd.f32 %v4834_v50, %v5975_v16  ;;  %v685_v58 = vadd.f32 %v677_v37, %v664_v44 }
 0x107   : > { %v613_v60 = vpop.f32.mrf.mxu0  ;;  %v706_v21 = vrot.slane %v686_v59, 7 }
 0x108   : > { %v666_v1 = vmul.f32 %v658_v47, %v642_v55  ;;  %v645_v2 = vadd.f32 %v637_v51, %v619_v56  ;;  %v614_v4 = vadd.f32 %v5975_v16, %v613_v60  ;;  %v688_v5 = vadd.f32 %v680_v49, %v667_v54 }
 0x109   : > { %v4837_v6 = vpop.f32.mrf.mxu0  ;;  %v705_v9 = vrot.slane %v685_v58, 7 }
 0x10a   : > { %v669_v11 = vmul.f32 %v661_v52, %v645_v2  ;;  %v644_v12 = vadd.f32 %v636_v61, %v614_v4  ;;  %v629_v13 = vadd.f32 %v4837_v6, %v5975_v16  ;;  %v687_v20 = vadd.f32 %v679_v0, %v666_v1 }
 0x10b   : > { %v623_v17 = vpop.f32.mrf.mxu0  ;;  %v6051_v19 = vsel %vm704_vm1, %v695_v53, %v705_v9  ;;  %v710_v26 = vrot.slane %v688_v5, 7  ;;  %v6058_v33 = vsel %vm704_vm1, %v705_v9, %v706_v21 }
 0x10c   : > { %7977 = vst [vmem:[#allocation12_spill] sm:$0xff] %v6051_v19  ;;  %v690_v22 = vadd.f32 %v682_v3, %v669_v11  ;;  %v668_v23 = vmul.f32 %v660_v62, %v644_v12  ;;  %v647_v24 = vadd.f32 %v639_v7, %v629_v13  ;;  %v624_v25 = vadd.f32 %v5975_v16, %v623_v17 }
 0x10d   : > { %v733_v28 = vsel %vm502_vm0, %v6051_v19, 0.0  ;;  %v708_v29 = vrot.slane %v687_v20, 7  ;;  %7978 = vst [vmem:[#allocation13_spill] sm:$0xff] %v6058_v33  ;;  %v736_v27 = vsel %vm502_vm0, %v6058_v33, 0.0 }
 0x10e   : > { %v671_v31 = vmul.f32 %v663_v14, %v647_v24  ;;  %v646_v32 = vadd.f32 %v638_v18, %v624_v25  ;;  %734 = vadd.xlane.f32.xlu0 %v733_v28  ;;  %v689_v34 = vadd.f32 %v681_v10, %v668_v23  ;;  %v714_v35 = vrot.slane %v690_v22, 7 }
 0x10f   : > { %v6061_v36 = vsel %vm704_vm1, %v706_v21, %v708_v29  ;;  %v6068_v39 = vsel %vm704_vm1, %v708_v29, %v710_v26 }
 0x110   : > { %7979 = vst [vmem:[#allocation14_spill] sm:$0xff] %v6061_v36  ;;  %v692_v37 = vadd.f32 %v684_v15, %v671_v31  ;;  %v670_v16 = vmul.f32 %v662_v8, %v646_v32  ;;  %v739_v38 = vsel %vm502_vm0, %v6061_v36, 0.0  ;;  %7980 = vst [vmem:[#allocation15_spill] sm:$0xff] %v6068_v39  ;;  %v712_v40 = vrot.slane %v689_v34, 7 }
 0x111   : > { %740 = vadd.xlane.f32.xlu1 %v739_v38  ;;  %v742_v45 = vsel %vm502_vm0, %v6068_v39, 0.0 }
 0x112   : > { %737 = vadd.xlane.f32.xlu0 %v736_v27  ;;  %v691_v41 = vadd.f32 %v683_v30, %v670_v16  ;;  %v718_v42 = vrot.slane %v692_v37, 7  ;;  %v6071_v43 = vsel %vm704_vm1, %v710_v26, %v712_v40  ;;  %v6074_v44 = vsel %vm704_vm1, %v712_v40, %v714_v35  ;;  %v892_v40 = vld [vmem:[%s7941_s6 + $0x78] sm:$0xff] }
 0x113   : > { %7981 = vst [vmem:[#allocation16_spill] sm:$0xff] %v6071_v43  ;;  %7982 = vst [vmem:[#allocation17_spill] sm:$0xff] %v6074_v44  ;;  %v745_v46 = vsel %vm502_vm0, %v6071_v43, 0.0  ;;  %v748_v48 = vsel %vm502_vm0, %v6074_v44, 0.0  ;;  %948 = vmatprep.subr.mxu1 %v892_v40 }
 0x114   : > { %v716_v47 = vrot.slane %v691_v41, 7  ;;  %v6091_v52 = vsel %vm704_vm1, %v718_v42, 0.0  ;;  %v891_v41 = vld [vmem:[%s7941_s6 + $0x70] sm:$0xff] }
 0x115   : > { %743 = vadd.xlane.f32.xlu1 %v742_v45  ;;  %7985 = vst [vmem:[#allocation20_spill] sm:$0xff] %v6091_v52  ;;  %v757_v54 = vsel %vm502_vm0, %v6091_v52, 0.0  ;;  %949 = vmatpush1.msra.mxu1 %v891_v41  ;;  %v889_v45 = vld [vmem:[%s7941_s6 + $0x60] sm:$0xff] }
 0x116   : > { %746 = vadd.xlane.f32.xlu0 %v745_v46  ;;  %v6083_v49 = vsel %vm704_vm1, %v714_v35, %v716_v47  ;;  %v6088_v51 = vsel %vm704_vm1, %v716_v47, %v718_v42  ;;  %v890_v42 = vld [vmem:[%s7941_s6 + $0x68] sm:$0xff]  ;;  %v888_v46 = vld [vmem:[%s7941_s6 + $0x58] sm:$0xff]  ;;  %v887_v47 = vld [vmem:[%s7941_s6 + $0x50] sm:$0xff] }
 0x117   : > { %7983 = vst [vmem:[#allocation18_spill] sm:$0xff] %v6083_v49  ;;  %v751_v50 = vsel %vm502_vm0, %v6083_v49, 0.0  ;;  %7984 = vst [vmem:[#allocation19_spill] sm:$0xff] %v6088_v51  ;;  %v754_v53 = vsel %vm502_vm0, %v6088_v51, 0.0  ;;  %950 = vmatprep.subr.mxu1 %v890_v42 }
 0x118   : > { %951 = vmatpush1.msra.mxu1 %v889_v45 }
 0x119   : > { %749 = vadd.xlane.f32.xlu1 %v748_v48  ;;  %952 = vmatprep.subr.mxu1 %v888_v46  ;;  %v886_v48 = vld [vmem:[%s7941_s6 + $0x48] sm:$0xff] }
 0x11a   : > { %752 = vadd.xlane.f32.xlu0 %v751_v50  ;;  %953 = vmatpush1.msra.mxu1 %v887_v47  ;;  %v885_v50 = vld [vmem:[%s7941_s6 + $0x40] sm:$0xff] }
 0x11b   : > { %954 = vmatprep.subr.mxu1 %v886_v48 }
 0x11c   : > { %955 = vmatpush1.msra.mxu1 %v885_v50 }
 0x11d   : > { %755 = vadd.xlane.f32.xlu1 %v754_v53  ;;  %v884_v53 = vld [vmem:[%s7941_s6 + $0x38] sm:$0xff] }
 0x11e   : > { %758 = vadd.xlane.f32.xlu0 %v757_v54  ;;  %956 = vmatprep.subr.mxu1 %v884_v53  ;;  %v883_v54 = vld [vmem:[%s7941_s6 + $0x30] sm:$0xff] }
 0x11f   : > { %957 = vmatpush1.msra.mxu1 %v883_v54 }
 0x197   : > { %v735_v55 = vpop.xlane.xlu0 %734 }
 0x198   : > { %v761_v56 = vmul.f32 0.015625, %v735_v55  ;;  %v882_v55 = vld [vmem:[%s7941_s6 + $0x28] sm:$0xff] }
 0x199   : > { %958 = vmatprep.subr.mxu1 %v882_v55 }
 0x19a   : > { %v6098_v57 = vsub.f32 %v6051_v19, %v761_v56  ;;  %v741_v58 = vpop.xlane.xlu1 %740  ;;  %v881_v56 = vld [vmem:[%s7941_s6 + $0x20] sm:$0xff] }
 0x19b   : > { %v763_v59 = vmul.f32 0.015625, %v741_v58  ;;  %v738_v60 = vpop.xlane.xlu0 %737  ;;  %959 = vmatpush1.msra.mxu1 %v881_v56  ;;  %v880_v58 = vld [vmem:[%s7941_s6 + $0x18] sm:$0xff] }
 0x19c   : > { %v762_v61 = vmul.f32 0.015625, %v738_v60  ;;  %v779_v62 = vmul.f32 %v6098_v57, %v6098_v57  ;;  %960 = vmatprep.subr.mxu1 %v880_v58  ;;  %v878_v60 = vld [vmem:[%s7941_s6 + $0x8] sm:$0xff] }
 0x19d   : > { %v6103_v63 = vsub.f32 %v6061_v36, %v763_v59  ;;  %v879_v59 = vld [vmem:[%s7941_s6 + $0x10] sm:$0xff] }
 0x19e   : > { %v6106_v0 = vsub.f32 %v6058_v33, %v762_v61  ;;  %v744_v1 = vpop.xlane.xlu1 %743  ;;  %v788_v2 = vsel %vm502_vm0, %v779_v62, 0.0  ;;  %v877_v61 = vld [vmem:[%s7941_s6] sm:$0xff]  ;;  %961 = vmatpush1.msra.mxu1 %v879_v59  ;;  %v7955_v62 = vmov 0.0  }
 0x19f   : > { %v764_v3 = vmul.f32 0.015625, %v744_v1  ;;  %789 = vadd.xlane.f32.xlu1 %v788_v2  ;;  %v747_v4 = vpop.xlane.xlu0 %746  ;;  %v781_v5 = vmul.f32 %v6103_v63, %v6103_v63  ;;  %996 = vmatprep.mubr.f32.mxu1 %v7955_v62 }
 0x1a0   : > { %v765_v6 = vmul.f32 0.015625, %v747_v4  ;;  %v780_v7 = vmul.f32 %v6106_v0, %v6106_v0  ;;  %962 = vmatprep.subr.mxu1 %v878_v60  ;;  %4838 = vmatprep.subr.mxu0 %v7955_v62 }
 0x1a1   : > { %v6114_v8 = vsub.f32 %v6068_v39, %v764_v3  ;;  %v794_v9 = vsel %vm502_vm0, %v781_v5, 0.0  ;;  %963 = vmatpush1.msra.mxu1 %v877_v61  ;;  %4856 = vmatprep.mubr.msk.f32.mxu0 %vm5794_vm2, %v7955_v62 }
 0x1a2   : > { %v6118_v10 = vsub.f32 %v6071_v43, %v765_v6  ;;  %v750_v11 = vpop.xlane.xlu1 %749  ;;  %v791_v12 = vsel %vm502_vm0, %v780_v7, 0.0  ;;  %4883 = vmatprep.subr.mxu1 %v7955_v62 }
 0x1a3   : > { %v766_v13 = vmul.f32 0.015625, %v750_v11  ;;  %795 = vadd.xlane.f32.xlu1 %v794_v9  ;;  %792 = vadd.xlane.f32.xlu0 %v791_v12  ;;  %v753_v14 = vpop.xlane.xlu0 %752  ;;  %v782_v15 = vmul.f32 %v6114_v8, %v6114_v8 }
 0x1a4   : > { %v767_v17 = vmul.f32 0.015625, %v753_v14  ;;  %v783_v18 = vmul.f32 %v6118_v10, %v6118_v10 }
 0x1a5   : > { %v6126_v20 = vsub.f32 %v6074_v44, %v766_v13  ;;  %v797_v21 = vsel %vm502_vm0, %v782_v15, 0.0 }
 0x1a6   : > { %v6130_v22 = vsub.f32 %v6083_v49, %v767_v17  ;;  %v756_v23 = vpop.xlane.xlu1 %755  ;;  %v800_v24 = vsel %vm502_vm0, %v783_v18, 0.0 }
 0x1a7   : > { %v768_v25 = vmul.f32 0.015625, %v756_v23  ;;  %798 = vadd.xlane.f32.xlu0 %v797_v21  ;;  %801 = vadd.xlane.f32.xlu1 %v800_v24  ;;  %v759_v26 = vpop.xlane.xlu0 %758  ;;  %v784_v28 = vmul.f32 %v6126_v20, %v6126_v20 }
 0x1a8   : > { %v769_v29 = vmul.f32 0.015625, %v759_v26  ;;  %v785_v30 = vmul.f32 %v6130_v22, %v6130_v22 }
 0x1a9   : > { %v6138_v31 = vsub.f32 %v6088_v51, %v768_v25  ;;  %v803_v32 = vsel %vm502_vm0, %v784_v28, 0.0 }
 0x1aa   : > { %v6142_v34 = vsub.f32 %v6091_v52, %v769_v29  ;;  %v806_v35 = vsel %vm502_vm0, %v785_v30, 0.0  ;;  %v4380_v30 = vld [vmem:[%s7940_s5 + $0x3] ss:$0 sm:$0xff] }
 0x1ab   : > { %804 = vadd.xlane.f32.xlu0 %v803_v32  ;;  %807 = vadd.xlane.f32.xlu1 %v806_v35  ;;  %v786_v37 = vmul.f32 %v6138_v31, %v6138_v31 }
 0x1ac   : > { %v787_v16 = vmul.f32 %v6142_v34, %v6142_v34 }
 0x1ad   : > { %v809_v38 = vsel %vm502_vm0, %v786_v37, 0.0 }
 0x1ae   : > { %v812_v27 = vsel %vm502_vm0, %v787_v16, 0.0 }
 0x1af   : > { %810 = vadd.xlane.f32.xlu0 %v809_v38  ;;  %813 = vadd.xlane.f32.xlu1 %v812_v27  ;;  %v4381_v38 = vld [vmem:[%s7940_s5 + $0x4] ss:$0 sm:$0xff] }
 0x228   : > { %v790_v1 = vpop.xlane.xlu1 %789 }
 0x229   : > { %v815_v2 = vmul.f32 0.015625, %v790_v1 }
 0x22b   : > { %v824_v3 = vadd.f32 1e-05, %v815_v2 }
 0x22c   : > { %v796_v4 = vpop.xlane.xlu1 %795  ;;  %v793_v5 = vpop.xlane.xlu0 %792 }
 0x22d   : > { %5492 = vrsqrt.f32 %v824_v3  ;;  %v817_v6 = vmul.f32 0.015625, %v796_v4  ;;  %v816_v7 = vmul.f32 0.015625, %v793_v5 }
 0x22f   : > { %v826_v9 = vadd.f32 1e-05, %v817_v6  ;;  %v825_v11 = vadd.f32 1e-05, %v816_v7 }
 0x230   : > { %v802_v12 = vpop.xlane.xlu1 %801  ;;  %v799_v13 = vpop.xlane.xlu0 %798 }
 0x231   : > { %5494 = vrsqrt.f32 %v826_v9  ;;  %v819_v14 = vmul.f32 0.015625, %v802_v12  ;;  %v818_v15 = vmul.f32 0.015625, %v799_v13 }
 0x232   : > { %5496 = vrsqrt.f32 %v825_v11 }
 0x233   : > { %v827_v17 = vadd.f32 1e-05, %v818_v15  ;;  %v828_v18 = vadd.f32 1e-05, %v819_v14 }
 0x234   : > { %v805_v21 = vpop.xlane.xlu0 %804  ;;  %v808_v23 = vpop.xlane.xlu1 %807 }
 0x235   : > { %v820_v24 = vmul.f32 0.015625, %v805_v21  ;;  %5498 = vrsqrt.f32 %v827_v17  ;;  %v821_v25 = vmul.f32 0.015625, %v808_v23 }
 0x236   : > { %5500 = vrsqrt.f32 %v828_v18 }
 0x237   : > { %v829_v26 = vadd.f32 1e-05, %v820_v24  ;;  %v830_v35 = vadd.f32 1e-05, %v821_v25 }
 0x238   : > { %v811_v28 = vpop.xlane.xlu0 %810  ;;  %v814_v37 = vpop.xlane.xlu1 %813 }
 0x239   : > { %5502 = vrsqrt.f32 %v829_v26  ;;  %v822_v16 = vmul.f32 0.015625, %v811_v28  ;;  %v823_v42 = vmul.f32 0.015625, %v814_v37  ;;  %v895_v26 = vlaneseq }
 0x23a   : > { %v5493_v29 = vpop.eup %5492  ;;  %5504 = vrsqrt.f32 %v830_v35 }
 0x23b   : > { %v842_v32 = vmul.f32 %v5493_v29, %v6098_v57  ;;  %v831_v46 = vadd.f32 1e-05, %v822_v16  ;;  %v832_v53 = vadd.f32 1e-05, %v823_v42  ;;  %v893_v16 = vld [vmem:[%s7942_s7] sm:$0x3] }
 0x23d   : > { %v855_v27 = vmul.f32 %v4380_v30, %v842_v32  ;;  %5506 = vrsqrt.f32 %v831_v46 }
 0x23e   : > { %v5495_v40 = vpop.eup %5494  ;;  %5508 = vrsqrt.f32 %v832_v53 }
 0x23f   : > { %v5497_v41 = vpop.eup %5496  ;;  %v868_v45 = vadd.f32 %v4381_v38, %v855_v27  ;;  %v844_v48 = vmul.f32 %v5495_v40, %v6103_v63 }
 0x240   : > { %v843_v47 = vmul.f32 %v5497_v41, %v6106_v0 }
 0x241   : > { %4382 = vmatmul.mubr.msk.f32.vlgmr.msra.gmra.mxu1 %vm502_vm0, %v868_v45  ;;  %v857_v55 = vmul.f32 %v4380_v30, %v844_v48 }
 0x242   : > { %1002 = vmatprep.mubr.f32.mxu1 %v7955_v62  ;;  %v856_v57 = vmul.f32 %v4380_v30, %v843_v47  ;;  %v5499_v50 = vpop.eup %5498 }
 0x243   : > { %v845_v56 = vmul.f32 %v5499_v50, %v6114_v8  ;;  %v5501_v58 = vpop.eup %5500  ;;  %v870_v0 = vadd.f32 %v4381_v38, %v857_v55 }
 0x244   : > { %v869_v54 = vadd.f32 %v4381_v38, %v856_v57  ;;  %v846_v59 = vmul.f32 %v5501_v58, %v6118_v10 }
 0x245   : > { %v858_v63 = vmul.f32 %v4380_v30, %v845_v56 }
 0x246   : > { %4383 = vmatmul.mubr.msk.f32.gmra.mxu1 %vm502_vm0, %v869_v54  ;;  %v5503_v60 = vpop.eup %5502  ;;  %v859_v1 = vmul.f32 %v4380_v30, %v846_v59 }
 0x247   : > { %1008 = vmatprep.mubr.f32.mxu1 %v7955_v62  ;;  %v871_v61 = vadd.f32 %v4381_v38, %v858_v63  ;;  %v847_v2 = vmul.f32 %v5503_v60, %v6126_v20  ;;  %v5505_v8 = vpop.eup %5504 }
 0x248   : > { %v872_v3 = vadd.f32 %v4381_v38, %v859_v1  ;;  %v848_v5 = vmul.f32 %v5505_v8, %v6130_v22 }
 0x249   : > { %v860_v4 = vmul.f32 %v4380_v30, %v847_v2 }
 0x24a   : > { %4384 = vmatmul.mubr.msk.f32.gmra.mxu1 %vm502_vm0, %v870_v0  ;;  %v5507_v6 = vpop.eup %5506  ;;  %v861_v7 = vmul.f32 %v4380_v30, %v848_v5 }
 0x24b   : > { %1014 = vmatprep.mubr.f32.mxu1 %v7955_v62  ;;  %v873_v10 = vadd.f32 %v4381_v38, %v860_v4  ;;  %v849_v9 = vmul.f32 %v5507_v6, %v6138_v31  ;;  %v5509_v11 = vpop.eup %5508 }
 0x24c   : > { %v874_v20 = vadd.f32 %v4381_v38, %v861_v7  ;;  %v850_v13 = vmul.f32 %v5509_v11, %v6142_v34 }
 0x24d   : > { %v862_v12 = vmul.f32 %v4380_v30, %v849_v9 }
 0x24e   : > { %4385 = vmatmul.mubr.msk.f32.gmra.mxu1 %vm502_vm0, %v871_v61  ;;  %v863_v14 = vmul.f32 %v4380_v30, %v850_v13  ;;  %v896_v30 = vshrl.u32 %v895_v26, 7 }
 0x24f   : > { %1020 = vmatprep.mubr.f32.mxu1 %v7955_v62  ;;  %v875_v22 = vadd.f32 %v4381_v38, %v862_v12 }
 0x250   : > { %v876_v31 = vadd.f32 %v4381_v38, %v863_v14  ;;  %v897_v37 = vsub.s32 0, %v896_v30  ;;  %v901_v42 = vsub.s32 1, %v896_v30 }
 0x252   : > { %4386 = vmatmul.mubr.msk.f32.gmra.mxu1 %vm502_vm0, %v872_v3  ;;  %v898_v40 = vrot.slane %v893_v16, %v897_v37  ;;  %v902_v48 = vrot.slane %v893_v16, %v901_v42 }
 0x253   : > { %1026 = vmatprep.mubr.f32.mxu1 %v7955_v62 }
 0x256   : > { %4387 = vmatmul.mubr.msk.f32.gmra.mxu1 %vm502_vm0, %v873_v10 }
 0x257   : > { %1032 = vmatprep.mubr.f32.mxu1 %v7955_v62 }
 0x25a   : > { %4388 = vmatmul.mubr.msk.f32.gmra.mxu1 %vm502_vm0, %v874_v20 }
 0x25b   : > { %1038 = vmatprep.mubr.f32.mxu1 %v7955_v62 }
 0x25e   : > { %4389 = vmatmul.mubr.msk.f32.gmra.mxu1 %vm502_vm0, %v875_v22 }
 0x25f   : > { %1044 = vmatprep.mubr.f32.mxu1 %v7955_v62 }
 0x262   : > { %4390 = vmatmul.mubr.msk.f32.gmra.mxu1 %vm502_vm0, %v876_v31 }
 0x263   : > { %4901 = vmatprep.mubr.msk.f32.mxu1 %vm5794_vm2, %v7955_v62 }
 0x301   : > { %v998_v15 = vpop.f32.mrf.mxu1 }
 0x302   : > { %v6286_v1 = vadd.f32 %v998_v15, %v898_v40 }
 0x303   : > { %v6234_v17 = vpop.f32.mrf.mxu1 }
 0x304   : > { %v6307_v5 = vadd.f32 %v6234_v17, %v902_v48 }
 0x306   : > { %v1004_v18 = vpop.f32.mrf.mxu1 }
 0x307   : > { %v6291_v8 = vadd.f32 %v1004_v18, %v898_v40 }
 0x308   : > { %v1006_v21 = vpop.f32.mrf.mxu1 }
 0x309   : > { %v6302_v4 = vadd.f32 %v1006_v21, %v902_v48 }
 0x30a   : > { %v1010_v23 = vpop.f32.mrf.mxu1 }
 0x30b   : > { %v6270_v63 = vadd.f32 %v1010_v23, %v898_v40 }
 0x30c   : > { %v1012_v34 = vpop.f32.mrf.mxu1 }
 0x30d   : > { %v6294_v3 = vadd.f32 %v1012_v34, %v902_v48 }
 0x30e   : > { %v1016_v24 = vpop.f32.mrf.mxu1 }
 0x30f   : > { %v6275_v60 = vadd.f32 %v1016_v24, %v898_v40 }
 0x310   : > { %v1018_v25 = vpop.f32.mrf.mxu1 }
 0x311   : > { %v6288_v2 = vadd.f32 %v1018_v25, %v902_v48 }
 0x312   : > { %v1022_v28 = vpop.f32.mrf.mxu1 }
 0x313   : > { %v6254_v55 = vadd.f32 %v1022_v28, %v898_v40 }
 0x314   : > { %v1024_v29 = vpop.f32.mrf.mxu1 }
 0x315   : > { %v6278_v61 = vadd.f32 %v1024_v29, %v902_v48 }
 0x316   : > { %v1028_v32 = vpop.f32.mrf.mxu1 }
 0x317   : > { %v6259_v58 = vadd.f32 %v1028_v32, %v898_v40 }
 0x318   : > { %v1030_v35 = vpop.f32.mrf.mxu1 }
 0x319   : > { %v6272_v59 = vadd.f32 %v1030_v35, %v902_v48 }
 0x31a   : > { %v1034_v38 = vpop.f32.mrf.mxu1 }
 0x31b   : > { %v6244_v57 = vadd.f32 %v1034_v38, %v898_v40 }
 0x31c   : > { %v1036_v27 = vpop.f32.mrf.mxu1 }
 0x31d   : > { %v6262_v0 = vadd.f32 %v1036_v27, %v902_v48  ;;  %v6448_v27 = vand.u32 127, %v895_v26 }
 0x31e   : > { %v1040_v41 = vpop.f32.mrf.mxu1 }
 0x31f   : > { %v6240_v45 = vadd.f32 %v1040_v41, %v898_v40  ;;  %vm1053_vm4 = vcmp.lt.s32.totalorder %v6448_v27, 65 }
 0x320   : > { %v1042_v46 = vpop.f32.mrf.mxu1 }
 0x321   : > { %1077 = vrot.lane.b32.xlu1 %v6240_v45, %s5792_s0  ;;  %v6256_v56 = vadd.f32 %v1042_v46, %v902_v48 }
 0x322   : > { %v1046_v47 = vpop.f32.mrf.mxu1 }
 0x323   : > { %v6246_v50 = vadd.f32 %v1046_v47, %v898_v40 }
 0x324   : > { %v1048_v53 = vpop.f32.mrf.mxu1 }
 0x325   : > { %7986 = vst [vmem:[#allocation21_spill] sm:$0xff] %v6246_v50  ;;  %v6248_v54 = vadd.f32 %v1048_v53, %v902_v48  ;;  %1079 = vrot.lane.b32.xlu0 %v6246_v50, %s5792_s0  ;;  %1075 = vrot.lane.b32.xlu1 %v6244_v57, %s5792_s0 }
 0x327   : > { %4884 = vmatpush3.msra.mxu1 %v6248_v54 }
 0x328   : > { %4885 = vmatprep.subr.mxu1 %v7955_v62 }
 0x329   : > { %1071 = vrot.lane.b32.xlu0 %v6254_v55, %s5792_s0  ;;  %4886 = vmatpush3.msra.mxu1 %v6256_v56 }
 0x32a   : > { %1073 = vrot.lane.b32.xlu1 %v6259_v58, %s5792_s0  ;;  %4887 = vmatprep.subr.mxu1 %v7955_v62 }
 0x32b   : > { %4888 = vmatpush3.msra.mxu1 %v6262_v0 }
 0x32c   : > { %4889 = vmatprep.subr.mxu1 %v7955_v62 }
 0x32d   : > { %1067 = vrot.lane.b32.xlu0 %v6270_v63, %s5792_s0  ;;  %4890 = vmatpush3.msra.mxu1 %v6272_v59 }
 0x32e   : > { %1069 = vrot.lane.b32.xlu1 %v6275_v60, %s5792_s0  ;;  %4891 = vmatprep.subr.mxu1 %v7955_v62 }
 0x32f   : > { %4892 = vmatpush3.msra.mxu1 %v6278_v61 }
 0x330   : > { %4893 = vmatprep.subr.mxu1 %v7955_v62 }
 0x331   : > { %1063 = vrot.lane.b32.xlu0 %v6286_v1, %s5792_s0  ;;  %4894 = vmatpush3.msra.mxu1 %v6288_v2 }
 0x332   : > { %1065 = vrot.lane.b32.xlu1 %v6291_v8, %s5792_s0  ;;  %4895 = vmatprep.subr.mxu1 %v7955_v62  ;;  %s4285_s0 = scalar_lea.hbm %s7949_s14, %s4551_s29 }
 0x333   : > { %4896 = vmatpush3.msra.mxu1 %v6294_v3 }
 0x334   : > { %4897 = vmatprep.subr.mxu1 %v7955_v62 }
 0x335   : > { %4898 = vmatpush3.msra.mxu1 %v6302_v4  ;;  %1519 = vrot.lane.b32.xlu0 %v6240_v45, %s5793_s28 }
 0x336   : > { %1521 = vrot.lane.b32.xlu1 %v6246_v50, %s5793_s28  ;;  %4899 = vmatprep.subr.mxu1 %v7955_v62 }
 0x337   : > { %4900 = vmatpush3.msra.mxu1 %v6307_v5 }
 0x338   : > { %4973 = vmatprep.subr.mxu1 %v7955_v62 }
 0x339   : > { %1515 = vrot.lane.b32.xlu0 %v6259_v58, %s5793_s28 }
 0x33a   : > { %1517 = vrot.lane.b32.xlu1 %v6244_v57, %s5793_s28 }
 0x33d   : > { %1511 = vrot.lane.b32.xlu0 %v6275_v60, %s5793_s28 }
 0x33e   : > { %1513 = vrot.lane.b32.xlu1 %v6254_v55, %s5793_s28 }
 0x341   : > { %1507 = vrot.lane.b32.xlu0 %v6291_v8, %s5793_s28 }
 0x342   : > { %1509 = vrot.lane.b32.xlu1 %v6270_v63, %s5793_s28 }
 0x345   : > { %1487 = vrot.lane.b32.xlu0 %v6286_v1, %s5795_s18 }
 0x346   : > { %1505 = vrot.lane.b32.xlu1 %v6286_v1, %s5793_s28  ;;  %s466_s28 = sand.u32 1, %s5780_s24  }
 0x349   : > { %1491 = vrot.lane.b32.xlu0 %v6270_v63, %s5795_s18 }
 0x34a   : > { %1489 = vrot.lane.b32.xlu1 %v6291_v8, %s5795_s18 }
 0x34d   : > { %1495 = vrot.lane.b32.xlu0 %v6254_v55, %s5795_s18 }
 0x34e   : > { %1493 = vrot.lane.b32.xlu1 %v6275_v60, %s5795_s18 }
 0x351   : > { %1499 = vrot.lane.b32.xlu0 %v6244_v57, %s5795_s18 }
 0x352   : > { %1497 = vrot.lane.b32.xlu1 %v6259_v58, %s5795_s18 }
 0x355   : > { %1503 = vrot.lane.b32.xlu0 %v6246_v50, %s5795_s18 }
 0x356   : > { %1501 = vrot.lane.b32.xlu1 %v6240_v45, %s5795_s18 }
 0x359   : > { %1809 = vrot.lane.b32.xlu0 %v6256_v56, %s5795_s18 }
 0x35a   : > { %1811 = vrot.lane.b32.xlu1 %v6248_v54, %s5795_s18 }
 0x393   : > { %v1078_v6 = vpop.permute.xlu1 %1077 }
 0x397   : > { %v1080_v10 = vpop.permute.xlu0 %1079  ;;  %v1076_v7 = vpop.permute.xlu1 %1075 }
 0x398   : > { %4839 = vmatpush3.xpose.msk.msra.mxu0 %vm1081_vm3, %v1080_v10 }
 0x399   : > { %4840 = vmatprep.subr.mxu0 %v7955_v62 }
 0x39b   : > { %v1072_v11 = vpop.permute.xlu0 %1071 }
 0x39c   : > { %4841 = vmatpush3.xpose.msk.msra.mxu0 %vm1081_vm3, %v1078_v6  ;;  %v1074_v9 = vpop.permute.xlu1 %1073 }
 0x39d   : > { %4842 = vmatprep.subr.mxu0 %v7955_v62 }
 0x39f   : > { %v1068_v12 = vpop.permute.xlu0 %1067 }
 0x3a0   : > { %4843 = vmatpush3.xpose.msk.msra.mxu0 %vm1081_vm3, %v1076_v7  ;;  %v1070_v20 = vpop.permute.xlu1 %1069 }
 0x3a1   : > { %4844 = vmatprep.subr.mxu0 %v7955_v62 }
 0x3a3   : > { %v1064_v22 = vpop.permute.xlu0 %1063 }
 0x3a4   : > { %4845 = vmatpush3.xpose.msk.msra.mxu0 %vm1081_vm3, %v1074_v9  ;;  %v1066_v13 = vpop.permute.xlu1 %1065 }
 0x3a5   : > { %4846 = vmatprep.subr.mxu0 %v7955_v62 }
 0x3a7   : > { %v1520_v31 = vpop.permute.xlu0 %1519 }
 0x3a8   : > { %4847 = vmatpush3.xpose.msk.msra.mxu0 %vm1081_vm3, %v1072_v11  ;;  %v1522_v14 = vpop.permute.xlu1 %1521 }
 0x3a9   : > { %4848 = vmatprep.subr.mxu0 %v7955_v62 }
 0x3ab   : > { %v1516_v17 = vpop.permute.xlu0 %1515 }
 0x3ac   : > { %4849 = vmatpush3.xpose.msk.msra.mxu0 %vm1081_vm3, %v1070_v20  ;;  %v1518_v15 = vpop.permute.xlu1 %1517 }
 0x3ad   : > { %4850 = vmatprep.subr.mxu0 %v7955_v62 }
 0x3af   : > { %v1512_v21 = vpop.permute.xlu0 %1511 }
 0x3b0   : > { %4851 = vmatpush3.xpose.msk.msra.mxu0 %vm1081_vm3, %v1068_v12  ;;  %v1514_v18 = vpop.permute.xlu1 %1513 }
 0x3b1   : > { %4852 = vmatprep.subr.mxu0 %v7955_v62 }
 0x3b3   : > { %v1508_v34 = vpop.permute.xlu0 %1507 }
 0x3b4   : > { %4853 = vmatpush3.xpose.msk.msra.mxu0 %vm1081_vm3, %v1066_v13  ;;  %v1510_v23 = vpop.permute.xlu1 %1509 }
 0x3b5   : > { %4854 = vmatprep.subr.mxu0 %v7955_v62 }
 0x3b7   : > { %v1488_v25 = vpop.permute.xlu0 %1487 }
 0x3b8   : > { %4855 = vmatpush3.xpose.msk.msra.mxu0 %vm1081_vm3, %v1064_v22  ;;  %v1506_v24 = vpop.permute.xlu1 %1505 }
 0x3b9   : > { %4928 = vmatprep.subr.mxu0 %v7955_v62 }
 0x3bb   : > { %4857 = vmatmul.mubr.msk.f32.vlgmr.msra.gmra.mxu0 %vm1081_vm3, %v6286_v1  ;;  %v1492_v29 = vpop.permute.xlu0 %1491 }
 0x3bc   : > { %4929 = vmatpush3.xpose.msk.msra.mxu0 %vm1081_vm3, %v1522_v14  ;;  %4859 = vmatprep.mubr.msk.f32.mxu0 %vm5794_vm2, %v7955_v62  ;;  %v1490_v28 = vpop.permute.xlu1 %1489 }
 0x3bd   : > { %4930 = vmatprep.subr.mxu0 %v7955_v62 }
 0x3bf   : > { %4860 = vmatmul.mubr.msk.f32.gmra.mxu0 %vm1081_vm3, %v6291_v8  ;;  %v1496_v32 = vpop.permute.xlu0 %1495 }
 0x3c0   : > { %4931 = vmatpush3.xpose.msk.msra.mxu0 %vm1081_vm3, %v1520_v31  ;;  %4862 = vmatprep.mubr.msk.f32.mxu0 %vm5794_vm2, %v7955_v62  ;;  %v1494_v30 = vpop.permute.xlu1 %1493 }
 0x3c1   : > { %4932 = vmatprep.subr.mxu0 %v7955_v62 }
 0x3c3   : > { %4863 = vmatmul.mubr.msk.f32.gmra.mxu0 %vm1081_vm3, %v6270_v63  ;;  %v1500_v37 = vpop.permute.xlu0 %1499 }
 0x3c4   : > { %4933 = vmatpush3.xpose.msk.msra.mxu0 %vm1081_vm3, %v1518_v15  ;;  %4865 = vmatprep.mubr.msk.f32.mxu0 %vm5794_vm2, %v7955_v62  ;;  %v1498_v35 = vpop.permute.xlu1 %1497 }
 0x3c5   : > { %4934 = vmatprep.subr.mxu0 %v7955_v62 }
 0x3c7   : > { %4866 = vmatmul.mubr.msk.f32.gmra.mxu0 %vm1081_vm3, %v6275_v60  ;;  %v1504_v38 = vpop.permute.xlu0 %1503 }
 0x3c8   : > { %4935 = vmatpush3.xpose.msk.msra.mxu0 %vm1081_vm3, %v1516_v17  ;;  %4868 = vmatprep.mubr.msk.f32.mxu0 %vm5794_vm2, %v7955_v62  ;;  %v1502_v16 = vpop.permute.xlu1 %1501 }
 0x3c9   : > { %4936 = vmatprep.subr.mxu0 %v7955_v62 }
 0x3cb   : > { %4869 = vmatmul.mubr.msk.f32.gmra.mxu0 %vm1081_vm3, %v6254_v55 }
 0x3cc   : > { %4937 = vmatpush3.xpose.msk.msra.mxu0 %vm1081_vm3, %v1514_v18  ;;  %4871 = vmatprep.mubr.msk.f32.mxu0 %vm5794_vm2, %v7955_v62 }
 0x3cd   : > { %4938 = vmatprep.subr.mxu0 %v7955_v62 }
 0x3cf   : > { %4872 = vmatmul.mubr.msk.f32.gmra.mxu0 %vm1081_vm3, %v6259_v58 }
 0x3d0   : > { %4939 = vmatpush3.xpose.msk.msra.mxu0 %vm1081_vm3, %v1512_v21  ;;  %4874 = vmatprep.mubr.msk.f32.mxu0 %vm5794_vm2, %v7955_v62 }
 0x3d1   : > { %4940 = vmatprep.subr.mxu0 %v7955_v62 }
 0x3d3   : > { %4875 = vmatmul.mubr.msk.f32.gmra.mxu0 %vm1081_vm3, %v6244_v57 }
 0x3d4   : > { %4941 = vmatpush3.xpose.msk.msra.mxu0 %vm1081_vm3, %v1510_v23  ;;  %4877 = vmatprep.mubr.msk.f32.mxu0 %vm5794_vm2, %v7955_v62 }
 0x3d5   : > { %4942 = vmatprep.subr.mxu0 %v7955_v62 }
 0x3d7   : > { %4878 = vmatmul.mubr.msk.f32.gmra.mxu0 %vm1081_vm3, %v6240_v45 }
 0x3d8   : > { %4943 = vmatpush3.xpose.msk.msra.mxu0 %vm1081_vm3, %v1508_v34  ;;  %4880 = vmatprep.mubr.msk.f32.mxu0 %vm5794_vm2, %v7955_v62 }
 0x3d9   : > { %4944 = vmatprep.subr.mxu0 %v7955_v62 }
 0x3db   : > { %4881 = vmatmul.mubr.msk.f32.gmra.mxu0 %vm1081_vm3, %v6246_v50 }
 0x3dc   : > { %4945 = vmatpush3.xpose.msk.msra.mxu0 %vm1081_vm3, %v1506_v24  ;;  %4946 = vmatprep.mubr.msk.f32.mxu0 %vm5794_vm2, %v7955_v62 }
 0x3dd   : > { %5018 = vmatprep.subr.mxu0 %v7955_v62 }
 0x3df   : > { %4947 = vmatmul.mubr.msk.f32.vlgmr.msra.gmra.mxu0 %vm1081_vm3, %v1488_v25 }
 0x3e0   : > { %4949 = vmatprep.mubr.msk.f32.mxu0 %vm5794_vm2, %v7955_v62 }
 0x3e3   : > { %4950 = vmatmul.mubr.msk.f32.gmra.mxu0 %vm1081_vm3, %v1490_v28 }
 0x3e4   : > { %4952 = vmatprep.mubr.msk.f32.mxu0 %vm5794_vm2, %v7955_v62 }
 0x3e7   : > { %4953 = vmatmul.mubr.msk.f32.gmra.mxu0 %vm1081_vm3, %v1492_v29 }
 0x3e8   : > { %4955 = vmatprep.mubr.msk.f32.mxu0 %vm5794_vm2, %v7955_v62 }
 0x3eb   : > { %4956 = vmatmul.mubr.msk.f32.gmra.mxu0 %vm1081_vm3, %v1494_v30 }
 0x3ec   : > { %4958 = vmatprep.mubr.msk.f32.mxu0 %vm5794_vm2, %v7955_v62 }
 0x3ef   : > { %4959 = vmatmul.mubr.msk.f32.gmra.mxu0 %vm1081_vm3, %v1496_v32 }
 0x3f0   : > { %4961 = vmatprep.mubr.msk.f32.mxu0 %vm5794_vm2, %v7955_v62 }
 0x3f3   : > { %4962 = vmatmul.mubr.msk.f32.gmra.mxu0 %vm1081_vm3, %v1498_v35 }
 0x3f4   : > { %4964 = vmatprep.mubr.msk.f32.mxu0 %vm5794_vm2, %v7955_v62 }
 0x3f7   : > { %4965 = vmatmul.mubr.msk.f32.gmra.mxu0 %vm1081_vm3, %v1500_v37 }
 0x3f8   : > { %4967 = vmatprep.mubr.msk.f32.mxu0 %vm5794_vm2, %v7955_v62 }
 0x3fb   : > { %4968 = vmatmul.mubr.msk.f32.gmra.mxu0 %vm1081_vm3, %v1502_v16 }
 0x3fc   : > { %4970 = vmatprep.mubr.msk.f32.mxu0 %vm5794_vm2, %v7955_v62 }
 0x3ff   : > { %4971 = vmatmul.mubr.msk.f32.gmra.mxu0 %vm1081_vm3, %v1504_v38 }
 0x400   : > { %5022 = vmatprep.mubr.msk.f32.mxu0 %vm5794_vm2, %v7955_v62 }
 0x47b   : > { %v1184_v40 = vpop.f32.mrf.mxu0 }
 0x47c   : > { %v1228_v41 = vmul.f32 0.25, %v1184_v40 }
 0x47d   : > { %v4858_v42 = vpop.f32.mrf.mxu0 }
 0x47e   : > { %v6453_v46 = vsel %vm1053_vm4, %v1228_v41, -1e+30 }
 0x47f   : > { %v1189_v47 = vpop.f32.mrf.mxu0  ;;  %v1249_v48 = vsel %vm1248_vm5, %v6453_v46, -inf }
 0x480   : > { %v1229_v53 = vmul.f32 0.25, %v1189_v47  ;;  %1250 = vmax.xlane.f32.xlu1 %v1249_v48 }
 0x481   : > { %v4861_v6 = vpop.f32.mrf.mxu0 }
 0x482   : > { %v6459_v26 = vsel %vm1053_vm4, %v1229_v53, -1e+30 }
 0x483   : > { %v1194_v10 = vpop.f32.mrf.mxu0  ;;  %v1252_v7 = vsel %vm1248_vm5, %v6459_v26, -inf }
 0x484   : > { %v1230_v9 = vmul.f32 0.25, %v1194_v10  ;;  %1253 = vmax.xlane.f32.xlu0 %v1252_v7 }
 0x485   : > { %v4864_v11 = vpop.f32.mrf.mxu0 }
 0x486   : > { %v6465_v20 = vsel %vm1053_vm4, %v1230_v9, -1e+30 }
 0x487   : > { %v1199_v12 = vpop.f32.mrf.mxu0  ;;  %v1255_v13 = vsel %vm1248_vm5, %v6465_v20, -inf }
 0x488   : > { %v1231_v22 = vmul.f32 0.25, %v1199_v12  ;;  %1256 = vmax.xlane.f32.xlu0 %v1255_v13 }
 0x489   : > { %v4867_v14 = vpop.f32.mrf.mxu0 }
 0x48a   : > { %v6471_v31 = vsel %vm1053_vm4, %v1231_v22, -1e+30 }
 0x48b   : > { %v1204_v15 = vpop.f32.mrf.mxu0  ;;  %v1258_v17 = vsel %vm1248_vm5, %v6471_v31, -inf }
 0x48c   : > { %v1232_v18 = vmul.f32 0.25, %v1204_v15  ;;  %1259 = vmax.xlane.f32.xlu0 %v1258_v17 }
 0x48d   : > { %v4870_v21 = vpop.f32.mrf.mxu0 }
 0x48e   : > { %v6477_v23 = vsel %vm1053_vm4, %v1232_v18, -1e+30 }
 0x48f   : > { %v1209_v34 = vpop.f32.mrf.mxu0  ;;  %v1261_v24 = vsel %vm1248_vm5, %v6477_v23, -inf }
 0x490   : > { %v1233_v25 = vmul.f32 0.25, %v1209_v34  ;;  %1262 = vmax.xlane.f32.xlu1 %v1261_v24 }
 0x491   : > { %v4873_v28 = vpop.f32.mrf.mxu0 }
 0x492   : > { %v6483_v29 = vsel %vm1053_vm4, %v1233_v25, -1e+30 }
 0x493   : > { %v1214_v30 = vpop.f32.mrf.mxu0  ;;  %v1264_v32 = vsel %vm1248_vm5, %v6483_v29, -inf }
 0x494   : > { %v1234_v35 = vmul.f32 0.25, %v1214_v30  ;;  %1265 = vmax.xlane.f32.xlu0 %v1264_v32 }
 0x495   : > { %v4876_v37 = vpop.f32.mrf.mxu0 }
 0x496   : > { %v6489_v16 = vsel %vm1053_vm4, %v1234_v35, -1e+30 }
 0x497   : > { %v1219_v38 = vpop.f32.mrf.mxu0  ;;  %v1267_v40 = vsel %vm1248_vm5, %v6489_v16, -inf }
 0x498   : > { %v1235_v41 = vmul.f32 0.25, %v1219_v38  ;;  %1268 = vmax.xlane.f32.xlu1 %v1267_v40 }
 0x499   : > { %v4879_v42 = vpop.f32.mrf.mxu0 }
 0x49a   : > { %v6495_v47 = vsel %vm1053_vm4, %v1235_v41, -1e+30 }
 0x49b   : > { %v1224_v48 = vpop.f32.mrf.mxu0  ;;  %v1270_v53 = vsel %vm1248_vm5, %v6495_v47, -inf }
 0x49c   : > { %v1236_v6 = vmul.f32 0.25, %v1224_v48  ;;  %1271 = vmax.xlane.f32.xlu0 %v1270_v53 }
 0x49d   : > { %v4882_v10 = vpop.f32.mrf.mxu0 }
 0x49e   : > { %v6501_v7 = vsel %vm1053_vm4, %v1236_v6, -1e+30 }
 0x49f   : > { %v1625_v9 = vpop.f32.mrf.mxu0  ;;  %v1273_v11 = vsel %vm1248_vm5, %v6501_v7, -inf }
 0x4a0   : > { %v1669_v12 = vmul.f32 0.25, %v1625_v9  ;;  %1274 = vmax.xlane.f32.xlu1 %v1273_v11 }
 0x4a1   : > { %v4948_v13 = vpop.f32.mrf.mxu0 }
 0x4a2   : > { %v6507_v22 = vsel %vm1053_vm4, %v1669_v12, -1e+30 }
 0x4a3   : > { %v1630_v14 = vpop.f32.mrf.mxu0  ;;  %v1687_v15 = vsel %vm1248_vm5, %v6507_v22, -inf }
 0x4a4   : > { %v1670_v17 = vmul.f32 0.25, %v1630_v14  ;;  %1688 = vmax.xlane.f32.xlu0 %v1687_v15 }
 0x4a5   : > { %v4951_v18 = vpop.f32.mrf.mxu0 }
 0x4a6   : > { %v6513_v21 = vsel %vm1053_vm4, %v1670_v17, -1e+30 }
 0x4a7   : > { %v1635_v34 = vpop.f32.mrf.mxu0  ;;  %v1690_v24 = vsel %vm1248_vm5, %v6513_v21, -inf }
 0x4a8   : > { %v1671_v25 = vmul.f32 0.25, %v1635_v34  ;;  %1691 = vmax.xlane.f32.xlu1 %v1690_v24 }
 0x4a9   : > { %v4954_v28 = vpop.f32.mrf.mxu0 }
 0x4aa   : > { %v6519_v30 = vsel %vm1053_vm4, %v1671_v25, -1e+30 }
 0x4ab   : > { %v1640_v32 = vpop.f32.mrf.mxu0  ;;  %v1693_v35 = vsel %vm1248_vm5, %v6519_v30, -inf }
 0x4ac   : > { %v1672_v37 = vmul.f32 0.25, %v1640_v32  ;;  %1694 = vmax.xlane.f32.xlu0 %v1693_v35 }
 0x4ad   : > { %v4957_v38 = vpop.f32.mrf.mxu0 }
 0x4ae   : > { %v6525_v40 = vsel %vm1053_vm4, %v1672_v37, -1e+30 }
 0x4af   : > { %v1645_v41 = vpop.f32.mrf.mxu0  ;;  %v1696_v42 = vsel %vm1248_vm5, %v6525_v40, -inf }
 0x4b0   : > { %v1673_v48 = vmul.f32 0.25, %v1645_v41  ;;  %1697 = vmax.xlane.f32.xlu1 %v1696_v42 }
 0x4b1   : > { %v4960_v53 = vpop.f32.mrf.mxu0 }
 0x4b2   : > { %v6531_v6 = vsel %vm1053_vm4, %v1673_v48, -1e+30 }
 0x4b3   : > { %v1650_v10 = vpop.f32.mrf.mxu0  ;;  %v1699_v9 = vsel %vm1248_vm5, %v6531_v6, -inf }
 0x4b4   : > { %v1674_v11 = vmul.f32 0.25, %v1650_v10  ;;  %1700 = vmax.xlane.f32.xlu0 %v1699_v9  ;;  %v6565_v10 = vpop.permute.xlu1 %1811  ;;  %v6567_v9 = vpop.permute.xlu0 %1809 }
 0x4b5   : > { %v4963_v12 = vpop.f32.mrf.mxu0 }
 0x4b6   : > { %v6537_v13 = vsel %vm1053_vm4, %v1674_v11, -1e+30 }
 0x4b7   : > { %v1655_v14 = vpop.f32.mrf.mxu0  ;;  %v1702_v15 = vsel %vm1248_vm5, %v6537_v13, -inf }
 0x4b8   : > { %v1675_v17 = vmul.f32 0.25, %v1655_v14  ;;  %1703 = vmax.xlane.f32.xlu1 %v1702_v15 }
 0x4b9   : > { %v4966_v18 = vpop.f32.mrf.mxu0 }
 0x4ba   : > { %v6543_v34 = vsel %vm1053_vm4, %v1675_v17, -1e+30 }
 0x4bb   : > { %v1660_v24 = vpop.f32.mrf.mxu0  ;;  %v1705_v25 = vsel %vm1248_vm5, %v6543_v34, -inf }
 0x4bc   : > { %v1676_v28 = vmul.f32 0.25, %v1660_v24  ;;  %1706 = vmax.xlane.f32.xlu0 %v1705_v25 }
 0x4bd   : > { %v4969_v32 = vpop.f32.mrf.mxu0 }
 0x4be   : > { %v6549_v35 = vsel %vm1053_vm4, %v1676_v28, -1e+30 }
 0x4bf   : > { %v1665_v37 = vpop.f32.mrf.mxu0  ;;  %v1708_v38 = vsel %vm1248_vm5, %v6549_v35, -inf }
 0x4c0   : > { %1709 = vmax.xlane.f32.xlu1 %v1708_v38  ;;  %v1677_v42 = vmul.f32 0.25, %v1665_v37 }
 0x4c1   : > { %v4972_v41 = vpop.f32.mrf.mxu0 }
 0x4c2   : > { %v6561_v48 = vsel %vm1053_vm4, %v1677_v42, -1e+30 }
 0x4c3   : > { %v1711_v53 = vsel %vm1248_vm5, %v6561_v48, -inf }
 0x4d1   : > { %1807 = vrot.lane.b32.xlu1 %v6262_v0, %s5795_s18 }
 0x4d2   : > { %1805 = vrot.lane.b32.xlu0 %v6272_v59, %s5795_s18 }
 0x4d6   : > { %1803 = vrot.lane.b32.xlu0 %v6278_v61, %s5795_s18 }
 0x4f5   : > { %1712 = vmax.xlane.f32.xlu0 %v1711_v53 }
 0x509   : > { %v1251_v11 = vpop.xlane.xlu1 %1250 }
 0x50a   : > { %v1276_v12 = vsub.f32 %v6453_v46, %v1251_v11 }
 0x50c   : > { %v1285_v14 = vmul.f32 1.442695, %v1276_v12 }
 0x50d   : > { %v1254_v15 = vpop.xlane.xlu0 %1253 }
 0x50e   : > { %5510 = vpow2.f32 %v1285_v14  ;;  %v1277_v17 = vsub.f32 %v6459_v26, %v1254_v15 }
 0x510   : > { %v1287_v18 = vmul.f32 1.442695, %v1277_v17 }
 0x511   : > { %v1257_v24 = vpop.xlane.xlu0 %1256 }
 0x512   : > { %5512 = vpow2.f32 %v1287_v18  ;;  %v1278_v25 = vsub.f32 %v6465_v20, %v1257_v24 }
 0x514   : > { %v1289_v28 = vmul.f32 1.442695, %v1278_v25 }
 0x515   : > { %v1260_v32 = vpop.xlane.xlu0 %1259 }
 0x516   : > { %5514 = vpow2.f32 %v1289_v28  ;;  %v1279_v37 = vsub.f32 %v6471_v31, %v1260_v32 }
 0x518   : > { %v1291_v38 = vmul.f32 1.442695, %v1279_v37 }
 0x519   : > { %v1263_v41 = vpop.xlane.xlu1 %1262 }
 0x51a   : > { %5516 = vpow2.f32 %v1291_v38  ;;  %v1280_v46 = vsub.f32 %v6477_v23, %v1263_v41 }
 0x51b   : > { %v6574_v42 = vpop.eup %5510 }
 0x51c   : > { %v1293_v53 = vmul.f32 1.442695, %v1280_v46  ;;  %v1303_v26 = vsel %vm1248_vm5, %v6574_v42, 0.0 }
 0x51d   : > { %v1266_v11 = vpop.xlane.xlu0 %1265  ;;  %1304 = vadd.xlane.f32.xlu1 %v1303_v26 }
 0x51e   : > { %5518 = vpow2.f32 %v1293_v53  ;;  %v1281_v20 = vsub.f32 %v6483_v29, %v1266_v11 }
 0x51f   : > { %v6579_v12 = vpop.eup %5512 }
 0x520   : > { %v1295_v14 = vmul.f32 1.442695, %v1281_v20  ;;  %v1306_v31 = vsel %vm1248_vm5, %v6579_v12, 0.0 }
 0x521   : > { %1307 = vadd.xlane.f32.xlu0 %v1306_v31  ;;  %v1269_v15 = vpop.xlane.xlu1 %1268 }
 0x522   : > { %5520 = vpow2.f32 %v1295_v14  ;;  %v1282_v23 = vsub.f32 %v6489_v16, %v1269_v15 }
 0x523   : > { %v6584_v17 = vpop.eup %5514 }
 0x524   : > { %v1297_v18 = vmul.f32 1.442695, %v1282_v23  ;;  %v1309_v24 = vsel %vm1248_vm5, %v6584_v17, 0.0 }
 0x525   : > { %v1272_v25 = vpop.xlane.xlu0 %1271  ;;  %1310 = vadd.xlane.f32.xlu1 %v1309_v24 }
 0x526   : > { %5522 = vpow2.f32 %v1297_v18  ;;  %v1283_v29 = vsub.f32 %v6495_v47, %v1272_v25 }
 0x527   : > { %v6589_v28 = vpop.eup %5516 }
 0x528   : > { %v1299_v32 = vmul.f32 1.442695, %v1283_v29  ;;  %v1312_v37 = vsel %vm1248_vm5, %v6589_v28, 0.0 }
 0x529   : > { %1313 = vadd.xlane.f32.xlu0 %v1312_v37  ;;  %v1275_v38 = vpop.xlane.xlu1 %1274 }
 0x52a   : > { %5524 = vpow2.f32 %v1299_v32  ;;  %v1284_v16 = vsub.f32 %v6501_v7, %v1275_v38 }
 0x52b   : > { %v6594_v41 = vpop.eup %5518 }
 0x52c   : > { %v1301_v46 = vmul.f32 1.442695, %v1284_v16  ;;  %v1315_v53 = vsel %vm1248_vm5, %v6594_v41, 0.0 }
 0x52d   : > { %v1689_v26 = vpop.xlane.xlu0 %1688  ;;  %1316 = vadd.xlane.f32.xlu1 %v1315_v53 }
 0x52e   : > { %5526 = vpow2.f32 %v1301_v46  ;;  %v1714_v47 = vsub.f32 %v6507_v22, %v1689_v26 }
 0x52f   : > { %v6599_v11 = vpop.eup %5520 }
 0x530   : > { %v1723_v20 = vmul.f32 1.442695, %v1714_v47  ;;  %v1318_v14 = vsel %vm1248_vm5, %v6599_v11, 0.0 }
 0x531   : > { %1319 = vadd.xlane.f32.xlu0 %v1318_v14  ;;  %v1692_v31 = vpop.xlane.xlu1 %1691 }
 0x532   : > { %5528 = vpow2.f32 %v1723_v20  ;;  %v1715_v7 = vsub.f32 %v6513_v21, %v1692_v31 }
 0x533   : > { %v6604_v15 = vpop.eup %5522 }
 0x534   : > { %v1725_v23 = vmul.f32 1.442695, %v1715_v7  ;;  %v1321_v18 = vsel %vm1248_vm5, %v6604_v15, 0.0 }
 0x535   : > { %v1695_v24 = vpop.xlane.xlu0 %1694  ;;  %1322 = vadd.xlane.f32.xlu1 %v1321_v18 }
 0x536   : > { %5530 = vpow2.f32 %v1725_v23  ;;  %v1716_v22 = vsub.f32 %v6519_v30, %v1695_v24 }
 0x537   : > { %v6609_v25 = vpop.eup %5524 }
 0x538   : > { %v1727_v29 = vmul.f32 1.442695, %v1716_v22  ;;  %v1324_v32 = vsel %vm1248_vm5, %v6609_v25, 0.0 }
 0x539   : > { %1325 = vadd.xlane.f32.xlu0 %v1324_v32  ;;  %v1698_v37 = vpop.xlane.xlu1 %1697 }
 0x53a   : > { %5532 = vpow2.f32 %v1727_v29  ;;  %v1717_v21 = vsub.f32 %v6525_v40, %v1698_v37 }
 0x53b   : > { %v6614_v38 = vpop.eup %5526 }
 0x53c   : > { %v1729_v16 = vmul.f32 1.442695, %v1717_v21  ;;  %v1327_v46 = vsel %vm1248_vm5, %v6614_v38, 0.0 }
 0x53d   : > { %v1701_v53 = vpop.xlane.xlu0 %1700  ;;  %1328 = vadd.xlane.f32.xlu1 %v1327_v46 }
 0x53e   : > { %5534 = vpow2.f32 %v1729_v16  ;;  %v1718_v30 = vsub.f32 %v6531_v6, %v1701_v53 }
 0x53f   : > { %v6619_v26 = vpop.eup %5528 }
 0x540   : > { %v1731_v47 = vmul.f32 1.442695, %v1718_v30  ;;  %v1741_v20 = vsel %vm1248_vm5, %v6619_v26, 0.0 }
 0x541   : > { %1742 = vadd.xlane.f32.xlu0 %v1741_v20  ;;  %v1704_v22 = vpop.xlane.xlu1 %1703 }
 0x542   : > { %5536 = vpow2.f32 %v1731_v47  ;;  %v1719_v29 = vsub.f32 %v6537_v13, %v1704_v22 }
 0x543   : > { %v6623_v40 = vpop.eup %5530 }
 0x544   : > { %v1744_v14 = vsel %vm1248_vm5, %v6623_v40, 0.0  ;;  %v1733_v37 = vmul.f32 1.442695, %v1719_v29 }
 0x545   : > { %1745 = vadd.xlane.f32.xlu1 %v1744_v14  ;;  %v1707_v32 = vpop.xlane.xlu0 %1706 }
 0x546   : > { %v1720_v21 = vsub.f32 %v6543_v34, %v1707_v32  ;;  %5538 = vpow2.f32 %v1733_v37 }
 0x547   : > { %v6627_v31 = vpop.eup %5532 }
 0x548   : > { %v1747_v7 = vsel %vm1248_vm5, %v6627_v31, 0.0  ;;  %v1735_v16 = vmul.f32 1.442695, %v1720_v21 }
 0x549   : > { %1748 = vadd.xlane.f32.xlu0 %v1747_v7  ;;  %v1806_v46 = vpop.permute.xlu0 %1805 }
 0x54a   : > { %5540 = vpow2.f32 %v1735_v16 }
 0x54b   : > { %v6631_v6 = vpop.eup %5534 }
 0x54c   : > { %v1750_v23 = vsel %vm1248_vm5, %v6631_v6, 0.0 }
 0x54d   : > { %1751 = vadd.xlane.f32.xlu0 %v1750_v23  ;;  %v6645_v53 = vpop.permute.xlu0 %1803 }
 0x54f   : > { %v6635_v18 = vpop.eup %5536 }
 0x550   : > { %v1753_v24 = vsel %vm1248_vm5, %v6635_v18, 0.0 }
 0x551   : > { %1754 = vadd.xlane.f32.xlu1 %v1753_v24 }
 0x553   : > { %v6647_v30 = vpop.eup %5538 }
 0x554   : > { %v1756_v7 = vsel %vm1248_vm5, %v6647_v30, 0.0 }
 0x557   : > { %v6652_v13 = vpop.eup %5540 }
 0x558   : > { %v1759_v34 = vsel %vm1248_vm5, %v6652_v13, 0.0 }
 0x562   : > { %1801 = vrot.lane.b32.xlu1 %v6288_v2, %s5795_s18 }
 0x563   : > { %1799 = vrot.lane.b32.xlu0 %v6294_v3, %s5795_s18 }
 0x57e   : > { %v1713_v47 = vpop.xlane.xlu0 %1712 }
 0x57f   : > { %v1722_v20 = vsub.f32 %v6561_v48, %v1713_v47  ;;  %v1710_v48 = vpop.xlane.xlu1 %1709 }
 0x580   : > { %v1721_v22 = vsub.f32 %v6549_v35, %v1710_v48 }
 0x581   : > { %v1739_v14 = vmul.f32 1.442695, %v1722_v20 }
 0x582   : > { %1757 = vadd.xlane.f32.xlu0 %v1756_v7  ;;  %v1737_v32 = vmul.f32 1.442695, %v1721_v22 }
 0x583   : > { %5542 = vpow2.f32 %v1739_v14  ;;  %v1808_v29 = vpop.permute.xlu1 %1807 }
 0x586   : > { %1760 = vadd.xlane.f32.xlu1 %v1759_v34 }
 0x590   : > { %v6656_v23 = vpop.eup %5542 }
 0x591   : > { %v1765_v24 = vsel %vm1248_vm5, %v6656_v23, 0.0 }
 0x592   : > { %1766 = vadd.xlane.f32.xlu1 %v1765_v24 }
 0x598   : > { %1797 = vrot.lane.b32.xlu0 %v6302_v4, %s5795_s18 }
 0x59c   : > { %1795 = vrot.lane.b32.xlu0 %v6307_v5, %s5795_s18  ;;  %s4272_s18 = scalar_lea.sflag [#allocation5], %s466_s28 }
 0x5a3   : > { %2269 = vrot.lane.b32.xlu1 %v6246_v50, %s5796_s21 }
 0x5a6   : > { %v1305_v37 = vpop.xlane.xlu1 %1304 }
 0x5a7   : > { %5544 = vrcp.f32 %v1305_v37  ;;  %2265 = vrot.lane.b32.xlu1 %v6244_v57, %s5796_s21 }
 0x5a8   : > { %5546 = vpow2.f32 %v1737_v32 }
 0x5aa   : > { %v1308_v21 = vpop.xlane.xlu0 %1307 }
 0x5ab   : > { %5548 = vrcp.f32 %v1308_v21  ;;  %2263 = vrot.lane.b32.xlu1 %v6259_v58, %s5796_s21 }
 0x5ae   : > { %v1311_v16 = vpop.xlane.xlu1 %1310 }
 0x5af   : > { %5550 = vrcp.f32 %v1311_v16  ;;  %2261 = vrot.lane.b32.xlu1 %v6254_v55, %s5796_s21 }
 0x5b2   : > { %v1314_v35 = vpop.xlane.xlu0 %1313 }
 0x5b3   : > { %5552 = vrcp.f32 %v1314_v35  ;;  %2259 = vrot.lane.b32.xlu1 %v6275_v60, %s5796_s21 }
 0x5b4   : > { %v5545_v47 = vpop.eup %5544 }
 0x5b5   : > { %v1331_v20 = vmul.f32 %v5545_v47, %v6574_v42  ;;  %v6676_v7 = vpop.eup %5546 }
 0x5b6   : > { %v1317_v14 = vpop.xlane.xlu1 %1316  ;;  %v1762_v48 = vsel %vm1248_vm5, %v6676_v7, 0.0 }
 0x5b7   : > { %5554 = vrcp.f32 %v1317_v14  ;;  %2257 = vrot.lane.b32.xlu1 %v6270_v63, %s5796_s21  ;;  %4902 = vmatmul.mubr.msk.f32.vlgmr.msra.gmra.mxu1 %vm1248_vm5, %v1331_v20 }
 0x5b8   : > { %v5549_v34 = vpop.eup %5548  ;;  %4974 = vmatpush3.msra.mxu1 %v6565_v10  ;;  %4904 = vmatprep.mubr.msk.f32.mxu1 %vm5794_vm2, %v7955_v62 }
 0x5b9   : > { %4975 = vmatprep.subr.mxu1 %v7955_v62  ;;  %v1333_v24 = vmul.f32 %v5549_v34, %v6579_v12 }
 0x5ba   : > { %4976 = vmatpush3.msra.mxu1 %v6567_v9  ;;  %v1320_v42 = vpop.xlane.xlu0 %1319 }
 0x5bb   : > { %5556 = vrcp.f32 %v1320_v42  ;;  %4977 = vmatprep.subr.mxu1 %v7955_v62  ;;  %2255 = vrot.lane.b32.xlu1 %v6291_v8, %s5796_s21 }
 0x5bc   : > { %v5551_v10 = vpop.eup %5550  ;;  %1763 = vadd.xlane.f32.xlu0 %v1762_v48  ;;  %4905 = vmatmul.mubr.msk.f32.gmra.mxu1 %vm1248_vm5, %v1333_v24 }
 0x5bd   : > { %4978 = vmatpush3.msra.mxu1 %v1808_v29  ;;  %4907 = vmatprep.mubr.msk.f32.mxu1 %vm5794_vm2, %v7955_v62  ;;  %v1335_v9 = vmul.f32 %v5551_v10, %v6584_v17 }
 0x5be   : > { %4979 = vmatprep.subr.mxu1 %v7955_v62  ;;  %v1323_v12 = vpop.xlane.xlu1 %1322 }
 0x5bf   : > { %4980 = vmatpush3.msra.mxu1 %v1806_v46  ;;  %5558 = vrcp.f32 %v1323_v12  ;;  %2235 = vrot.lane.b32.xlu1 %v6286_v1, %s5797_s22 }
 0x5c0   : > { %v5553_v22 = vpop.eup %5552  ;;  %4981 = vmatprep.subr.mxu1 %v7955_v62  ;;  %4908 = vmatmul.mubr.msk.f32.gmra.mxu1 %vm1248_vm5, %v1335_v9 }
 0x5c1   : > { %4982 = vmatpush3.msra.mxu1 %v6645_v53  ;;  %4910 = vmatprep.mubr.msk.f32.mxu1 %vm5794_vm2, %v7955_v62  ;;  %v1337_v17 = vmul.f32 %v5553_v22, %v6589_v28  ;;  %v1486_v22 = vld [vmem:[%s7943_s8 + $0x8] sm:$0xff] }
 0x5c2   : > { %v1326_v29 = vpop.xlane.xlu0 %1325  ;;  %4983 = vmatprep.subr.mxu1 %v7955_v62 }
 0x5c3   : > { %5560 = vrcp.f32 %v1326_v29  ;;  %2239 = vrot.lane.b32.xlu1 %v6270_v63, %s5797_s22  ;;  %v1485_v29 = vld [vmem:[%s7943_s8] sm:$0xff] }
 0x5c4   : > { %v5555_v46 = vpop.eup %5554  ;;  %4911 = vmatmul.mubr.msk.f32.gmra.mxu1 %vm1248_vm5, %v1337_v17 }
 0x5c5   : > { %4913 = vmatprep.mubr.msk.f32.mxu1 %vm5794_vm2, %v7955_v62  ;;  %v1339_v53 = vmul.f32 %v5555_v46, %v6594_v41 }
 0x5c6   : > { %v1329_v32 = vpop.xlane.xlu1 %1328 }
 0x5c7   : > { %5562 = vrcp.f32 %v1329_v32  ;;  %2243 = vrot.lane.b32.xlu1 %v6254_v55, %s5797_s22  ;;  %v1960_v32 = vld [vmem:[%s7943_s8 + $0x18] sm:$0xff] }
 0x5c8   : > { %v5557_v28 = vpop.eup %5556  ;;  %4914 = vmatmul.mubr.msk.f32.gmra.mxu1 %vm1248_vm5, %v1339_v53  ;;  %5019 = vmatpush3.msra.mxu0 %v1960_v32 }
 0x5c9   : > { %4916 = vmatprep.mubr.msk.f32.mxu1 %vm5794_vm2, %v7955_v62  ;;  %v1341_v37 = vmul.f32 %v5557_v28, %v6599_v11  ;;  %5020 = vmatprep.subr.mxu0 %v7955_v62 }
 0x5ca   : > { %v1743_v35 = vpop.xlane.xlu0 %1742 }
 0x5cb   : > { %2247 = vrot.lane.b32.xlu1 %v6244_v57, %s5797_s22  ;;  %5564 = vrcp.f32 %v1743_v35 }
 0x5cc   : > { %v5559_v21 = vpop.eup %5558  ;;  %4917 = vmatmul.mubr.msk.f32.gmra.mxu1 %vm1248_vm5, %v1341_v37 }
 0x5cd   : > { %4919 = vmatprep.mubr.msk.f32.mxu1 %vm5794_vm2, %v7955_v62  ;;  %v1343_v41 = vmul.f32 %v5559_v21, %v6604_v15 }
 0x5ce   : > { %v1746_v14 = vpop.xlane.xlu1 %1745 }
 0x5cf   : > { %2251 = vrot.lane.b32.xlu1 %v6246_v50, %s5797_s22  ;;  %5566 = vrcp.f32 %v1746_v14 }
 0x5d0   : > { %v5561_v16 = vpop.eup %5560  ;;  %4920 = vmatmul.mubr.msk.f32.gmra.mxu1 %vm1248_vm5, %v1343_v41 }
 0x5d1   : > { %4922 = vmatprep.mubr.msk.f32.mxu1 %vm5794_vm2, %v7955_v62  ;;  %v1345_v11 = vmul.f32 %v5561_v16, %v6609_v25 }
 0x5d2   : > { %2267 = vrot.lane.b32.xlu0 %v6240_v45, %s5796_s21  ;;  %v1749_v15 = vpop.xlane.xlu0 %1748 }
 0x5d3   : > { %2548 = vrot.lane.b32.xlu1 %v6256_v56, %s5797_s22  ;;  %5568 = vrcp.f32 %v1749_v15 }
 0x5d4   : > { %v5563_v47 = vpop.eup %5562  ;;  %4923 = vmatmul.mubr.msk.f32.gmra.mxu1 %vm1248_vm5, %v1345_v11 }
 0x5d5   : > { %4925 = vmatprep.mubr.msk.f32.mxu1 %vm5794_vm2, %v7955_v62  ;;  %v1347_v20 = vmul.f32 %v5563_v47, %v6614_v38 }
 0x5d6   : > { %2253 = vrot.lane.b32.xlu0 %v6286_v1, %s5796_s21  ;;  %v1752_v25 = vpop.xlane.xlu0 %1751  ;;  %s5798_s21 = smov 16  }
 0x5d7   : > { %2546 = vrot.lane.b32.xlu1 %v6262_v0, %s5797_s22  ;;  %5570 = vrcp.f32 %v1752_v25 }
 0x5d8   : > { %4926 = vmatmul.mubr.msk.f32.gmra.mxu1 %vm1248_vm5, %v1347_v20  ;;  %v5565_v10 = vpop.eup %5564 }
 0x5d9   : > { %4991 = vmatprep.mubr.msk.f32.mxu1 %vm5794_vm2, %v7955_v62  ;;  %v1769_v9 = vmul.f32 %v5565_v10, %v6619_v26 }
 0x5da   : > { %2237 = vrot.lane.b32.xlu0 %v6291_v8, %s5797_s22  ;;  %v1755_v34 = vpop.xlane.xlu1 %1754  ;;  %v1800_v24 = vpop.permute.xlu0 %1799 }
 0x5db   : > { %2544 = vrot.lane.b32.xlu1 %v6272_v59, %s5797_s22  ;;  %5572 = vrcp.f32 %v1755_v34 }
 0x5dc   : > { %v5567_v17 = vpop.eup %5566 }
 0x5dd   : > { %v1771_v26 = vmul.f32 %v5567_v17, %v6623_v40  ;;  %v1959_v40 = vld [vmem:[%s7943_s8 + $0x10] sm:$0xff] }
 0x5de   : > { %2241 = vrot.lane.b32.xlu0 %v6275_v60, %s5797_s22  ;;  %v1802_v38 = vpop.permute.xlu1 %1801  ;;  %5021 = vmatpush3.msra.mxu0 %v1959_v40 }
 0x5df   : > { %2542 = vrot.lane.b32.xlu1 %v6278_v61, %s5797_s22  ;;  %4984 = vmatpush3.msra.mxu1 %v1802_v38 }
 0x5e0   : > { %4985 = vmatprep.subr.mxu1 %v7955_v62  ;;  %v5569_v46 = vpop.eup %5568  ;;  %5080 = vmatprep.subr.mxu0 %v7955_v62 }
 0x5e1   : > { %4986 = vmatpush3.msra.mxu1 %v1800_v24  ;;  %v1773_v28 = vmul.f32 %v5569_v46, %v6627_v31 }
 0x5e2   : > { %2245 = vrot.lane.b32.xlu0 %v6259_v58, %s5797_s22  ;;  %4987 = vmatprep.subr.mxu1 %v7955_v62 }
 0x5e4   : > { %v5571_v37 = vpop.eup %5570 }
 0x5e5   : > { %v1775_v21 = vmul.f32 %v5571_v37, %v6631_v6 }
 0x5e6   : > { %2249 = vrot.lane.b32.xlu0 %v6240_v45, %s5797_s22 }
 0x5e8   : > { %v5573_v41 = vpop.eup %5572 }
 0x5e9   : > { %v1777_v31 = vmul.f32 %v5573_v41, %v6635_v18 }
 0x5ea   : > { %2550 = vrot.lane.b32.xlu0 %v6248_v54, %s5797_s22 }
 0x60b   : > { %v1758_v42 = vpop.xlane.xlu0 %1757 }
 0x60c   : > { %5574 = vrcp.f32 %v1758_v42 }
 0x60f   : > { %v1798_v48 = vpop.permute.xlu0 %1797  ;;  %v1761_v53 = vpop.xlane.xlu1 %1760 }
 0x610   : > { %4988 = vmatpush3.msra.mxu1 %v1798_v48  ;;  %5576 = vrcp.f32 %v1761_v53 }
 0x611   : > { %4989 = vmatprep.subr.mxu1 %v7955_v62 }
 0x613   : > { %v1796_v12 = vpop.permute.xlu0 %1795 }
 0x614   : > { %4990 = vmatpush3.msra.mxu1 %v1796_v12 }
 0x615   : > { %4992 = vmatmul.mubr.msk.f32.vlgmr.msra.gmra.mxu1 %vm1248_vm5, %v1769_v9  ;;  %5049 = vmatprep.subr.mxu1 %v7955_v62 }
 0x616   : > { %4994 = vmatprep.mubr.msk.f32.mxu1 %vm5794_vm2, %v7955_v62  ;;  %5050 = vmatpush3.msra.mxu1 %v1486_v22 }
 0x617   : > { %5051 = vmatprep.subr.mxu1 %v7955_v62 }
 0x618   : > { %5052 = vmatpush3.msra.mxu1 %v1485_v29 }
 0x619   : > { %4995 = vmatmul.mubr.msk.f32.gmra.mxu1 %vm1248_vm5, %v1771_v26  ;;  %5125 = vmatprep.subr.mxu1 %v7955_v62  ;;  %v5575_v35 = vpop.eup %5574 }
 0x61a   : > { %4997 = vmatprep.mubr.msk.f32.mxu1 %vm5794_vm2, %v7955_v62  ;;  %v1779_v47 = vmul.f32 %v5575_v35, %v6647_v30 }
 0x61b   : > { %v1767_v16 = vpop.xlane.xlu1 %1766 }
 0x61d   : > { %4998 = vmatmul.mubr.msk.f32.gmra.mxu1 %vm1248_vm5, %v1773_v28  ;;  %v5577_v6 = vpop.eup %5576 }
 0x61e   : > { %5000 = vmatprep.mubr.msk.f32.mxu1 %vm5794_vm2, %v7955_v62  ;;  %v1781_v15 = vmul.f32 %v5577_v6, %v6652_v13 }
 0x61f   : > { %v6799_v11 = vpop.permute.xlu1 %2269 }
 0x621   : > { %5001 = vmatmul.mubr.msk.f32.gmra.mxu1 %vm1248_vm5, %v1775_v21 }
 0x622   : > { %5003 = vmatprep.mubr.msk.f32.mxu1 %vm5794_vm2, %v7955_v62 }
 0x623   : > { %v6806_v20 = vpop.permute.xlu1 %2265 }
 0x625   : > { %5004 = vmatmul.mubr.msk.f32.gmra.mxu1 %vm1248_vm5, %v1777_v31 }
 0x626   : > { %5006 = vmatprep.mubr.msk.f32.mxu1 %vm5794_vm2, %v7955_v62 }
 0x627   : > { %v6811_v18 = vpop.permute.xlu1 %2263 }
 0x629   : > { %5007 = vmatmul.mubr.msk.f32.gmra.mxu1 %vm1248_vm5, %v1779_v47 }
 0x62a   : > { %5009 = vmatprep.mubr.msk.f32.mxu1 %vm5794_vm2, %v7955_v62 }
 0x62b   : > { %v6813_v14 = vpop.permute.xlu1 %2261 }
 0x62d   : > { %5010 = vmatmul.mubr.msk.f32.gmra.mxu1 %vm1248_vm5, %v1781_v15 }
 0x62e   : > { %5012 = vmatprep.mubr.msk.f32.mxu1 %vm5794_vm2, %v7955_v62 }
 0x62f   : > { %v6815_v30 = vpop.permute.xlu1 %2259 }
 0x633   : > { %v6817_v25 = vpop.permute.xlu1 %2257 }
 0x637   : > { %v6819_v38 = vpop.permute.xlu1 %2255 }
 0x63b   : > { %v6821_v13 = vpop.permute.xlu1 %2235 }
 0x63f   : > { %v6827_v9 = vpop.permute.xlu1 %2239 }
 0x643   : > { %v6837_v17 = vpop.permute.xlu1 %2243 }
 0x645   : > { %v1764_v34 = vpop.xlane.xlu0 %1763 }
 0x646   : > { %5578 = vrcp.f32 %v1764_v34 }
 0x647   : > { %5580 = vrcp.f32 %v1767_v16  ;;  %v6841_v29 = vpop.permute.xlu1 %2247 }
 0x649   : > { %v6823_v42 = vpop.permute.xlu0 %2267 }
 0x64b   : > { %v6845_v46 = vpop.permute.xlu1 %2251 }
 0x64d   : > { %v6832_v22 = vpop.permute.xlu0 %2253 }
 0x653   : > { %v5579_v24 = vpop.eup %5578 }
 0x654   : > { %v1783_v48 = vmul.f32 %v5579_v24, %v6676_v7  ;;  %v5581_v10 = vpop.eup %5580  ;;  %v6839_v7 = vpop.permute.xlu0 %2237 }
 0x655   : > { %v1785_v12 = vmul.f32 %v5581_v10, %v6656_v23  ;;  %v2549_v23 = vpop.permute.xlu1 %2548 }
 0x656   : > { %5013 = vmatmul.mubr.msk.f32.gmra.mxu1 %vm1248_vm5, %v1783_v48 }
 0x657   : > { %5015 = vmatprep.mubr.msk.f32.mxu1 %vm5794_vm2, %v7955_v62 }
 0x658   : > { %v6843_v26 = vpop.permute.xlu0 %2241 }
 0x659   : > { %v2547_v40 = vpop.permute.xlu1 %2546 }
 0x65a   : > { %5016 = vmatmul.mubr.msk.f32.gmra.mxu1 %vm1248_vm5, %v1785_v12 }
 0x65b   : > { %5053 = vmatprep.mubr.msk.f32.mxu1 %vm5794_vm2, %v7955_v62 }
 0x65c   : > { %v6847_v53 = vpop.permute.xlu0 %2245 }
 0x65d   : > { %v2545_v41 = vpop.permute.xlu1 %2544 }
 0x660   : > { %v6849_v32 = vpop.permute.xlu0 %2249 }
 0x661   : > { %v2543_v47 = vpop.permute.xlu1 %2542 }
 0x664   : > { %v2551_v37 = vpop.permute.xlu0 %2550 }
 0x677   : > { %v1441_v28 = vpop.f32.mrf.mxu1 }
 0x678   : > { %5054 = vmatmul.mubr.msk.f32.vlgmr.msra.gmra.mxu1 %vm1081_vm3, %v1441_v28 }
 0x679   : > { %5126 = vmatpush3.msra.mxu1 %v2551_v37  ;;  %v4903_v21 = vpop.f32.mrf.mxu1  ;;  %5056 = vmatprep.mubr.msk.f32.mxu1 %vm5794_vm2, %v7955_v62 }
 0x67a   : > { %5127 = vmatprep.subr.mxu1 %v7955_v62 }
 0x67b   : > { %5128 = vmatpush3.msra.mxu1 %v2549_v23 }
 0x67c   : > { %v1446_v16 = vpop.f32.mrf.mxu1  ;;  %5129 = vmatprep.subr.mxu1 %v7955_v62 }
 0x67d   : > { %5057 = vmatmul.mubr.msk.f32.gmra.mxu1 %vm1081_vm3, %v1446_v16 }
 0x67e   : > { %5130 = vmatpush3.msra.mxu1 %v2547_v40  ;;  %v4906_v31 = vpop.f32.mrf.mxu1  ;;  %5059 = vmatprep.mubr.msk.f32.mxu1 %vm5794_vm2, %v7955_v62 }
 0x67f   : > { %5131 = vmatprep.subr.mxu1 %v7955_v62 }
 0x680   : > { %5132 = vmatpush3.msra.mxu1 %v2545_v41  ;;  %v1451_v35 = vpop.f32.mrf.mxu1 }
 0x681   : > { %5133 = vmatprep.subr.mxu1 %v7955_v62  ;;  %5060 = vmatmul.mubr.msk.f32.gmra.mxu1 %vm1081_vm3, %v1451_v35 }
 0x682   : > { %5134 = vmatpush3.msra.mxu1 %v2543_v47  ;;  %v4909_v6 = vpop.f32.mrf.mxu1  ;;  %5062 = vmatprep.mubr.msk.f32.mxu1 %vm5794_vm2, %v7955_v62 }
 0x683   : > { %5135 = vmatprep.subr.mxu1 %v7955_v62 }
 0x684   : > { %v1456_v15 = vpop.f32.mrf.mxu1 }
 0x685   : > { %5063 = vmatmul.mubr.msk.f32.gmra.mxu1 %vm1081_vm3, %v1456_v15 }
 0x686   : > { %v4912_v34 = vpop.f32.mrf.mxu1  ;;  %5065 = vmatprep.mubr.msk.f32.mxu1 %vm5794_vm2, %v7955_v62 }
 0x688   : > { %v1461_v24 = vpop.f32.mrf.mxu1 }
 0x689   : > { %5066 = vmatmul.mubr.msk.f32.gmra.mxu1 %vm1081_vm3, %v1461_v24 }
 0x68a   : > { %v4915_v48 = vpop.f32.mrf.mxu1  ;;  %5068 = vmatprep.mubr.msk.f32.mxu1 %vm5794_vm2, %v7955_v62 }
 0x68c   : > { %v1466_v10 = vpop.f32.mrf.mxu1 }
 0x68d   : > { %5069 = vmatmul.mubr.msk.f32.gmra.mxu1 %vm1081_vm3, %v1466_v10 }
 0x68e   : > { %v4918_v12 = vpop.f32.mrf.mxu1  ;;  %5071 = vmatprep.mubr.msk.f32.mxu1 %vm5794_vm2, %v7955_v62 }
 0x690   : > { %v1471_v23 = vpop.f32.mrf.mxu1 }
 0x691   : > { %5072 = vmatmul.mubr.msk.f32.gmra.mxu1 %vm1081_vm3, %v1471_v23 }
 0x692   : > { %v4921_v40 = vpop.f32.mrf.mxu1  ;;  %5074 = vmatprep.mubr.msk.f32.mxu1 %vm5794_vm2, %v7955_v62 }
 0x694   : > { %v1476_v28 = vpop.f32.mrf.mxu1 }
 0x695   : > { %5075 = vmatmul.mubr.msk.f32.gmra.mxu1 %vm1081_vm3, %v1476_v28 }
 0x696   : > { %v4924_v37 = vpop.f32.mrf.mxu1  ;;  %5077 = vmatprep.mubr.msk.f32.mxu1 %vm5794_vm2, %v7955_v62 }
 0x698   : > { %v1481_v21 = vpop.f32.mrf.mxu1 }
 0x699   : > { %5078 = vmatmul.mubr.msk.f32.gmra.mxu1 %vm1081_vm3, %v1481_v21 }
 0x69a   : > { %v4927_v41 = vpop.f32.mrf.mxu1  ;;  %5143 = vmatprep.mubr.msk.f32.mxu1 %vm5794_vm2, %v7955_v62 }
 0x6d5   : > { %v1915_v16 = vpop.f32.mrf.mxu1 }
 0x6d6   : > { %5023 = vmatmul.mubr.msk.f32.vlgmr.msra.gmra.mxu0 %vm1081_vm3, %v1915_v16 }
 0x6d7   : > { %5081 = vmatpush3.xpose.msk.msra.mxu0 %vm1081_vm3, %v6799_v11  ;;  %v4993_v31 = vpop.f32.mrf.mxu1  ;;  %5025 = vmatprep.mubr.msk.f32.mxu0 %vm5794_vm2, %v7955_v62 }
 0x6d8   : > { %5082 = vmatprep.subr.mxu0 %v7955_v62 }
 0x6d9   : > { %v1920_v35 = vpop.f32.mrf.mxu1 }
 0x6da   : > { %5026 = vmatmul.mubr.msk.f32.gmra.mxu0 %vm1081_vm3, %v1920_v35 }
 0x6db   : > { %5083 = vmatpush3.xpose.msk.msra.mxu0 %vm1081_vm3, %v6823_v42  ;;  %v4996_v47 = vpop.f32.mrf.mxu1  ;;  %5028 = vmatprep.mubr.msk.f32.mxu0 %vm5794_vm2, %v7955_v62 }
 0x6dc   : > { %5084 = vmatprep.subr.mxu0 %v7955_v62 }
 0x6dd   : > { %v1925_v6 = vpop.f32.mrf.mxu1 }
 0x6de   : > { %5029 = vmatmul.mubr.msk.f32.gmra.mxu0 %vm1081_vm3, %v1925_v6 }
 0x6df   : > { %5085 = vmatpush3.xpose.msk.msra.mxu0 %vm1081_vm3, %v6806_v20  ;;  %v4999_v11 = vpop.f32.mrf.mxu1  ;;  %5031 = vmatprep.mubr.msk.f32.mxu0 %vm5794_vm2, %v7955_v62 }
 0x6e0   : > { %5086 = vmatprep.subr.mxu0 %v7955_v62 }
 0x6e1   : > { %v1930_v15 = vpop.f32.mrf.mxu1 }
 0x6e2   : > { %5032 = vmatmul.mubr.msk.f32.gmra.mxu0 %vm1081_vm3, %v1930_v15 }
 0x6e3   : > { %5087 = vmatpush3.xpose.msk.msra.mxu0 %vm1081_vm3, %v6811_v18  ;;  %v5002_v42 = vpop.f32.mrf.mxu1  ;;  %5034 = vmatprep.mubr.msk.f32.mxu0 %vm5794_vm2, %v7955_v62 }
 0x6e4   : > { %5088 = vmatprep.subr.mxu0 %v7955_v62 }
 0x6e5   : > { %v1935_v34 = vpop.f32.mrf.mxu1 }
 0x6e6   : > { %5035 = vmatmul.mubr.msk.f32.gmra.mxu0 %vm1081_vm3, %v1935_v34 }
 0x6e7   : > { %5089 = vmatpush3.xpose.msk.msra.mxu0 %vm1081_vm3, %v6813_v14  ;;  %v5005_v20 = vpop.f32.mrf.mxu1  ;;  %5037 = vmatprep.mubr.msk.f32.mxu0 %vm5794_vm2, %v7955_v62 }
 0x6e8   : > { %5090 = vmatprep.subr.mxu0 %v7955_v62 }
 0x6e9   : > { %v1940_v24 = vpop.f32.mrf.mxu1 }
 0x6ea   : > { %5038 = vmatmul.mubr.msk.f32.gmra.mxu0 %vm1081_vm3, %v1940_v24 }
 0x6eb   : > { %5091 = vmatpush3.xpose.msk.msra.mxu0 %vm1081_vm3, %v6815_v30  ;;  %v5008_v18 = vpop.f32.mrf.mxu1  ;;  %5040 = vmatprep.mubr.msk.f32.mxu0 %vm5794_vm2, %v7955_v62 }
 0x6ec   : > { %5092 = vmatprep.subr.mxu0 %v7955_v62 }
 0x6ed   : > { %v1945_v48 = vpop.f32.mrf.mxu1 }
 0x6ee   : > { %5041 = vmatmul.mubr.msk.f32.gmra.mxu0 %vm1081_vm3, %v1945_v48 }
 0x6ef   : > { %5093 = vmatpush3.xpose.msk.msra.mxu0 %vm1081_vm3, %v6817_v25  ;;  %v5011_v14 = vpop.f32.mrf.mxu1  ;;  %5043 = vmatprep.mubr.msk.f32.mxu0 %vm5794_vm2, %v7955_v62 }
 0x6f0   : > { %5094 = vmatprep.subr.mxu0 %v7955_v62 }
 0x6f3   : > { %5095 = vmatpush3.xpose.msk.msra.mxu0 %vm1081_vm3, %v6819_v38 }
 0x6f4   : > { %5096 = vmatprep.subr.mxu0 %v7955_v62 }
 0x6f7   : > { %5097 = vmatpush3.xpose.msk.msra.mxu0 %vm1081_vm3, %v6832_v22 }
 0x6f8   : > { %5170 = vmatprep.subr.mxu0 %v7955_v62 }
 0x716   : > { %v1950_v30 = vpop.f32.mrf.mxu1 }
 0x717   : > { %5044 = vmatmul.mubr.msk.f32.gmra.mxu0 %vm1081_vm3, %v1950_v30 }
 0x718   : > { %v5014_v25 = vpop.f32.mrf.mxu1  ;;  %5046 = vmatprep.mubr.msk.f32.mxu0 %vm5794_vm2, %v7955_v62 }
 0x71a   : > { %v1955_v10 = vpop.f32.mrf.mxu1 }
 0x71b   : > { %5047 = vmatmul.mubr.msk.f32.gmra.mxu0 %vm1081_vm3, %v1955_v10 }
 0x71c   : > { %v5017_v12 = vpop.f32.mrf.mxu1  ;;  %5098 = vmatprep.mubr.msk.f32.mxu0 %vm5794_vm2, %v7955_v62 }
 0x71f   : > { %5099 = vmatmul.mubr.msk.f32.vlgmr.msra.gmra.mxu0 %vm1081_vm3, %v6821_v13 }
 0x720   : > { %5101 = vmatprep.mubr.msk.f32.mxu0 %vm5794_vm2, %v7955_v62 }
 0x723   : > { %5102 = vmatmul.mubr.msk.f32.gmra.mxu0 %vm1081_vm3, %v6839_v7 }
 0x724   : > { %5104 = vmatprep.mubr.msk.f32.mxu0 %vm5794_vm2, %v7955_v62 }
 0x727   : > { %5105 = vmatmul.mubr.msk.f32.gmra.mxu0 %vm1081_vm3, %v6827_v9 }
 0x728   : > { %5107 = vmatprep.mubr.msk.f32.mxu0 %vm5794_vm2, %v7955_v62 }
 0x72b   : > { %5108 = vmatmul.mubr.msk.f32.gmra.mxu0 %vm1081_vm3, %v6843_v26 }
 0x72c   : > { %5110 = vmatprep.mubr.msk.f32.mxu0 %vm5794_vm2, %v7955_v62 }
 0x72f   : > { %5111 = vmatmul.mubr.msk.f32.gmra.mxu0 %vm1081_vm3, %v6837_v17 }
 0x730   : > { %5113 = vmatprep.mubr.msk.f32.mxu0 %vm5794_vm2, %v7955_v62 }
 0x733   : > { %5114 = vmatmul.mubr.msk.f32.gmra.mxu0 %vm1081_vm3, %v6847_v53 }
 0x734   : > { %5116 = vmatprep.mubr.msk.f32.mxu0 %vm5794_vm2, %v7955_v62 }
 0x737   : > { %5117 = vmatmul.mubr.msk.f32.gmra.mxu0 %vm1081_vm3, %v6841_v29 }
 0x738   : > { %v6963_v38 = vpop.f32.mrf.mxu1  ;;  %5119 = vmatprep.mubr.msk.f32.mxu0 %vm5794_vm2, %v7955_v62 }
 0x73a   : > { %v5055_v13 = vpop.f32.mrf.mxu1 }
 0x73b   : > { %5120 = vmatmul.mubr.msk.f32.gmra.mxu0 %vm1081_vm3, %v6849_v32 }
 0x73c   : > { %5122 = vmatprep.mubr.msk.f32.mxu0 %vm5794_vm2, %v7955_v62 }
 0x73d   : > { %v6971_v9 = vpop.f32.mrf.mxu1 }
 0x73f   : > { %v5058_v22 = vpop.f32.mrf.mxu1  ;;  %5123 = vmatmul.mubr.msk.f32.gmra.mxu0 %vm1081_vm3, %v6845_v46 }
 0x740   : > { %5174 = vmatprep.mubr.msk.f32.mxu0 %vm5794_vm2, %v7955_v62 }
 0x741   : > { %v6977_v17 = vpop.f32.mrf.mxu1 }
 0x743   : > { %v5061_v7 = vpop.f32.mrf.mxu1 }
 0x745   : > { %v6979_v29 = vpop.f32.mrf.mxu1 }
 0x747   : > { %v5064_v26 = vpop.f32.mrf.mxu1 }
 0x749   : > { %v6981_v53 = vpop.f32.mrf.mxu1 }
 0x74b   : > { %v5067_v32 = vpop.f32.mrf.mxu1 }
 0x74d   : > { %v6983_v23 = vpop.f32.mrf.mxu1 }
 0x74f   : > { %v5070_v40 = vpop.f32.mrf.mxu1 }
 0x751   : > { %v6985_v28 = vpop.f32.mrf.mxu1 }
 0x753   : > { %v5073_v37 = vpop.f32.mrf.mxu1 }
 0x755   : > { %v6987_v21 = vpop.f32.mrf.mxu1 }
 0x757   : > { %v5076_v46 = vpop.f32.mrf.mxu1 }
 0x759   : > { %v6989_v41 = vpop.f32.mrf.mxu1 }
 0x75b   : > { %v5079_v16 = vpop.f32.mrf.mxu1 }
 0x796   : > { %v6991_v31 = vpop.f32.mrf.mxu0 }
 0x798   : > { %v5024_v35 = vpop.f32.mrf.mxu0 }
 0x79a   : > { %v6993_v47 = vpop.f32.mrf.mxu0 }
 0x79c   : > { %v5027_v6 = vpop.f32.mrf.mxu0 }
 0x79e   : > { %v6995_v11 = vpop.f32.mrf.mxu0 }
 0x7a0   : > { %v5030_v15 = vpop.f32.mrf.mxu0 }
 0x7a2   : > { %v6997_v42 = vpop.f32.mrf.mxu0 }
 0x7a4   : > { %v5033_v34 = vpop.f32.mrf.mxu0 }
 0x7a6   : > { %v6999_v20 = vpop.f32.mrf.mxu0 }
 0x7a8   : > { %v5036_v24 = vpop.f32.mrf.mxu0 }
 0x7aa   : > { %v7001_v18 = vpop.f32.mrf.mxu0 }
 0x7ac   : > { %v5039_v48 = vpop.f32.mrf.mxu0 }
 0x7ae   : > { %v7003_v14 = vpop.f32.mrf.mxu0 }
 0x7b0   : > { %v5042_v30 = vpop.f32.mrf.mxu0 }
 0x7d7   : > { %v7005_v25 = vpop.f32.mrf.mxu0 }
 0x7d9   : > { %v5045_v10 = vpop.f32.mrf.mxu0 }
 0x7db   : > { %v7007_v12 = vpop.f32.mrf.mxu0 }
 0x7dd   : > { %v5048_v13 = vpop.f32.mrf.mxu0 }
 0x7df   : > { %v2373_v22 = vpop.f32.mrf.mxu0 }
 0x7e0   : > { %v2417_v7 = vmul.f32 0.25, %v2373_v22 }
 0x7e1   : > { %v5100_v26 = vpop.f32.mrf.mxu0 }
 0x7e2   : > { %v2426_v32 = vsel %vm1053_vm4, %v2417_v7, -1e+30 }
 0x7e3   : > { %v2378_v40 = vpop.f32.mrf.mxu0  ;;  %v2435_v37 = vsel %vm1248_vm5, %v2426_v32, -inf }
 0x7e4   : > { %v2418_v46 = vmul.f32 0.25, %v2378_v40  ;;  %2436 = vmax.xlane.f32.xlu0 %v2435_v37 }
 0x7e5   : > { %v5103_v16 = vpop.f32.mrf.mxu0 }
 0x7e6   : > { %v2427_v35 = vsel %vm1053_vm4, %v2418_v46, -1e+30 }
 0x7e7   : > { %v2383_v6 = vpop.f32.mrf.mxu0  ;;  %v2438_v15 = vsel %vm1248_vm5, %v2427_v35, -inf }
 0x7e8   : > { %v2419_v34 = vmul.f32 0.25, %v2383_v6  ;;  %2439 = vmax.xlane.f32.xlu1 %v2438_v15 }
 0x7e9   : > { %v5106_v24 = vpop.f32.mrf.mxu0 }
 0x7ea   : > { %v7017_v48 = vsel %vm1053_vm4, %v2419_v34, -1e+30 }
 0x7eb   : > { %v2388_v30 = vpop.f32.mrf.mxu0  ;;  %v2441_v10 = vsel %vm1248_vm5, %v7017_v48, -inf }
 0x7ec   : > { %v2420_v13 = vmul.f32 0.25, %v2388_v30  ;;  %2442 = vmax.xlane.f32.xlu0 %v2441_v10 }
 0x7ed   : > { %v5109_v22 = vpop.f32.mrf.mxu0 }
 0x7ee   : > { %v7023_v7 = vsel %vm1053_vm4, %v2420_v13, -1e+30 }
 0x7ef   : > { %v2393_v26 = vpop.f32.mrf.mxu0  ;;  %v2444_v40 = vsel %vm1248_vm5, %v7023_v7, -inf }
 0x7f0   : > { %v2421_v37 = vmul.f32 0.25, %v2393_v26  ;;  %2445 = vmax.xlane.f32.xlu0 %v2444_v40 }
 0x7f1   : > { %v5112_v46 = vpop.f32.mrf.mxu0 }
 0x7f2   : > { %v7029_v16 = vsel %vm1053_vm4, %v2421_v37, -1e+30 }
 0x7f3   : > { %v2398_v6 = vpop.f32.mrf.mxu0  ;;  %v2447_v15 = vsel %vm1248_vm5, %v7029_v16, -inf }
 0x7f4   : > { %v2422_v34 = vmul.f32 0.25, %v2398_v6  ;;  %2448 = vmax.xlane.f32.xlu0 %v2447_v15 }
 0x7f5   : > { %v5115_v24 = vpop.f32.mrf.mxu0 }
 0x7f6   : > { %v7035_v30 = vsel %vm1053_vm4, %v2422_v34, -1e+30 }
 0x7f7   : > { %v2403_v10 = vpop.f32.mrf.mxu0  ;;  %v2450_v13 = vsel %vm1248_vm5, %v7035_v30, -inf }
 0x7f8   : > { %v2423_v22 = vmul.f32 0.25, %v2403_v10  ;;  %2451 = vmax.xlane.f32.xlu1 %v2450_v13 }
 0x7f9   : > { %v5118_v26 = vpop.f32.mrf.mxu0 }
 0x7fa   : > { %v7041_v40 = vsel %vm1053_vm4, %v2423_v22, -1e+30 }
 0x7fb   : > { %v2408_v37 = vpop.f32.mrf.mxu0  ;;  %v2453_v46 = vsel %vm1248_vm5, %v7041_v40, -inf }
 0x7fc   : > { %v2424_v6 = vmul.f32 0.25, %v2408_v37  ;;  %2454 = vmax.xlane.f32.xlu0 %v2453_v46 }
 0x7fd   : > { %v5121_v15 = vpop.f32.mrf.mxu0 }
 0x7fe   : > { %v7047_v34 = vsel %vm1053_vm4, %v2424_v6, -1e+30 }
 0x7ff   : > { %v2413_v24 = vpop.f32.mrf.mxu0  ;;  %v2456_v10 = vsel %vm1248_vm5, %v7047_v34, -inf }
 0x800   : > { %v2425_v13 = vmul.f32 0.25, %v2413_v24  ;;  %2457 = vmax.xlane.f32.xlu1 %v2456_v10 }
 0x801   : > { %v5124_v26 = vpop.f32.mrf.mxu0 }
 0x802   : > { %v2434_v22 = vsel %vm1053_vm4, %v2425_v13, -1e+30 }
 0x803   : > { %v2459_v62 = vsel %vm1248_vm5, %v2434_v22, -inf }
 0x804   : > { %2460 = vmax.xlane.f32.xlu0 %v2459_v62 }
 0x811   : > { %2538 = vrot.lane.b32.xlu1 %v6294_v3, %s5797_s22 }
 0x815   : > { %2536 = vrot.lane.b32.xlu1 %v6302_v4, %s5797_s22 }
 0x819   : > { %2534 = vrot.lane.b32.xlu1 %v6307_v5, %s5797_s22 }
 0x81a   : > { %2540 = vrot.lane.b32.xlu0 %v6288_v2, %s5797_s22  ;;  %s5799_s22 = smov 80  }
 0x86d   : > { %v2437_v37 = vpop.xlane.xlu0 %2436 }
 0x86e   : > { %v2462_v46 = vsub.f32 %v2426_v32, %v2437_v37 }
 0x870   : > { %v2471_v6 = vmul.f32 1.442695, %v2462_v46 }
 0x871   : > { %v2440_v15 = vpop.xlane.xlu1 %2439 }
 0x872   : > { %5582 = vpow2.f32 %v2471_v6  ;;  %v2463_v24 = vsub.f32 %v2427_v35, %v2440_v15 }
 0x874   : > { %v2473_v10 = vmul.f32 1.442695, %v2463_v24 }
 0x875   : > { %v2443_v62 = vpop.xlane.xlu0 %2442 }
 0x876   : > { %5584 = vpow2.f32 %v2473_v10  ;;  %v2464_v44 = vsub.f32 %v7017_v48, %v2443_v62 }
 0x878   : > { %v2475_v39 = vmul.f32 1.442695, %v2464_v44 }
 0x879   : > { %v2446_v26 = vpop.xlane.xlu0 %2445 }
 0x87a   : > { %v2465_v36 = vsub.f32 %v7023_v7, %v2446_v26 }
 0x87c   : > { %v2477_v19 = vmul.f32 1.442695, %v2465_v36 }
 0x87d   : > { %v2449_v32 = vpop.xlane.xlu0 %2448 }
 0x87f   : > { %v7062_v13 = vpop.eup %5582 }
 0x880   : > { %v2489_v52 = vsel %vm1248_vm5, %v7062_v13, 0.0 }
 0x881   : > { %2490 = vadd.xlane.f32.xlu1 %v2489_v52  ;;  %v2452_v37 = vpop.xlane.xlu1 %2451  ;;  %v7987_v52 = vmov 0.0  }
 0x883   : > { %v7066_v51 = vpop.eup %5584 }
 0x884   : > { %v2492_v49 = vsel %vm1248_vm5, %v7066_v51, 0.0 }
 0x885   : > { %2493 = vadd.xlane.f32.xlu0 %v2492_v49  ;;  %v2455_v46 = vpop.xlane.xlu0 %2454 }
 0x889   : > { %v2458_v35 = vpop.xlane.xlu1 %2457 }
 0x88d   : > { %v2461_v6 = vpop.xlane.xlu0 %2460  ;;  %v2539_v15 = vpop.permute.xlu1 %2538 }
 0x88e   : > { %v2470_v43 = vsub.f32 %v2434_v22, %v2461_v6 }
 0x890   : > { %v2487_v33 = vmul.f32 1.442695, %v2470_v43 }
 0x891   : > { %v2541_v24 = vpop.permute.xlu0 %2540  ;;  %v2537_v10 = vpop.permute.xlu1 %2536 }
 0x892   : > { %2878 = vrot.lane.b32.xlu1 %v6240_v45, %s5798_s21  ;;  %5136 = vmatpush3.msra.mxu1 %v2541_v24 }
 0x893   : > { %5137 = vmatprep.subr.mxu1 %v7987_v52 }
 0x894   : > { %5138 = vmatpush3.msra.mxu1 %v2539_v15  ;;  %v2466_v15 = vsub.f32 %v7029_v16, %v2449_v32  ;;  %v2469_v32 = vsub.f32 %v7047_v34, %v2458_v35 }
 0x895   : > { %5139 = vmatprep.subr.mxu1 %v7987_v52  ;;  %v2535_v49 = vpop.permute.xlu1 %2534 }
 0x896   : > { %2876 = vrot.lane.b32.xlu1 %v6244_v57, %s5798_s21  ;;  %5140 = vmatpush3.msra.mxu1 %v2537_v10  ;;  %v2479_v24 = vmul.f32 1.442695, %v2466_v15  ;;  %v2468_v10 = vsub.f32 %v7041_v40, %v2455_v46  ;;  %v2485_v48 = vmul.f32 1.442695, %v2469_v32 }
 0x897   : > { %5141 = vmatprep.subr.mxu1 %v7987_v52 }
 0x898   : > { %5142 = vmatpush3.msra.mxu1 %v2535_v49  ;;  %5586 = vpow2.f32 %v2479_v24  ;;  %v2483_v49 = vmul.f32 1.442695, %v2468_v10 }
 0x899   : > { %5201 = vmatprep.subr.mxu1 %v7987_v52 }
 0x89a   : > { %2874 = vrot.lane.b32.xlu1 %v6259_v58, %s5798_s21  ;;  %5588 = vpow2.f32 %v2483_v49 }
 0x89b   : > { %2880 = vrot.lane.b32.xlu0 %v6246_v50, %s5798_s21  ;;  %5590 = vpow2.f32 %v2475_v39  ;;  %v2467_v50 = vsub.f32 %v7035_v30, %v2452_v37 }
 0x89c   : > { %5592 = vpow2.f32 %v2487_v33 }
 0x89d   : > { %5594 = vpow2.f32 %v2477_v19  ;;  %v2481_v16 = vmul.f32 1.442695, %v2467_v50 }
 0x89e   : > { %2872 = vrot.lane.b32.xlu1 %v6254_v55, %s5798_s21 }
 0x89f   : > { %5596 = vpow2.f32 %v2481_v16 }
 0x8a0   : > { %5598 = vpow2.f32 %v2485_v48 }
 0x8a5   : > { %v7090_v40 = vpop.eup %5586 }
 0x8a6   : > { %v2501_v44 = vsel %vm1248_vm5, %v7090_v40, 0.0 }
 0x8a7   : > { %v7094_v22 = vpop.eup %5588 }
 0x8a8   : > { %v7096_v43 = vpop.eup %5590  ;;  %v2507_v33 = vsel %vm1248_vm5, %v7094_v22, 0.0 }
 0x8a9   : > { %v7100_v19 = vpop.eup %5592  ;;  %v2495_v36 = vsel %vm1248_vm5, %v7096_v43, 0.0 }
 0x8aa   : > { %v2513_v39 = vsel %vm1248_vm5, %v7100_v19, 0.0  ;;  %v7106_v50 = vpop.eup %5594 }
 0x8ab   : > { %v2498_v7 = vsel %vm1248_vm5, %v7106_v50, 0.0 }
 0x8ac   : > { %v7110_v30 = vpop.eup %5596 }
 0x8ad   : > { %v2504_v34 = vsel %vm1248_vm5, %v7110_v30, 0.0  ;;  %v7114_v62 = vpop.eup %5598 }
 0x8ae   : > { %v2510_v26 = vsel %vm1248_vm5, %v7114_v62, 0.0 }
 0x8ba   : > { %2502 = vadd.xlane.f32.xlu0 %v2501_v44 }
 0x8be   : > { %2508 = vadd.xlane.f32.xlu0 %v2507_v33 }
 0x8c2   : > { %2496 = vadd.xlane.f32.xlu1 %v2495_v36  ;;  %2514 = vadd.xlane.f32.xlu0 %v2513_v39 }
 0x8c6   : > { %2499 = vadd.xlane.f32.xlu1 %v2498_v7 }
 0x8ca   : > { %2505 = vadd.xlane.f32.xlu1 %v2504_v34 }
 0x8ce   : > { %2511 = vadd.xlane.f32.xlu1 %v2510_v26  ;;  %v2698_v26 = vld [vmem:[%s7943_s8 + $0x20] sm:$0xff] }
 0x8d8   : > { %2870 = vrot.lane.b32.xlu0 %v6275_v60, %s5798_s21 }
 0x8dc   : > { %3159 = vrot.lane.b32.xlu0 %v6256_v56, %s5799_s22  ;;  %v2699_v56 = vld [vmem:[%s7943_s8 + $0x28] sm:$0xff] }
 0x8dd   : > { %5171 = vmatpush3.msra.mxu0 %v2699_v56 }
 0x8de   : > { %5172 = vmatprep.subr.mxu0 %v7987_v52 }
 0x8df   : > { %2868 = vrot.lane.b32.xlu1 %v6270_v63, %s5798_s21  ;;  %5173 = vmatpush3.msra.mxu0 %v2698_v26 }
 0x8e0   : > { %3153 = vrot.lane.b32.xlu0 %v6278_v61, %s5799_s22  ;;  %5246 = vmatprep.subr.mxu0 %v7987_v52 }
 0x8e3   : > { %2866 = vrot.lane.b32.xlu1 %v6291_v8, %s5798_s21 }
 0x8e4   : > { %3149 = vrot.lane.b32.xlu0 %v6294_v3, %s5799_s22 }
 0x8e7   : > { %2864 = vrot.lane.b32.xlu1 %v6286_v1, %s5798_s21 }
 0x8eb   : > { %2846 = vrot.lane.b32.xlu1 %v6286_v1, %s5799_s22 }
 0x90a   : > { %v2491_v61 = vpop.xlane.xlu1 %2490 }
 0x90b   : > { %5600 = vrcp.f32 %v2491_v61 }
 0x90e   : > { %v2494_v37 = vpop.xlane.xlu0 %2493  ;;  %v2879_v35 = vpop.permute.xlu1 %2878 }
 0x90f   : > { %5602 = vrcp.f32 %v2494_v37 }
 0x912   : > { %v2881_v6 = vpop.permute.xlu0 %2880  ;;  %v2877_v24 = vpop.permute.xlu1 %2876 }
 0x918   : > { %v5601_v46 = vpop.eup %5600 }
 0x919   : > { %v2517_v3 = vmul.f32 %v5601_v46, %v7062_v13  ;;  %v2875_v13 = vpop.permute.xlu1 %2874 }
 0x91b   : > { %5144 = vmatmul.mubr.msk.f32.vlgmr.msra.gmra.mxu1 %vm1248_vm5, %v2517_v3 }
 0x91c   : > { %v5603_v15 = vpop.eup %5602  ;;  %5202 = vmatpush3.xpose.msk.msra.mxu1 %vm1081_vm3, %v2881_v6  ;;  %5146 = vmatprep.mubr.msk.f32.mxu1 %vm5794_vm2, %v7987_v52 }
 0x91d   : > { %5203 = vmatprep.subr.mxu1 %v7987_v52  ;;  %v2519_v1 = vmul.f32 %v5603_v15, %v7066_v51  ;;  %v2873_v51 = vpop.permute.xlu1 %2872 }
 0x91f   : > { %5147 = vmatmul.mubr.msk.f32.gmra.mxu1 %vm1248_vm5, %v2519_v1 }
 0x920   : > { %5204 = vmatpush3.xpose.msk.msra.mxu1 %vm1081_vm3, %v2879_v35  ;;  %5149 = vmatprep.mubr.msk.f32.mxu1 %vm5794_vm2, %v7987_v52 }
 0x921   : > { %5205 = vmatprep.subr.mxu1 %v7987_v52 }
 0x924   : > { %5206 = vmatpush3.xpose.msk.msra.mxu1 %vm1081_vm3, %v2877_v24 }
 0x925   : > { %5207 = vmatprep.subr.mxu1 %v7987_v52 }
 0x928   : > { %5208 = vmatpush3.xpose.msk.msra.mxu1 %vm1081_vm3, %v2875_v13 }
 0x929   : > { %5209 = vmatprep.subr.mxu1 %v7987_v52 }
 0x92c   : > { %5210 = vmatpush3.xpose.msk.msra.mxu1 %vm1081_vm3, %v2873_v51 }
 0x92d   : > { %5211 = vmatprep.subr.mxu1 %v7987_v52 }
 0x943   : > { %v2503_v10 = vpop.xlane.xlu0 %2502 }
 0x947   : > { %v2509_v49 = vpop.xlane.xlu0 %2508 }
 0x94b   : > { %v2515_v16 = vpop.xlane.xlu0 %2514  ;;  %v2497_v32 = vpop.xlane.xlu1 %2496 }
 0x94c   : > { %5604 = vrcp.f32 %v2497_v32 }
 0x94f   : > { %v2871_v48 = vpop.permute.xlu0 %2870  ;;  %v2500_v44 = vpop.xlane.xlu1 %2499 }
 0x950   : > { %5606 = vrcp.f32 %v2500_v44  ;;  %5212 = vmatpush3.xpose.msk.msra.mxu1 %vm1081_vm3, %v2871_v48 }
 0x951   : > { %5213 = vmatprep.subr.mxu1 %v7987_v52  ;;  %5608 = vrcp.f32 %v2503_v10 }
 0x953   : > { %v2506_v33 = vpop.xlane.xlu1 %2505 }
 0x954   : > { %5610 = vrcp.f32 %v2506_v33 }
 0x955   : > { %5612 = vrcp.f32 %v2509_v49 }
 0x957   : > { %v2512_v36 = vpop.xlane.xlu1 %2511 }
 0x958   : > { %5614 = vrcp.f32 %v2512_v36 }
 0x959   : > { %v5605_v39 = vpop.eup %5604  ;;  %5616 = vrcp.f32 %v2515_v16 }
 0x95a   : > { %v2521_v34 = vmul.f32 %v5605_v39, %v7096_v43 }
 0x95b   : > { %v2869_v7 = vpop.permute.xlu1 %2868 }
 0x95c   : > { %5214 = vmatpush3.xpose.msk.msra.mxu1 %vm1081_vm3, %v2869_v7 }
 0x95d   : > { %v5607_v56 = vpop.eup %5606  ;;  %5150 = vmatmul.mubr.msk.f32.gmra.mxu1 %vm1248_vm5, %v2521_v34  ;;  %5215 = vmatprep.subr.mxu1 %v7987_v52 }
 0x95e   : > { %5152 = vmatprep.mubr.msk.f32.mxu1 %vm5794_vm2, %v7987_v52  ;;  %v2523_v61 = vmul.f32 %v5607_v56, %v7106_v50  ;;  %v5609_v37 = vpop.eup %5608 }
 0x95f   : > { %v2867_v43 = vpop.permute.xlu1 %2866  ;;  %v2525_v3 = vmul.f32 %v5609_v37, %v7090_v40 }
 0x960   : > { %5216 = vmatpush3.xpose.msk.msra.mxu1 %vm1081_vm3, %v2867_v43 }
 0x961   : > { %5153 = vmatmul.mubr.msk.f32.gmra.mxu1 %vm1248_vm5, %v2523_v61  ;;  %5217 = vmatprep.subr.mxu1 %v7987_v52  ;;  %v5611_v35 = vpop.eup %5610 }
 0x962   : > { %5155 = vmatprep.mubr.msk.f32.mxu1 %vm5794_vm2, %v7987_v52  ;;  %v2527_v50 = vmul.f32 %v5611_v35, %v7110_v30  ;;  %v5613_v6 = vpop.eup %5612 }
 0x963   : > { %v2865_v46 = vpop.permute.xlu1 %2864  ;;  %v2529_v40 = vmul.f32 %v5613_v6, %v7094_v22 }
 0x964   : > { %5218 = vmatpush3.xpose.msk.msra.mxu1 %vm1081_vm3, %v2865_v46 }
 0x965   : > { %5156 = vmatmul.mubr.msk.f32.gmra.mxu1 %vm1248_vm5, %v2525_v3  ;;  %5291 = vmatprep.subr.mxu1 %v7987_v52  ;;  %v5615_v15 = vpop.eup %5614 }
 0x966   : > { %5158 = vmatprep.mubr.msk.f32.mxu1 %vm5794_vm2, %v7987_v52  ;;  %v2531_v1 = vmul.f32 %v5615_v15, %v7114_v62  ;;  %v5617_v24 = vpop.eup %5616 }
 0x967   : > { %v2533_v30 = vmul.f32 %v5617_v24, %v7100_v19  ;;  %v2847_v22 = vpop.permute.xlu1 %2846 }
 0x969   : > { %5159 = vmatmul.mubr.msk.f32.gmra.mxu1 %vm1248_vm5, %v2527_v50 }
 0x96a   : > { %5161 = vmatprep.mubr.msk.f32.mxu1 %vm5794_vm2, %v7987_v52 }
 0x96d   : > { %5162 = vmatmul.mubr.msk.f32.gmra.mxu1 %vm1248_vm5, %v2529_v40 }
 0x96e   : > { %5164 = vmatprep.mubr.msk.f32.mxu1 %vm5794_vm2, %v7987_v52 }
 0x971   : > { %5165 = vmatmul.mubr.msk.f32.gmra.mxu1 %vm1248_vm5, %v2531_v1 }
 0x972   : > { %5167 = vmatprep.mubr.msk.f32.mxu1 %vm5794_vm2, %v7987_v52 }
 0x975   : > { %5168 = vmatmul.mubr.msk.f32.gmra.mxu1 %vm1248_vm5, %v2533_v30 }
 0x976   : > { %5219 = vmatprep.mubr.msk.f32.mxu1 %vm5794_vm2, %v7987_v52 }
 0x979   : > { %5220 = vmatmul.mubr.msk.f32.vlgmr.msra.gmra.mxu1 %vm1081_vm3, %v2847_v22 }
 0x97a   : > { %5222 = vmatprep.mubr.msk.f32.mxu1 %vm5794_vm2, %v7987_v52 }
 0x9db   : > { %v2654_v62 = vpop.f32.mrf.mxu1 }
 0x9dc   : > { %5175 = vmatmul.mubr.msk.f32.vlgmr.msra.gmra.mxu0 %vm1081_vm3, %v2654_v62  ;;  %v2202_v62 = vadd.f32 %v6977_v17, %v6995_v11  ;;  %v2212_v17 = vadd.f32 %v6981_v53, %v6999_v20  ;;  %v2227_v53 = vadd.f32 %v6987_v21, %v7005_v25  ;;  %v3310_v21 = vld [vmem:[%s7943_s8 + $0x38] sm:$0xff] }
 0x9dd   : > { %v5145_v13 = vpop.f32.mrf.mxu1  ;;  %5177 = vmatprep.mubr.msk.f32.mxu0 %vm5794_vm2, %v7987_v52  ;;  %5292 = vmatpush3.msra.mxu1 %v3310_v21 }
 0x9de   : > { %5293 = vmatprep.subr.mxu1 %v7987_v52 }
 0x9df   : > { %v2659_v51 = vpop.f32.mrf.mxu1 }
 0x9e0   : > { %5178 = vmatmul.mubr.msk.f32.gmra.mxu0 %vm1081_vm3, %v2659_v51 }
 0x9e1   : > { %v5148_v19 = vpop.f32.mrf.mxu1  ;;  %5180 = vmatprep.mubr.msk.f32.mxu0 %vm5794_vm2, %v7987_v52 }
 0xa1d   : > { %v2664_v10 = vpop.f32.mrf.mxu1 }
 0xa1e   : > { %5181 = vmatmul.mubr.msk.f32.gmra.mxu0 %vm1081_vm3, %v2664_v10 }
 0xa1f   : > { %v5151_v49 = vpop.f32.mrf.mxu1  ;;  %5183 = vmatprep.mubr.msk.f32.mxu0 %vm5794_vm2, %v7987_v52 }
 0xa20   : > { %v2207_v49 = vadd.f32 %v6979_v29, %v6997_v42  ;;  %v2222_v42 = vadd.f32 %v6985_v28, %v7003_v14 }
 0xa21   : > { %v2669_v16 = vpop.f32.mrf.mxu1 }
 0xa22   : > { %5184 = vmatmul.mubr.msk.f32.gmra.mxu0 %vm1081_vm3, %v2669_v16 }
 0xa23   : > { %v5154_v32 = vpop.f32.mrf.mxu1  ;;  %5186 = vmatprep.mubr.msk.f32.mxu0 %vm5794_vm2, %v7987_v52 }
 0xa25   : > { %v2674_v48 = vpop.f32.mrf.mxu1 }
 0xa26   : > { %5187 = vmatmul.mubr.msk.f32.gmra.mxu0 %vm1081_vm3, %v2674_v48 }
 0xa27   : > { %v5157_v44 = vpop.f32.mrf.mxu1  ;;  %5189 = vmatprep.mubr.msk.f32.mxu0 %vm5794_vm2, %v7987_v52 }
 0xa29   : > { %v2679_v33 = vpop.f32.mrf.mxu1 }
 0xa2a   : > { %5190 = vmatmul.mubr.msk.f32.gmra.mxu0 %vm1081_vm3, %v2679_v33 }
 0xa2b   : > { %v5160_v36 = vpop.f32.mrf.mxu1  ;;  %5192 = vmatprep.mubr.msk.f32.mxu0 %vm5794_vm2, %v7987_v52 }
 0xa2c   : > { %v2217_v36 = vadd.f32 %v6983_v23, %v7001_v18  ;;  %v2232_v18 = vadd.f32 %v6989_v41, %v7007_v12 }
 0xa2d   : > { %v2684_v39 = vpop.f32.mrf.mxu1 }
 0xa2e   : > { %5193 = vmatmul.mubr.msk.f32.gmra.mxu0 %vm1081_vm3, %v2684_v39 }
 0xa2f   : > { %v5163_v7 = vpop.f32.mrf.mxu1  ;;  %5195 = vmatprep.mubr.msk.f32.mxu0 %vm5794_vm2, %v7987_v52 }
 0xa31   : > { %v2689_v34 = vpop.f32.mrf.mxu1 }
 0xa32   : > { %5196 = vmatmul.mubr.msk.f32.gmra.mxu0 %vm1081_vm3, %v2689_v34 }
 0xa33   : > { %v5166_v26 = vpop.f32.mrf.mxu1  ;;  %5198 = vmatprep.mubr.msk.f32.mxu0 %vm5794_vm2, %v7987_v52 }
 0xa35   : > { %v2694_v56 = vpop.f32.mrf.mxu1 }
 0xa36   : > { %5199 = vmatmul.mubr.msk.f32.gmra.mxu0 %vm1081_vm3, %v2694_v56 }
 0xa37   : > { %v5169_v61 = vpop.f32.mrf.mxu1  ;;  %5264 = vmatprep.mubr.msk.f32.mxu0 %vm5794_vm2, %v7987_v52 }
 0xa39   : > { %v2984_v43 = vpop.f32.mrf.mxu1 }
 0xa3a   : > { %v3028_v37 = vmul.f32 0.25, %v2984_v43 }
 0xa3b   : > { %v5221_v46 = vpop.f32.mrf.mxu1 }
 0xa3c   : > { %v3037_v3 = vsel %vm1053_vm4, %v3028_v37, -1e+30 }
 0xa3d   : > { %v3046_v35 = vsel %vm1248_vm5, %v3037_v3, -inf }
 0xa3e   : > { %3047 = vmax.xlane.f32.xlu1 %v3046_v35 }
 0xa4f   : > { %3161 = vrot.lane.b32.xlu1 %v6248_v54, %s5799_s22  ;;  %v2192_v54 = vadd.f32 %v6963_v38, %v6991_v31 }
 0xa53   : > { %3157 = vrot.lane.b32.xlu1 %v6262_v0, %s5799_s22 }
 0xa57   : > { %3155 = vrot.lane.b32.xlu1 %v6272_v59, %s5799_s22 }
 0xa5b   : > { %3151 = vrot.lane.b32.xlu1 %v6288_v2, %s5799_s22 }
 0xa5f   : > { %3147 = vrot.lane.b32.xlu1 %v6302_v4, %s5799_s22  ;;  %v2197_v4 = vadd.f32 %v6971_v9, %v6993_v47 }
 0xa63   : > { %2848 = vrot.lane.b32.xlu1 %v6291_v8, %s5799_s22 }
 0xa67   : > { %2852 = vrot.lane.b32.xlu1 %v6275_v60, %s5799_s22 }
 0xa6b   : > { %2856 = vrot.lane.b32.xlu1 %v6259_v58, %s5799_s22 }
 0xa6f   : > { %2860 = vrot.lane.b32.xlu1 %v6240_v45, %s5799_s22  ;;  %v3160_v45 = vpop.permute.xlu0 %3159 }
 0xa73   : > { %v3154_v9 = vpop.permute.xlu0 %3153 }
 0xa77   : > { %v3150_v24 = vpop.permute.xlu0 %3149 }
 0xa9c   : > { %v2793_v0 = vpop.f32.mrf.mxu0 }
 0xa9d   : > { %v7249_v59 = vadd.f32 %v2793_v0, %v2192_v54 }
 0xa9e   : > { %v5176_v2 = vpop.f32.mrf.mxu0 }
 0xaa0   : > { %v2798_v8 = vpop.f32.mrf.mxu0 }
 0xaa1   : > { %v7253_v50 = vadd.f32 %v2798_v8, %v2197_v4 }
 0xaa2   : > { %v5179_v60 = vpop.f32.mrf.mxu0 }
 0xac7   : > { %v3048_v6 = vpop.xlane.xlu1 %3047 }
 0xac8   : > { %v3073_v40 = vsub.f32 %v3037_v3, %v3048_v6 }
 0xaca   : > { %v3082_v58 = vmul.f32 1.442695, %v3073_v40 }
 0xacb   : > { %v3162_v15 = vpop.permute.xlu1 %3161 }
 0xacc   : > { %5618 = vpow2.f32 %v3082_v58  ;;  %5247 = vmatpush3.msra.mxu0 %v3162_v15 }
 0xacd   : > { %5248 = vmatprep.subr.mxu0 %v7987_v52 }
 0xace   : > { %5249 = vmatpush3.msra.mxu0 %v3160_v45 }
 0xacf   : > { %5250 = vmatprep.subr.mxu0 %v7987_v52  ;;  %v3158_v38 = vpop.permute.xlu1 %3157 }
 0xad0   : > { %5251 = vmatpush3.msra.mxu0 %v3158_v38 }
 0xad1   : > { %5252 = vmatprep.subr.mxu0 %v7987_v52 }
 0xad3   : > { %v3156_v31 = vpop.permute.xlu1 %3155 }
 0xad4   : > { %5253 = vmatpush3.msra.mxu0 %v3156_v31 }
 0xad5   : > { %5254 = vmatprep.subr.mxu0 %v7987_v52 }
 0xad6   : > { %5255 = vmatpush3.msra.mxu0 %v3154_v9 }
 0xad7   : > { %5256 = vmatprep.subr.mxu0 %v7987_v52  ;;  %v3152_v47 = vpop.permute.xlu1 %3151 }
 0xad8   : > { %5257 = vmatpush3.msra.mxu0 %v3152_v47 }
 0xad9   : > { %v7260_v1 = vpop.eup %5618  ;;  %5258 = vmatprep.subr.mxu0 %v7987_v52 }
 0xada   : > { %5259 = vmatpush3.msra.mxu0 %v3150_v24  ;;  %v3100_v30 = vsel %vm1248_vm5, %v7260_v1, 0.0 }
 0xadb   : > { %3101 = vadd.xlane.f32.xlu0 %v3100_v30  ;;  %5260 = vmatprep.subr.mxu0 %v7987_v52  ;;  %v3148_v22 = vpop.permute.xlu1 %3147 }
 0xadc   : > { %5261 = vmatpush3.msra.mxu0 %v3148_v22 }
 0xadd   : > { %5262 = vmatprep.subr.mxu0 %v7987_v52 }
 0xade   : > { %v2803_v13 = vpop.f32.mrf.mxu0 }
 0xadf   : > { %v7269_v51 = vadd.f32 %v2803_v13, %v2202_v62  ;;  %v2849_v19 = vpop.permute.xlu1 %2848 }
 0xae0   : > { %v5182_v10 = vpop.f32.mrf.mxu0  ;;  %5223 = vmatmul.mubr.msk.f32.gmra.mxu1 %vm1081_vm3, %v2849_v19 }
 0xae1   : > { %5225 = vmatprep.mubr.msk.f32.mxu1 %vm5794_vm2, %v7987_v52 }
 0xae2   : > { %v2808_v16 = vpop.f32.mrf.mxu0 }
 0xae3   : > { %v7276_v32 = vadd.f32 %v2808_v16, %v2207_v49  ;;  %v2853_v25 = vpop.permute.xlu1 %2852 }
 0xae4   : > { %v5185_v48 = vpop.f32.mrf.mxu0 }
 0xae6   : > { %v2813_v11 = vpop.f32.mrf.mxu0 }
 0xae7   : > { %v7280_v44 = vadd.f32 %v2813_v11, %v2212_v17  ;;  %v2857_v3 = vpop.permute.xlu1 %2856 }
 0xae8   : > { %v5188_v33 = vpop.f32.mrf.mxu0 }
 0xaea   : > { %v2818_v39 = vpop.f32.mrf.mxu0 }
 0xaeb   : > { %v7284_v7 = vadd.f32 %v2818_v39, %v2217_v36  ;;  %v2861_v54 = vpop.permute.xlu1 %2860 }
 0xaec   : > { %v5191_v29 = vpop.f32.mrf.mxu0 }
 0xaee   : > { %v2823_v34 = vpop.f32.mrf.mxu0 }
 0xaef   : > { %v7288_v26 = vadd.f32 %v2823_v34, %v2222_v42 }
 0xaf0   : > { %v5194_v56 = vpop.f32.mrf.mxu0 }
 0xaf1   : > { %3145 = vrot.lane.b32.xlu0 %v6307_v5, %s5799_s22  ;;  %v7988_v5 = vld [vmem:[#allocation21_spill] sm:$0xff] }
 0xaf2   : > { %v2828_v20 = vpop.f32.mrf.mxu0 }
 0xaf3   : > { %v7294_v61 = vadd.f32 %v2828_v20, %v2227_v53 }
 0xaf4   : > { %v5197_v23 = vpop.f32.mrf.mxu0 }
 0xaf5   : > { %2850 = vrot.lane.b32.xlu0 %v6270_v63, %s5799_s22  ;;  %v3309_v63 = vld [vmem:[%s7943_s8 + $0x30] sm:$0xff] }
 0xaf6   : > { %v2833_v28 = vpop.f32.mrf.mxu0  ;;  %5294 = vmatpush3.msra.mxu1 %v3309_v63 }
 0xaf7   : > { %v7300_v14 = vadd.f32 %v2833_v28, %v2232_v18  ;;  %5365 = vmatprep.subr.mxu1 %v7987_v52 }
 0xaf8   : > { %v5200_v43 = vpop.f32.mrf.mxu0 }
 0xaf9   : > { %2854 = vrot.lane.b32.xlu0 %v6254_v55, %s5799_s22 }
 0xafd   : > { %2858 = vrot.lane.b32.xlu0 %v6244_v57, %s5799_s22 }
 0xb01   : > { %2862 = vrot.lane.b32.xlu0 %v7988_v5, %s5799_s22  ;;  %s7886_s22 = scalar_lea.vmem [#allocation4], %s466_s28 }
 0xb02   : > { %s4287_s19 = sshll.u32 %s7886_s22, 4  ;;  %s4288_s19 = int_to_ptr.vmem [resolvable:$true] %s4287_s19 }
 0xb03   : > { %s5726_s21 = scalar_lea.vmem %s4288_s19, 16 }
 0xb04   : > { %p5727_p2 = scmp.ne.s32.totalorder %s4288_s19, %s5726_s21 }
 0xb06   : > { %p5728_p3 = pnand %p5727_p2, %p5922_p10 }
 0xb08   : > { %p5729_p4 = pneg %p5728_p3 }
 0xb64   : > { %v3102_v55 = vpop.xlane.xlu0 %3101 }
 0xb65   : > { %5620 = vrcp.f32 %v3102_v55 }
 0xb68   : > { %v3146_v57 = vpop.permute.xlu0 %3145 }
 0xb69   : > { %5263 = vmatpush3.msra.mxu0 %v3146_v57 }
 0xb6a   : > { %5322 = vmatprep.subr.mxu0 %v7987_v52 }
 0xb6c   : > { %v2851_v41 = vpop.permute.xlu0 %2850 }
 0xb6d   : > { %5226 = vmatmul.mubr.msk.f32.gmra.mxu1 %vm1081_vm3, %v2851_v41 }
 0xb6e   : > { %5228 = vmatprep.mubr.msk.f32.mxu1 %vm5794_vm2, %v7987_v52 }
 0xb70   : > { %v2855_v46 = vpop.permute.xlu0 %2854 }
 0xb71   : > { %5229 = vmatmul.mubr.msk.f32.gmra.mxu1 %vm1081_vm3, %v2853_v25 }
 0xb72   : > { %v5621_v12 = vpop.eup %5620  ;;  %5231 = vmatprep.mubr.msk.f32.mxu1 %vm5794_vm2, %v7987_v52 }
 0xb73   : > { %v3128_v37 = vmul.f32 %v5621_v12, %v7260_v1 }
 0xb74   : > { %v2859_v35 = vpop.permute.xlu0 %2858 }
 0xb75   : > { %5232 = vmatmul.mubr.msk.f32.gmra.mxu1 %vm1081_vm3, %v2855_v46  ;;  %5265 = vmatmul.mubr.msk.f32.vlgmr.msra.gmra.mxu0 %vm1248_vm5, %v3128_v37 }
 0xb76   : > { %5234 = vmatprep.mubr.msk.f32.mxu1 %vm5794_vm2, %v7987_v52  ;;  %5267 = vmatprep.mubr.msk.f32.mxu0 %vm5794_vm2, %v7987_v52 }
 0xb78   : > { %v2863_v0 = vpop.permute.xlu0 %2862 }
 0xb79   : > { %5235 = vmatmul.mubr.msk.f32.gmra.mxu1 %vm1081_vm3, %v2857_v3 }
 0xb7a   : > { %5237 = vmatprep.mubr.msk.f32.mxu1 %vm5794_vm2, %v7987_v52 }
 0xb7d   : > { %5238 = vmatmul.mubr.msk.f32.gmra.mxu1 %vm1081_vm3, %v2859_v35 }
 0xb7e   : > { %5240 = vmatprep.mubr.msk.f32.mxu1 %vm5794_vm2, %v7987_v52 }
 0xb81   : > { %5241 = vmatmul.mubr.msk.f32.gmra.mxu1 %vm1081_vm3, %v2861_v54 }
 0xb82   : > { %5243 = vmatprep.mubr.msk.f32.mxu1 %vm5794_vm2, %v7987_v52 }
 0xb85   : > { %5244 = vmatmul.mubr.msk.f32.gmra.mxu1 %vm1081_vm3, %v2863_v0 }
 0xb86   : > { %5295 = vmatprep.mubr.msk.f32.mxu1 %vm5794_vm2, %v7987_v52 }
 0xba0   : > { %v2989_v2 = vpop.f32.mrf.mxu1 }
 0xba1   : > { %v3029_v4 = vmul.f32 0.25, %v2989_v2 }
 0xba2   : > { %v5224_v8 = vpop.f32.mrf.mxu1 }
 0xba3   : > { %v3038_v60 = vsel %vm1053_vm4, %v3029_v4, -1e+30 }
 0xba4   : > { %v3049_v6 = vsel %vm1248_vm5, %v3038_v60, -inf }
 0xba5   : > { %3050 = vmax.xlane.f32.xlu1 %v3049_v6 }
 0xc2d   : > { %v2994_v40 = vpop.f32.mrf.mxu1 }
 0xc2e   : > { %v3030_v58 = vmul.f32 0.25, %v2994_v40  ;;  %v3051_v31 = vpop.xlane.xlu1 %3050 }
 0xc2f   : > { %v5227_v15 = vpop.f32.mrf.mxu1  ;;  %v3074_v30 = vsub.f32 %v3038_v60, %v3051_v31 }
 0xc30   : > { %v7347_v45 = vsel %vm1053_vm4, %v3030_v58, -1e+30 }
 0xc31   : > { %v2999_v38 = vpop.f32.mrf.mxu1  ;;  %v3052_v9 = vsel %vm1248_vm5, %v7347_v45, -inf  ;;  %v3084_v48 = vmul.f32 1.442695, %v3074_v30 }
 0xc32   : > { %v3031_v47 = vmul.f32 0.25, %v2999_v38  ;;  %3053 = vmax.xlane.f32.xlu0 %v3052_v9 }
 0xc33   : > { %v5230_v1 = vpop.f32.mrf.mxu1  ;;  %5622 = vpow2.f32 %v3084_v48 }
 0xc34   : > { %v3040_v24 = vsel %vm1053_vm4, %v3031_v47, -1e+30 }
 0xc35   : > { %v3004_v22 = vpop.f32.mrf.mxu1  ;;  %v3265_v62 = vpop.f32.mrf.mxu0  ;;  %v3055_v13 = vsel %vm1248_vm5, %v3040_v24, -inf }
 0xc36   : > { %v3032_v19 = vmul.f32 0.25, %v3004_v22  ;;  %5296 = vmatmul.mubr.msk.f32.vlgmr.msra.gmra.mxu1 %vm1081_vm3, %v3265_v62  ;;  %3056 = vmax.xlane.f32.xlu0 %v3055_v13 }
 0xc37   : > { %v5233_v10 = vpop.f32.mrf.mxu1  ;;  %v5266_v49 = vpop.f32.mrf.mxu0  ;;  %5298 = vmatprep.mubr.msk.f32.mxu1 %vm5794_vm2, %v7987_v52 }
 0xc38   : > { %v7359_v16 = vsel %vm1053_vm4, %v3032_v19, -1e+30 }
 0xc39   : > { %v3009_v17 = vpop.f32.mrf.mxu1  ;;  %v3058_v11 = vsel %vm1248_vm5, %v7359_v16, -inf }
 0xc3a   : > { %v3033_v33 = vmul.f32 0.25, %v3009_v17  ;;  %3059 = vmax.xlane.f32.xlu1 %v3058_v11 }
 0xc3b   : > { %v5236_v36 = vpop.f32.mrf.mxu1 }
 0xc3c   : > { %v3042_v39 = vsel %vm1053_vm4, %v3033_v33, -1e+30 }
 0xc3d   : > { %v3014_v29 = vpop.f32.mrf.mxu1  ;;  %v3061_v42 = vsel %vm1248_vm5, %v3042_v39, -inf }
 0xc3e   : > { %v3034_v34 = vmul.f32 0.25, %v3014_v29  ;;  %3062 = vmax.xlane.f32.xlu0 %v3061_v42  ;;  %v7400_v29 = vld [vmem:[%s7940_s5 + $0x1] ss:$0 sm:$0xff] }
 0xc3f   : > { %v5239_v56 = vpop.f32.mrf.mxu1 }
 0xc40   : > { %v3043_v53 = vsel %vm1053_vm4, %v3034_v34, -1e+30  ;;  %v5623_v25 = vpop.eup %5622  ;;  %v7989_v56 = vld [vmem:[#allocation12_spill] sm:$0xff] }
 0xc41   : > { %v3019_v20 = vpop.f32.mrf.mxu1  ;;  %v3064_v23 = vsel %vm1248_vm5, %v3043_v53, -inf  ;;  %v3103_v12 = vsel %vm1248_vm5, %v5623_v25, 0.0 }
 0xc42   : > { %v3035_v18 = vmul.f32 0.25, %v3019_v20  ;;  %3065 = vmax.xlane.f32.xlu1 %v3064_v23 }
 0xc43   : > { %v5242_v28 = vpop.f32.mrf.mxu1 }
 0xc44   : > { %v3044_v43 = vsel %vm1053_vm4, %v3035_v18, -1e+30 }
 0xc45   : > { %v3024_v5 = vpop.f32.mrf.mxu1  ;;  %v3067_v21 = vsel %vm1248_vm5, %v3044_v43, -inf }
 0xc46   : > { %v3036_v63 = vmul.f32 0.25, %v3024_v5  ;;  %3068 = vmax.xlane.f32.xlu0 %v3067_v21  ;;  %v3632_v5 = vld [vmem:[%s7944_s9 + $0x38] sm:$0xff]  ;;  %v3631_v21 = vld [vmem:[%s7944_s9 + $0x30] sm:$0xff] }
 0xc47   : > { %v5245_v55 = vpop.f32.mrf.mxu1  ;;  %5323 = vmatpush3.msra.mxu0 %v3632_v5 }
 0xc48   : > { %v3045_v57 = vsel %vm1053_vm4, %v3036_v63, -1e+30  ;;  %5324 = vmatprep.subr.mxu0 %v7987_v52  ;;  %v3630_v63 = vld [vmem:[%s7944_s9 + $0x28] sm:$0xff] }
 0xc49   : > { %v3070_v41 = vsel %vm1248_vm5, %v3045_v57, -inf  ;;  %5325 = vmatpush3.msra.mxu0 %v3631_v21 }
 0xc4a   : > { %3071 = vmax.xlane.f32.xlu1 %v3070_v41  ;;  %5326 = vmatprep.subr.mxu0 %v7987_v52 }
 0xc4b   : > { %5327 = vmatpush3.msra.mxu0 %v3630_v63 }
 0xc4c   : > { %5328 = vmatprep.subr.mxu0 %v7987_v52 }
 0xc4e   : > { %3104 = vadd.xlane.f32.xlu1 %v3103_v12 }
 0xcbb   : > { %v3054_v37 = vpop.xlane.xlu0 %3053 }
 0xcbc   : > { %v3075_v49 = vsub.f32 %v7347_v45, %v3054_v37 }
 0xcbe   : > { %v3086_v48 = vmul.f32 1.442695, %v3075_v49  ;;  %v3626_v49 = vld [vmem:[%s7944_s9 + $0x8] sm:$0xff] }
 0xcbf   : > { %v3057_v46 = vpop.xlane.xlu0 %3056 }
 0xcc0   : > { %v3076_v3 = vsub.f32 %v3040_v24, %v3057_v46 }
 0xcc2   : > { %v3088_v35 = vmul.f32 1.442695, %v3076_v3 }
 0xcc3   : > { %v3060_v4 = vpop.xlane.xlu1 %3059 }
 0xcc4   : > { %5624 = vpow2.f32 %v3088_v35  ;;  %v3077_v17 = vsub.f32 %v7359_v16, %v3060_v4 }
 0xcc6   : > { %v3090_v11 = vmul.f32 1.442695, %v3077_v17  ;;  %v3625_v17 = vld [vmem:[%s7944_s9] sm:$0xff] }
 0xcc7   : > { %v3063_v54 = vpop.xlane.xlu0 %3062 }
 0xcc8   : > { %v3078_v0 = vsub.f32 %v3042_v39, %v3063_v54 }
 0xcca   : > { %v3092_v2 = vmul.f32 1.442695, %v3078_v0 }
 0xccb   : > { %v3066_v8 = vpop.xlane.xlu1 %3065 }
 0xccc   : > { %5626 = vpow2.f32 %v3092_v2  ;;  %v3079_v33 = vsub.f32 %v3043_v53, %v3066_v8 }
 0xcce   : > { %v3094_v36 = vmul.f32 1.442695, %v3079_v33 }
 0xccf   : > { %v3069_v60 = vpop.xlane.xlu0 %3068 }
 0xcd0   : > { %v3080_v6 = vsub.f32 %v3044_v43, %v3069_v60 }
 0xcd1   : > { %v7376_v40 = vpop.eup %5624 }
 0xcd2   : > { %v3096_v58 = vmul.f32 1.442695, %v3080_v6  ;;  %v3109_v15 = vsel %vm1248_vm5, %v7376_v40, 0.0 }
 0xcd3   : > { %3110 = vadd.xlane.f32.xlu1 %v3109_v15  ;;  %v3072_v38 = vpop.xlane.xlu1 %3071 }
 0xcd4   : > { %5628 = vpow2.f32 %v3096_v58  ;;  %v3081_v9 = vsub.f32 %v3045_v57, %v3072_v38 }
 0xcd6   : > { %v3098_v31 = vmul.f32 1.442695, %v3081_v9 }
 0xcd7   : > { %v3105_v47 = vpop.xlane.xlu1 %3104 }
 0xcd8   : > { %5630 = vpow2.f32 %v3098_v31 }
 0xcd9   : > { %v7380_v1 = vpop.eup %5626  ;;  %5632 = vrcp.f32 %v3105_v47 }
 0xcda   : > { %v3115_v24 = vsel %vm1248_vm5, %v7380_v1, 0.0  ;;  %5634 = vpow2.f32 %v3086_v48 }
 0xcdb   : > { %3116 = vadd.xlane.f32.xlu1 %v3115_v24  ;;  %5636 = vpow2.f32 %v3090_v11 }
 0xcdc   : > { %5638 = vpow2.f32 %v3094_v36 }
 0xce1   : > { %v7384_v30 = vpop.eup %5628 }
 0xce2   : > { %v3121_v22 = vsel %vm1248_vm5, %v7384_v30, 0.0 }
 0xce3   : > { %3122 = vadd.xlane.f32.xlu1 %v3121_v22 }
 0xce5   : > { %v7388_v62 = vpop.eup %5630 }
 0xce6   : > { %v5633_v13 = vpop.eup %5632  ;;  %v3124_v19 = vsel %vm1248_vm5, %v7388_v62, 0.0 }
 0xce7   : > { %3125 = vadd.xlane.f32.xlu1 %v3124_v19  ;;  %v3130_v10 = vmul.f32 %v5633_v13, %v5623_v25  ;;  %v5635_v53 = vpop.eup %5634  ;;  %v3627_v19 = vld [vmem:[%s7944_s9 + $0x10] sm:$0xff] }
 0xce8   : > { %v3106_v23 = vsel %vm1248_vm5, %v5635_v53, 0.0  ;;  %v5637_v18 = vpop.eup %5636 }
 0xce9   : > { %5268 = vmatmul.mubr.msk.f32.gmra.mxu0 %vm1248_vm5, %v3130_v10  ;;  %v3112_v28 = vsel %vm1248_vm5, %v5637_v18, 0.0  ;;  %v5639_v43 = vpop.eup %5638 }
 0xcea   : > { %5270 = vmatprep.mubr.msk.f32.mxu0 %vm5794_vm2, %v7987_v52 }
 0xcf6   : > { %v3404_v39 = vpop.f32.mrf.mxu1 }
 0xcf7   : > { %v3448_v45 = vadd.f32 %v3404_v39, %v7249_v59  ;;  %v3118_v59 = vsel %vm1248_vm5, %v5639_v43, 0.0 }
 0xcf8   : > { %v5297_v42 = vpop.f32.mrf.mxu1 }
 0xcf9   : > { %v3462_v34 = vadd.f32 %v7400_v29, %v3448_v45  ;;  %v7481_v45 = vld [vmem:[%s7940_s5 + $0x5] ss:$0 sm:$0xff] }
 0xcfb   : > { %v7405_v20 = vadd.f32 %v3462_v34, %v7989_v56 }
 0xcfd   : > { %v3482_v16 = vsel %vm502_vm0, %v7405_v20, 0.0 }
 0xcfe   : > { %3483 = vadd.xlane.f32.xlu0 %v3482_v16 }
 0xd02   : > { %3107 = vadd.xlane.f32.xlu0 %v3106_v23 }
 0xd06   : > { %3113 = vadd.xlane.f32.xlu0 %v3112_v28 }
 0xd0a   : > { %3119 = vadd.xlane.f32.xlu0 %v3118_v59 }
 0xd5c   : > { %v3111_v25 = vpop.xlane.xlu1 %3110 }
 0xd64   : > { %v3117_v35 = vpop.xlane.xlu1 %3116 }
 0xd6c   : > { %v3123_v2 = vpop.xlane.xlu1 %3122 }
 0xd70   : > { %v3126_v58 = vpop.xlane.xlu1 %3125 }
 0xd87   : > { %v3484_v55 = vpop.xlane.xlu0 %3483 }
 0xd88   : > { %v3509_v57 = vmul.f32 0.015625, %v3484_v55 }
 0xd8a   : > { %v7425_v41 = vsub.f32 %v7405_v20, %v3509_v57 }
 0xd8b   : > { %v3108_v12 = vpop.xlane.xlu0 %3107 }
 0xd8c   : > { %5640 = vrcp.f32 %v3108_v12  ;;  %v3527_v37 = vmul.f32 %v7425_v41, %v7425_v41  ;;  %v7990_v12 = vld [vmem:[#allocation13_spill] sm:$0xff] }
 0xd8d   : > { %5642 = vrcp.f32 %v3111_v25 }
 0xd8e   : > { %v3536_v46 = vsel %vm502_vm0, %v3527_v37, 0.0 }
 0xd8f   : > { %3537 = vadd.xlane.f32.xlu0 %v3536_v46  ;;  %v3114_v3 = vpop.xlane.xlu0 %3113 }
 0xd90   : > { %5644 = vrcp.f32 %v3114_v3 }
 0xd91   : > { %5646 = vrcp.f32 %v3117_v35 }
 0xd93   : > { %v3120_v54 = vpop.xlane.xlu0 %3119 }
 0xd94   : > { %5648 = vrcp.f32 %v3120_v54 }
 0xd95   : > { %5650 = vrcp.f32 %v3123_v2  ;;  %v4034_v2 = vld [vmem:[%s7946_s11 + $0x70] sm:$0xff] }
 0xd96   : > { %5652 = vrcp.f32 %v3126_v58  ;;  %v4029_v58 = vld [vmem:[%s7946_s11 + $0x48] sm:$0xff] }
 0xd99   : > { %v5641_v0 = vpop.eup %5640 }
 0xd9a   : > { %v3132_v4 = vmul.f32 %v5641_v0, %v5635_v53  ;;  %v5643_v8 = vpop.eup %5642  ;;  %v4035_v0 = vld [vmem:[%s7946_s11 + $0x78] sm:$0xff] }
 0xd9b   : > { %v3134_v60 = vmul.f32 %v5643_v8, %v7376_v40  ;;  %v3629_v40 = vld [vmem:[%s7944_s9 + $0x20] sm:$0xff]  ;;  %5366 = vmatpush3.msra.mxu1 %v4035_v0 }
 0xd9c   : > { %5271 = vmatmul.mubr.msk.f32.gmra.mxu0 %vm1248_vm5, %v3132_v4  ;;  %5367 = vmatprep.subr.mxu1 %v7987_v52  ;;  %v4033_v4 = vld [vmem:[%s7946_s11 + $0x68] sm:$0xff]  ;;  %v4032_v8 = vld [vmem:[%s7946_s11 + $0x60] sm:$0xff] }
 0xd9d   : > { %5273 = vmatprep.mubr.msk.f32.mxu0 %vm5794_vm2, %v7987_v52  ;;  %v5645_v6 = vpop.eup %5644  ;;  %5329 = vmatpush3.msra.mxu0 %v3629_v40  ;;  %v4024_v40 = vld [vmem:[%s7946_s11 + $0x20] sm:$0xff] }
 0xd9e   : > { %v3136_v15 = vmul.f32 %v5645_v6, %v5637_v18  ;;  %v5647_v38 = vpop.eup %5646  ;;  %5330 = vmatprep.subr.mxu0 %v7987_v52  ;;  %5368 = vmatpush3.msra.mxu1 %v4034_v2  ;;  %v4030_v6 = vld [vmem:[%s7946_s11 + $0x50] sm:$0xff] }
 0xd9f   : > { %v3138_v9 = vmul.f32 %v5647_v38, %v7380_v1  ;;  %v3628_v1 = vld [vmem:[%s7944_s9 + $0x18] sm:$0xff]  ;;  %5369 = vmatprep.subr.mxu1 %v7987_v52 }
 0xda0   : > { %5274 = vmatmul.mubr.msk.f32.gmra.mxu0 %vm1248_vm5, %v3134_v60  ;;  %5370 = vmatpush3.msra.mxu1 %v4033_v4  ;;  %v4031_v60 = vld [vmem:[%s7946_s11 + $0x58] sm:$0xff] }
 0xda1   : > { %5276 = vmatprep.mubr.msk.f32.mxu0 %vm5794_vm2, %v7987_v52  ;;  %v5649_v31 = vpop.eup %5648  ;;  %5331 = vmatpush3.msra.mxu0 %v3628_v1  ;;  %v4027_v38 = vld [vmem:[%s7946_s11 + $0x38] sm:$0xff]  ;;  %v4021_v1 = vld [vmem:[%s7946_s11 + $0x8] sm:$0xff] }
 0xda2   : > { %v3140_v24 = vmul.f32 %v5649_v31, %v5639_v43  ;;  %v5651_v22 = vpop.eup %5650  ;;  %5332 = vmatprep.subr.mxu0 %v7987_v52  ;;  %5371 = vmatprep.subr.mxu1 %v7987_v52  ;;  %v4025_v31 = vld [vmem:[%s7946_s11 + $0x28] sm:$0xff] }
 0xda3   : > { %5333 = vmatpush3.msra.mxu0 %v3627_v19  ;;  %v3142_v10 = vmul.f32 %v5651_v22, %v7384_v30  ;;  %v5653_v48 = vpop.eup %5652  ;;  %5372 = vmatpush3.msra.mxu1 %v4032_v8  ;;  %v4020_v22 = vld [vmem:[%s7946_s11] sm:$0xff] }
 0xda4   : > { %5277 = vmatmul.mubr.msk.f32.gmra.mxu0 %vm1248_vm5, %v3136_v15  ;;  %5334 = vmatprep.subr.mxu0 %v7987_v52  ;;  %v3144_v30 = vmul.f32 %v5653_v48, %v7388_v62  ;;  %v7487_v62 = vld [vmem:[%s7940_s5 + $0x6] ss:$0 sm:$0xff] }
 0xda5   : > { %5279 = vmatprep.mubr.msk.f32.mxu0 %vm5794_vm2, %v7987_v52  ;;  %5335 = vmatpush3.msra.mxu0 %v3626_v49  ;;  %v4028_v15 = vld [vmem:[%s7946_s11 + $0x40] sm:$0xff] }
 0xda6   : > { %5336 = vmatprep.subr.mxu0 %v7987_v52  ;;  %5373 = vmatprep.subr.mxu1 %v7987_v52 }
 0xda7   : > { %5337 = vmatpush3.msra.mxu0 %v3625_v17  ;;  %5374 = vmatpush3.msra.mxu1 %v4031_v60 }
 0xda8   : > { %5280 = vmatmul.mubr.msk.f32.gmra.mxu0 %vm1248_vm5, %v3138_v9  ;;  %5424 = vmatprep.subr.mxu0 %v7987_v52  ;;  %v4026_v9 = vld [vmem:[%s7946_s11 + $0x30] sm:$0xff] }
 0xda9   : > { %v3270_v47 = vpop.f32.mrf.mxu0  ;;  %5282 = vmatprep.mubr.msk.f32.mxu0 %vm5794_vm2, %v7987_v52  ;;  %5375 = vmatprep.subr.mxu1 %v7987_v52 }
 0xdaa   : > { %5299 = vmatmul.mubr.msk.f32.gmra.mxu1 %vm1081_vm3, %v3270_v47  ;;  %v4023_v47 = vld [vmem:[%s7946_s11 + $0x18] sm:$0xff] }
 0xdab   : > { %v5269_v13 = vpop.f32.mrf.mxu0  ;;  %5301 = vmatprep.mubr.msk.f32.mxu1 %vm5794_vm2, %v7987_v52  ;;  %5376 = vmatpush3.msra.mxu1 %v4030_v6 }
 0xdac   : > { %5283 = vmatmul.mubr.msk.f32.gmra.mxu0 %vm1248_vm5, %v3140_v24  ;;  %5377 = vmatprep.subr.mxu1 %v7987_v52  ;;  %v4022_v24 = vld [vmem:[%s7946_s11 + $0x10] sm:$0xff]  ;;  %v7588_v13 = vld [vmem:[%s7945_s10] ss:$0 sm:$0xff] }
 0xdad   : > { %5285 = vmatprep.mubr.msk.f32.mxu0 %vm5794_vm2, %v7987_v52  ;;  %5378 = vmatpush3.msra.mxu1 %v4029_v58 }
 0xdae   : > { %5379 = vmatprep.subr.mxu1 %v7987_v52 }
 0xdaf   : > { %5380 = vmatpush3.msra.mxu1 %v4028_v15  ;;  %v7992_v15 = vld [vmem:[#allocation15_spill] sm:$0xff] }
 0xdb0   : > { %5286 = vmatmul.mubr.msk.f32.gmra.mxu0 %vm1248_vm5, %v3142_v10  ;;  %5381 = vmatprep.subr.mxu1 %v7987_v52 }
 0xdb1   : > { %5288 = vmatprep.mubr.msk.f32.mxu0 %vm5794_vm2, %v7987_v52  ;;  %5382 = vmatpush3.msra.mxu1 %v4027_v38 }
 0xdb2   : > { %5383 = vmatprep.subr.mxu1 %v7987_v52 }
 0xdb3   : > { %5384 = vmatpush3.msra.mxu1 %v4026_v9 }
 0xdb4   : > { %5289 = vmatmul.mubr.msk.f32.gmra.mxu0 %vm1248_vm5, %v3144_v30  ;;  %5385 = vmatprep.subr.mxu1 %v7987_v52 }
 0xdb5   : > { %5338 = vmatprep.mubr.msk.f32.mxu0 %vm5794_vm2, %v7987_v52  ;;  %5386 = vmatpush3.msra.mxu1 %v4025_v31 }
 0xdb6   : > { %5387 = vmatprep.subr.mxu1 %v7987_v52 }
 0xdb7   : > { %5388 = vmatpush3.msra.mxu1 %v4024_v40 }
 0xdb8   : > { %5389 = vmatprep.subr.mxu1 %v7987_v52 }
 0xdb9   : > { %5390 = vmatpush3.msra.mxu1 %v4023_v47 }
 0xdba   : > { %5391 = vmatprep.subr.mxu1 %v7987_v52 }
 0xdbb   : > { %5392 = vmatpush3.msra.mxu1 %v4022_v24  ;;  %v7993_v24 = vld [vmem:[#allocation16_spill] sm:$0xff] }
 0xdbc   : > { %5393 = vmatprep.subr.mxu1 %v7987_v52 }
 0xdbd   : > { %5394 = vmatpush3.msra.mxu1 %v4021_v1 }
 0xdbe   : > { %5395 = vmatprep.subr.mxu1 %v7987_v52 }
 0xdbf   : > { %5396 = vmatpush3.msra.mxu1 %v4020_v22 }
 0xe18   : > { %v3538_v11 = vpop.xlane.xlu0 %3537 }
 0xe19   : > { %v3563_v33 = vmul.f32 0.015625, %v3538_v11 }
 0xe1b   : > { %v3572_v36 = vadd.f32 1e-05, %v3563_v33 }
 0xe1d   : > { %5654 = vrsqrt.f32 %v3572_v36 }
 0xe2a   : > { %v5655_v39 = vpop.eup %5654 }
 0xe2b   : > { %v3590_v42 = vmul.f32 %v5655_v39, %v7425_v41 }
 0xe2d   : > { %v3603_v34 = vmul.f32 %v7481_v45, %v3590_v42 }
 0xe2f   : > { %v3616_v56 = vadd.f32 %v7487_v62, %v3603_v34 }
 0xe31   : > { %5339 = vmatmul.mubr.msk.f32.vlgmr.msra.gmra.mxu0 %vm502_vm0, %v3616_v56 }
 0xe32   : > { %5341 = vmatprep.mubr.msk.f32.mxu0 %vm5794_vm2, %v7987_v52 }
 0xe5c   : > { %v3275_v16 = vpop.f32.mrf.mxu0 }
 0xe5d   : > { %5302 = vmatmul.mubr.msk.f32.gmra.mxu1 %vm1081_vm3, %v3275_v16 }
 0xe5e   : > { %v5272_v53 = vpop.f32.mrf.mxu0  ;;  %5304 = vmatprep.mubr.msk.f32.mxu1 %vm5794_vm2, %v7987_v52 }
 0xe60   : > { %v3280_v23 = vpop.f32.mrf.mxu0 }
 0xe61   : > { %5305 = vmatmul.mubr.msk.f32.gmra.mxu1 %vm1081_vm3, %v3280_v23 }
 0xe62   : > { %v5275_v18 = vpop.f32.mrf.mxu0  ;;  %5307 = vmatprep.mubr.msk.f32.mxu1 %vm5794_vm2, %v7987_v52 }
 0xe64   : > { %v3285_v28 = vpop.f32.mrf.mxu0 }
 0xe65   : > { %5308 = vmatmul.mubr.msk.f32.gmra.mxu1 %vm1081_vm3, %v3285_v28 }
 0xe66   : > { %v5278_v43 = vpop.f32.mrf.mxu0  ;;  %5310 = vmatprep.mubr.msk.f32.mxu1 %vm5794_vm2, %v7987_v52 }
 0xe68   : > { %v3290_v59 = vpop.f32.mrf.mxu0 }
 0xe69   : > { %5311 = vmatmul.mubr.msk.f32.gmra.mxu1 %vm1081_vm3, %v3290_v59 }
 0xe6a   : > { %v3409_v5 = vpop.f32.mrf.mxu1  ;;  %v5281_v21 = vpop.f32.mrf.mxu0  ;;  %5313 = vmatprep.mubr.msk.f32.mxu1 %vm5794_vm2, %v7987_v52 }
 0xe6b   : > { %v3449_v63 = vadd.f32 %v3409_v5, %v7253_v50 }
 0xe6c   : > { %v5300_v55 = vpop.f32.mrf.mxu1  ;;  %v3295_v57 = vpop.f32.mrf.mxu0 }
 0xe6d   : > { %v3463_v41 = vadd.f32 %v7400_v29, %v3449_v63  ;;  %5314 = vmatmul.mubr.msk.f32.gmra.mxu1 %vm1081_vm3, %v3295_v57 }
 0xe6e   : > { %v5284_v25 = vpop.f32.mrf.mxu0  ;;  %5316 = vmatprep.mubr.msk.f32.mxu1 %vm5794_vm2, %v7987_v52 }
 0xe6f   : > { %v7512_v37 = vadd.f32 %v3463_v41, %v7990_v12 }
 0xe70   : > { %v3300_v46 = vpop.f32.mrf.mxu0 }
 0xe71   : > { %5317 = vmatmul.mubr.msk.f32.gmra.mxu1 %vm1081_vm3, %v3300_v46  ;;  %v3485_v3 = vsel %vm502_vm0, %v7512_v37, 0.0 }
 0xe72   : > { %3486 = vadd.xlane.f32.xlu0 %v3485_v3  ;;  %v5287_v50 = vpop.f32.mrf.mxu0  ;;  %5319 = vmatprep.mubr.msk.f32.mxu1 %vm5794_vm2, %v7987_v52 }
 0xe74   : > { %v3305_v35 = vpop.f32.mrf.mxu0 }
 0xe75   : > { %5320 = vmatmul.mubr.msk.f32.gmra.mxu1 %vm1081_vm3, %v3305_v35  ;;  %v7991_v35 = vld [vmem:[#allocation14_spill] sm:$0xff] }
 0xe76   : > { %v5290_v54 = vpop.f32.mrf.mxu0  ;;  %5397 = vmatprep.mubr.msk.f32.mxu1 %vm5794_vm2, %v7987_v52 }
 0xef1   : > { %v3733_v19 = vpop.f32.mrf.mxu0 }
 0xef2   : > { %v3734_v10 = vadd.f32 %v7588_v13, %v3733_v19 }
 0xef3   : > { %v5340_v49 = vpop.f32.mrf.mxu0 }
 0xef4   : > { %v3786_v48 = vmul.f32 0.70710677, %v3734_v10  ;;  %v3777_v0 = vmul.f32 0.5, %v3734_v10 }
 0xef6   : > { %v3795_v17 = vand.u32 2147483647, %v3786_v48  ;;  %vm3975_vm6 = vcmp.lt.f32.partialorder %v3786_v48, 0.0  ;;  %v7994_v48 = vld [vmem:[#allocation17_spill] sm:$0xff] }
 0xef8   : > { %v3804_v30 = vmul.f32 0.3275911, %v3795_v17  ;;  %v3921_v33 = vsub.f32 0.0, %v3795_v17 }
 0xefa   : > { %v3813_v11 = vadd.f32 1.0, %v3804_v30  ;;  %v3930_v36 = vmul.f32 %v3921_v33, %v3795_v17 }
 0xefb   : > { %v3487_v33 = vpop.xlane.xlu0 %3486 }
 0xefc   : > { %5656 = vrcp.f32 %v3813_v11  ;;  %v3939_v34 = vmul.f32 1.442695, %v3930_v36 }
 0xefe   : > { %5658 = vpow2.f32 %v3939_v34 }
 0xf09   : > { %v5657_v39 = vpop.eup %5656 }
 0xf0a   : > { %v3840_v42 = vmul.f32 1.0614054, %v5657_v39 }
 0xf0b   : > { %v5659_v5 = vpop.eup %5658 }
 0xf0c   : > { %v3849_v56 = vadd.f32 -1.4531521, %v3840_v42  ;;  %v7995_v42 = vld [vmem:[#allocation18_spill] sm:$0xff] }
 0xf0e   : > { %v3858_v16 = vmul.f32 %v5657_v39, %v3849_v56 }
 0xf10   : > { %v3867_v53 = vadd.f32 1.4214138, %v3858_v16  ;;  %v3510_v16 = vmul.f32 0.015625, %v3487_v33 }
 0xf12   : > { %v3876_v23 = vmul.f32 %v5657_v39, %v3867_v53 }
 0xf14   : > { %v3885_v18 = vadd.f32 -0.28449672, %v3876_v23 }
 0xf16   : > { %v3894_v28 = vmul.f32 %v5657_v39, %v3885_v18 }
 0xf18   : > { %v3903_v43 = vadd.f32 0.2548296, %v3894_v28  ;;  %v7996_v28 = vld [vmem:[#allocation19_spill] sm:$0xff] }
 0xf1a   : > { %v3912_v59 = vmul.f32 %v5657_v39, %v3903_v43 }
 0xf1c   : > { %v3957_v21 = vmul.f32 %v5659_v5, %v3912_v59  ;;  %v3519_v5 = vsub.f32 %v7512_v37, %v3510_v16 }
 0xf1d   : > { %v3414_v63 = vpop.f32.mrf.mxu1 }
 0xf1e   : > { %v3966_v55 = vsub.f32 1.0, %v3957_v21  ;;  %v3450_v57 = vadd.f32 %v3414_v63, %v7269_v51  ;;  %v7997_v63 = vld [vmem:[#allocation20_spill] sm:$0xff] }
 0xf1f   : > { %v5303_v41 = vpop.f32.mrf.mxu1 }
 0xf20   : > { %v3984_v25 = vsub.f32 0.0, %v3966_v55  ;;  %v3464_v12 = vadd.f32 %v7400_v29, %v3450_v57  ;;  %v3528_v41 = vmul.f32 %v3519_v5, %v3519_v5 }
 0xf21   : > { %v3419_v46 = vpop.f32.mrf.mxu1 }
 0xf22   : > { %v3993_v3 = vsel %vm3975_vm6, %v3984_v25, %v3966_v55  ;;  %v3451_v50 = vadd.f32 %v3419_v46, %v7276_v32  ;;  %v7595_v54 = vadd.f32 %v3464_v12, %v7991_v35  ;;  %v3539_v25 = vsel %vm502_vm0, %v3528_v41, 0.0 }
 0xf23   : > { %v4002_v2 = vadd.f32 1.0, %v3993_v3  ;;  %v5306_v4 = vpop.f32.mrf.mxu1 }
 0xf24   : > { %v3465_v8 = vadd.f32 %v7400_v29, %v3451_v50  ;;  %v3488_v51 = vsel %vm502_vm0, %v7595_v54, 0.0 }
 0xf25   : > { %v4011_v60 = vmul.f32 %v4002_v2, %v3777_v0  ;;  %3489 = vadd.xlane.f32.xlu1 %v3488_v51  ;;  %v3424_v6 = vpop.f32.mrf.mxu1 }
 0xf26   : > { %v3452_v58 = vadd.f32 %v3424_v6, %v7280_v44  ;;  %v3474_v38 = vadd.f32 %v3465_v8, %v7992_v15 }
 0xf27   : > { %v5309_v9 = vpop.f32.mrf.mxu1  ;;  %5398 = vmatmul.mubr.f32.vlgmr.msra.gmra.mxu1 %v4011_v60 }
 0xf28   : > { %v3466_v32 = vadd.f32 %v7400_v29, %v3452_v58  ;;  %v3491_v31 = vsel %vm502_vm0, %v3474_v38, 0.0  ;;  %5400 = vmatprep.mubr.msk.f32.mxu1 %vm5794_vm2, %v7987_v52 }
 0xf29   : > { %3492 = vadd.xlane.f32.xlu0 %v3491_v31  ;;  %v3429_v40 = vpop.f32.mrf.mxu1 }
 0xf2a   : > { %v3453_v47 = vadd.f32 %v3429_v40, %v7284_v7  ;;  %v7608_v1 = vadd.f32 %v3466_v32, %v7993_v24 }
 0xf2b   : > { %v5312_v22 = vpop.f32.mrf.mxu1 }
 0xf2c   : > { %v3467_v44 = vadd.f32 %v7400_v29, %v3453_v47  ;;  %v3494_v19 = vsel %vm502_vm0, %v7608_v1, 0.0 }
 0xf2d   : > { %3495 = vadd.xlane.f32.xlu1 %v3494_v19  ;;  %v3434_v10 = vpop.f32.mrf.mxu1 }
 0xf2e   : > { %v3454_v49 = vadd.f32 %v3434_v10, %v7288_v26  ;;  %v3476_v17 = vadd.f32 %v3467_v44, %v7994_v48  ;;  %v4548_v10 = vld [vmem:[%s7940_s5 + $0x2] ss:$0 sm:$0xff] }
 0xf2f   : > { %v5315_v30 = vpop.f32.mrf.mxu1 }
 0xf30   : > { %v3468_v11 = vadd.f32 %v7400_v29, %v3454_v49  ;;  %v3497_v7 = vsel %vm502_vm0, %v3476_v17, 0.0 }
 0xf31   : > { %3498 = vadd.xlane.f32.xlu0 %v3497_v7  ;;  %v3439_v36 = vpop.f32.mrf.mxu1 }
 0xf32   : > { %v3455_v39 = vadd.f32 %v3439_v36, %v7294_v61  ;;  %v7619_v34 = vadd.f32 %v3468_v11, %v7995_v42 }
 0xf33   : > { %v5318_v56 = vpop.f32.mrf.mxu1 }
 0xf34   : > { %v3469_v53 = vadd.f32 %v7400_v29, %v3455_v39  ;;  %v3500_v26 = vsel %vm502_vm0, %v7619_v34, 0.0 }
 0xf35   : > { %3501 = vadd.xlane.f32.xlu1 %v3500_v26  ;;  %v3444_v23 = vpop.f32.mrf.mxu1 }
 0xf36   : > { %v3456_v18 = vadd.f32 %v3444_v23, %v7300_v14  ;;  %v3478_v43 = vadd.f32 %v3469_v53, %v7996_v28  ;;  %v4169_v28 = vld [vmem:[%s7947_s12 + $0x38] sm:$0xff] }
 0xf37   : > { %v5321_v59 = vpop.f32.mrf.mxu1  ;;  %5425 = vmatpush3.msra.mxu0 %v4169_v28 }
 0xf38   : > { %v3470_v61 = vadd.f32 %v7400_v29, %v3456_v18  ;;  %v3503_v21 = vsel %vm502_vm0, %v3478_v43, 0.0  ;;  %5426 = vmatprep.subr.mxu0 %v7987_v52  ;;  %v4167_v59 = vld [vmem:[%s7947_s12 + $0x28] sm:$0xff] }
 0xf39   : > { %3504 = vadd.xlane.f32.xlu0 %v3503_v21 }
 0xf3a   : > { %v3479_v55 = vadd.f32 %v3470_v61, %v7997_v63 }
 0xf3c   : > { %v3506_v57 = vsel %vm502_vm0, %v3479_v55, 0.0 }
 0xf3d   : > { %3507 = vadd.xlane.f32.xlu1 %v3506_v57 }
 0xf41   : > { %3540 = vadd.xlane.f32.xlu1 %v3539_v25 }
 0xfae   : > { %v3490_v3 = vpop.xlane.xlu1 %3489 }
 0xfaf   : > { %v3511_v19 = vmul.f32 0.015625, %v3490_v3 }
 0xfb1   : > { %v7656_v48 = vsub.f32 %v7595_v54, %v3511_v19 }
 0xfb2   : > { %v3493_v14 = vpop.xlane.xlu0 %3492 }
 0xfb3   : > { %v3512_v12 = vmul.f32 0.015625, %v3493_v14  ;;  %v3529_v42 = vmul.f32 %v7656_v48, %v7656_v48 }
 0xfb5   : > { %v7632_v46 = vsub.f32 %v3474_v38, %v3512_v12  ;;  %v3542_v16 = vsel %vm502_vm0, %v3529_v42, 0.0  ;;  %v4165_v42 = vld [vmem:[%s7947_s12 + $0x18] sm:$0xff] }
 0xfb6   : > { %v3496_v2 = vpop.xlane.xlu1 %3495 }
 0xfb7   : > { %v3530_v37 = vmul.f32 %v7632_v46, %v7632_v46 }
 0xfb9   : > { %v3545_v29 = vsel %vm502_vm0, %v3530_v37, 0.0 }
 0xfba   : > { %v3499_v50 = vpop.xlane.xlu0 %3498  ;;  %3546 = vadd.xlane.f32.xlu1 %v3545_v29 }
 0xfbb   : > { %v3514_v35 = vmul.f32 0.015625, %v3499_v50 }
 0xfbd   : > { %v7637_v0 = vsub.f32 %v3476_v17, %v3514_v35  ;;  %v3513_v17 = vmul.f32 0.015625, %v3496_v2 }
 0xfbe   : > { %v3502_v51 = vpop.xlane.xlu1 %3501 }
 0xfbf   : > { %v3532_v4 = vmul.f32 %v7637_v0, %v7637_v0  ;;  %v7660_v33 = vsub.f32 %v7608_v1, %v3513_v17  ;;  %v3515_v36 = vmul.f32 0.015625, %v3502_v51 }
 0xfc1   : > { %v3551_v8 = vsel %vm502_vm0, %v3532_v4, 0.0  ;;  %v7666_v56 = vsub.f32 %v7619_v34, %v3515_v36  ;;  %v3531_v53 = vmul.f32 %v7660_v33, %v7660_v33 }
 0xfc2   : > { %v3505_v60 = vpop.xlane.xlu0 %3504  ;;  %3552 = vadd.xlane.f32.xlu1 %v3551_v8 }
 0xfc3   : > { %v3516_v6 = vmul.f32 0.015625, %v3505_v60  ;;  %v3548_v1 = vsel %vm502_vm0, %v3531_v53, 0.0  ;;  %v3533_v26 = vmul.f32 %v7666_v56, %v7666_v56 }
 0xfc5   : > { %v7642_v58 = vsub.f32 %v3478_v43, %v3516_v6  ;;  %v3554_v23 = vsel %vm502_vm0, %v3533_v26, 0.0  ;;  %v4168_v43 = vld [vmem:[%s7947_s12 + $0x30] sm:$0xff]  ;;  %v4163_v26 = vld [vmem:[%s7947_s12 + $0x8] sm:$0xff] }
 0xfc6   : > { %v3508_v15 = vpop.xlane.xlu1 %3507  ;;  %5427 = vmatpush3.msra.mxu0 %v4168_v43 }
 0xfc7   : > { %v3534_v38 = vmul.f32 %v7642_v58, %v7642_v58  ;;  %v3517_v54 = vmul.f32 0.015625, %v3508_v15  ;;  %5428 = vmatprep.subr.mxu0 %v7987_v52 }
 0xfc8   : > { %5429 = vmatpush3.msra.mxu0 %v4167_v59 }
 0xfc9   : > { %v3557_v9 = vsel %vm502_vm0, %v3534_v38, 0.0  ;;  %5430 = vmatprep.subr.mxu0 %v7987_v52 }
 0xfca   : > { %3558 = vadd.xlane.f32.xlu1 %v3557_v9  ;;  %v3541_v32 = vpop.xlane.xlu1 %3540 }
 0xfcb   : > { %v3564_v31 = vmul.f32 0.015625, %v3541_v32 }
 0xfcd   : > { %v3573_v40 = vadd.f32 1e-05, %v3564_v31 }
 0xfcf   : > { %5660 = vrsqrt.f32 %v3573_v40 }
 0xfdc   : > { %v5661_v47 = vpop.eup %5660 }
 0xfdd   : > { %v3591_v24 = vmul.f32 %v5661_v47, %v3519_v5 }
 0xfdf   : > { %v3604_v22 = vmul.f32 %v7481_v45, %v3591_v24 }
 0xfe1   : > { %v3617_v44 = vadd.f32 %v7487_v62, %v3604_v22 }
 0xfe3   : > { %5342 = vmatmul.mubr.msk.f32.gmra.mxu0 %vm502_vm0, %v3617_v44 }
 0xfe4   : > { %5344 = vmatprep.mubr.msk.f32.mxu0 %vm5794_vm2, %v7987_v52 }
 0xfe7   : > { %v4107_v49 = vpop.f32.mrf.mxu1 }
 0xfe8   : > { %v4108_v30 = vadd.f32 %v4548_v10, %v4107_v49 }
 0xfe9   : > { %v5399_v11 = vpop.f32.mrf.mxu1 }
 0xfea   : > { %v4143_v7 = vadd.f32 %v4108_v30, %v7405_v20  ;;  %v7671_v20 = vsub.f32 %v3479_v55, %v3517_v54 }
 0xfec   : > { %v4147_v39 = vsel %vm4146_vm7, %v4143_v7, 0.0  ;;  %v3535_v34 = vmul.f32 %v7671_v20, %v7671_v20 }
 0xfed   : > { %4148 = vadd.xlane.f32.xlu0 %v4147_v39 }
 0xfee   : > { %v3560_v18 = vsel %vm502_vm0, %v3535_v34, 0.0  ;;  %v4162_v34 = vld [vmem:[%s7947_s12] sm:$0xff] }
 0xff1   : > { %3543 = vadd.xlane.f32.xlu0 %v3542_v16 }
 0xff5   : > { %3549 = vadd.xlane.f32.xlu0 %v3548_v1 }
 0xff9   : > { %3555 = vadd.xlane.f32.xlu0 %v3554_v23 }
 0xffd   : > { %3561 = vadd.xlane.f32.xlu0 %v3560_v18 }
0x1043   : > { %v3547_v5 = vpop.xlane.xlu1 %3546 }
0x1044   : > { %v3566_v61 = vmul.f32 0.015625, %v3547_v5 }
0x1046   : > { %v3575_v55 = vadd.f32 1e-05, %v3566_v61 }
0x1048   : > { %5662 = vrsqrt.f32 %v3575_v55 }
0x104b   : > { %v3553_v41 = vpop.xlane.xlu1 %3552 }
0x104c   : > { %v3568_v37 = vmul.f32 0.015625, %v3553_v41 }
0x104e   : > { %v3577_v2 = vadd.f32 1e-05, %v3568_v37 }
0x1053   : > { %v3559_v8 = vpop.xlane.xlu1 %3558 }
0x1054   : > { %v3570_v6 = vmul.f32 0.015625, %v3559_v8 }
0x1055   : > { %v5663_v31 = vpop.eup %5662 }
0x1056   : > { %v3579_v9 = vadd.f32 1e-05, %v3570_v6  ;;  %v3593_v47 = vmul.f32 %v5663_v31, %v7632_v46 }
0x1058   : > { %v3606_v17 = vmul.f32 %v7481_v45, %v3593_v47 }
0x1076   : > { %v4149_v21 = vpop.xlane.xlu0 %4148 }
0x1077   : > { %v4150_v63 = vmul.f32 0.015625, %v4149_v21 }
0x1079   : > { %v7692_v57 = vsub.f32 %v4143_v7, %v4150_v63 }
0x107a   : > { %v3544_v25 = vpop.xlane.xlu0 %3543 }
0x107b   : > { %v3565_v14 = vmul.f32 0.015625, %v3544_v25  ;;  %v4152_v12 = vmul.f32 %v7692_v57, %v7692_v57 }
0x107d   : > { %v3574_v29 = vadd.f32 1e-05, %v3565_v14  ;;  %v4153_v3 = vsel %vm4146_vm7, %v4152_v12, 0.0 }
0x107e   : > { %4154 = vadd.xlane.f32.xlu1 %v4153_v3  ;;  %v3550_v50 = vpop.xlane.xlu0 %3549 }
0x107f   : > { %5664 = vrsqrt.f32 %v3574_v29  ;;  %v3567_v35 = vmul.f32 0.015625, %v3550_v50 }
0x1081   : > { %v3576_v4 = vadd.f32 1e-05, %v3567_v35 }
0x1082   : > { %v3556_v51 = vpop.xlane.xlu0 %3555 }
0x1083   : > { %5666 = vrsqrt.f32 %v3576_v4  ;;  %v3569_v60 = vmul.f32 0.015625, %v3556_v51 }
0x1084   : > { %5668 = vrsqrt.f32 %v3577_v2 }
0x1085   : > { %v3578_v15 = vadd.f32 1e-05, %v3569_v60 }
0x1086   : > { %v3562_v38 = vpop.xlane.xlu0 %3561 }
0x1087   : > { %5670 = vrsqrt.f32 %v3578_v15  ;;  %v3571_v32 = vmul.f32 0.015625, %v3562_v38 }
0x1088   : > { %5672 = vrsqrt.f32 %v3579_v9 }
0x1089   : > { %v3580_v22 = vadd.f32 1e-05, %v3571_v32 }
0x108b   : > { %5674 = vrsqrt.f32 %v3580_v22 }
0x108c   : > { %v5665_v40 = vpop.eup %5664 }
0x108d   : > { %v3592_v24 = vmul.f32 %v5665_v40, %v7656_v48  ;;  %v3619_v48 = vadd.f32 %v7487_v62, %v3606_v17 }
0x108f   : > { %v3605_v44 = vmul.f32 %v7481_v45, %v3592_v24 }
0x1090   : > { %v5667_v19 = vpop.eup %5666 }
0x1091   : > { %v3594_v10 = vmul.f32 %v5667_v19, %v7660_v33  ;;  %v3618_v49 = vadd.f32 %v7487_v62, %v3605_v44  ;;  %v5669_v30 = vpop.eup %5668  ;;  %v4166_v33 = vld [vmem:[%s7947_s12 + $0x20] sm:$0xff] }
0x1092   : > { %v3595_v46 = vmul.f32 %v5669_v30, %v7637_v0  ;;  %5431 = vmatpush3.msra.mxu0 %v4166_v33  ;;  %v4144_v19 = vld [vmem:[%s7940_s5 + $0x7] sm:$0x1] }
0x1093   : > { %5345 = vmatmul.mubr.msk.f32.gmra.mxu0 %vm502_vm0, %v3618_v49  ;;  %v3607_v11 = vmul.f32 %v7481_v45, %v3594_v10  ;;  %5432 = vmatprep.subr.mxu0 %v7987_v52  ;;  %v4145_v49 = vld [vmem:[%s7940_s5 + $0x8] sm:$0x1] }
0x1094   : > { %5347 = vmatprep.mubr.msk.f32.mxu0 %vm5794_vm2, %v7987_v52  ;;  %v5671_v7 = vpop.eup %5670  ;;  %v3608_v0 = vmul.f32 %v7481_v45, %v3595_v46  ;;  %5433 = vmatpush3.msra.mxu0 %v4165_v42 }
0x1095   : > { %v3596_v36 = vmul.f32 %v5671_v7, %v7666_v56  ;;  %v3620_v39 = vadd.f32 %v7487_v62, %v3607_v11  ;;  %v5673_v54 = vpop.eup %5672  ;;  %5434 = vmatprep.subr.mxu0 %v7987_v52  ;;  %v4164_v56 = vld [vmem:[%s7947_s12 + $0x10] sm:$0xff] }
0x1096   : > { %5435 = vmatpush3.msra.mxu0 %v4164_v56  ;;  %v3597_v16 = vmul.f32 %v5673_v54, %v7642_v58  ;;  %v3621_v53 = vadd.f32 %v7487_v62, %v3608_v0 }
0x1097   : > { %5348 = vmatmul.mubr.msk.f32.gmra.mxu0 %vm502_vm0, %v3619_v48  ;;  %v3609_v1 = vmul.f32 %v7481_v45, %v3596_v36  ;;  %5436 = vmatprep.subr.mxu0 %v7987_v52 }
0x1098   : > { %5350 = vmatprep.mubr.msk.f32.mxu0 %vm5794_vm2, %v7987_v52  ;;  %v5675_v23 = vpop.eup %5674  ;;  %5437 = vmatpush3.msra.mxu0 %v4163_v26  ;;  %v3610_v28 = vmul.f32 %v7481_v45, %v3597_v16 }
0x1099   : > { %5438 = vmatprep.subr.mxu0 %v7987_v52  ;;  %v3598_v58 = vmul.f32 %v5675_v23, %v7671_v20  ;;  %v3622_v18 = vadd.f32 %v7487_v62, %v3609_v1 }
0x109a   : > { %5439 = vmatpush3.msra.mxu0 %v4162_v34  ;;  %v3623_v61 = vadd.f32 %v7487_v62, %v3610_v28 }
0x109b   : > { %5351 = vmatmul.mubr.msk.f32.gmra.mxu0 %vm502_vm0, %v3620_v39  ;;  %v3611_v21 = vmul.f32 %v7481_v45, %v3598_v58 }
0x109c   : > { %5353 = vmatprep.mubr.msk.f32.mxu0 %vm5794_vm2, %v7987_v52 }
0x109d   : > { %v3624_v55 = vadd.f32 %v7487_v62, %v3611_v21 }
0x109f   : > { %5354 = vmatmul.mubr.msk.f32.gmra.mxu0 %vm502_vm0, %v3621_v53 }
0x10a0   : > { %5356 = vmatprep.mubr.msk.f32.mxu0 %vm5794_vm2, %v7987_v52 }
0x10a3   : > { %v3738_v43 = vpop.f32.mrf.mxu0  ;;  %5357 = vmatmul.mubr.msk.f32.gmra.mxu0 %vm502_vm0, %v3622_v18 }
0x10a4   : > { %v3739_v59 = vadd.f32 %v7588_v13, %v3738_v43  ;;  %5359 = vmatprep.mubr.msk.f32.mxu0 %vm5794_vm2, %v7987_v52 }
0x10a5   : > { %v5343_v5 = vpop.f32.mrf.mxu0 }
0x10a6   : > { %v3787_v63 = vmul.f32 0.70710677, %v3739_v59  ;;  %v3778_v32 = vmul.f32 0.5, %v3739_v59 }
0x10a7   : > { %5360 = vmatmul.mubr.msk.f32.gmra.mxu0 %vm502_vm0, %v3623_v61 }
0x10a8   : > { %v3796_v20 = vand.u32 2147483647, %v3787_v63  ;;  %5362 = vmatprep.mubr.msk.f32.mxu0 %vm5794_vm2, %v7987_v52  ;;  %vm3976_vm8 = vcmp.lt.f32.partialorder %v3787_v63, 0.0 }
0x10aa   : > { %v3805_v41 = vmul.f32 0.3275911, %v3796_v20  ;;  %v3922_v14 = vsub.f32 0.0, %v3796_v20 }
0x10ab   : > { %5363 = vmatmul.mubr.msk.f32.gmra.mxu0 %vm502_vm0, %v3624_v55 }
0x10ac   : > { %v3814_v25 = vadd.f32 1.0, %v3805_v41  ;;  %5440 = vmatprep.mubr.msk.f32.mxu0 %vm5794_vm2, %v7987_v52  ;;  %v3931_v12 = vmul.f32 %v3922_v14, %v3796_v20 }
0x10ae   : > { %5676 = vrcp.f32 %v3814_v25  ;;  %v3941_v29 = vmul.f32 1.442695, %v3931_v12 }
0x10b0   : > { %5678 = vpow2.f32 %v3941_v29 }
0x10bb   : > { %v5677_v45 = vpop.eup %5676 }
0x10bc   : > { %v3841_v37 = vmul.f32 1.0614054, %v5677_v45 }
0x10bd   : > { %v5679_v60 = vpop.eup %5678 }
0x10be   : > { %v3850_v3 = vadd.f32 -1.4531521, %v3841_v37 }
0x10c0   : > { %v3859_v50 = vmul.f32 %v5677_v45, %v3850_v3 }
0x10c2   : > { %v3868_v35 = vadd.f32 1.4214138, %v3859_v50 }
0x10c4   : > { %v3877_v2 = vmul.f32 %v5677_v45, %v3868_v35 }
0x10c6   : > { %v3886_v4 = vadd.f32 -0.28449672, %v3877_v2 }
0x10c8   : > { %v3895_v62 = vmul.f32 %v5677_v45, %v3886_v4 }
0x10ca   : > { %v3904_v8 = vadd.f32 0.2548296, %v3895_v62 }
0x10cc   : > { %v3913_v51 = vmul.f32 %v5677_v45, %v3904_v8 }
0x10ce   : > { %v3958_v6 = vmul.f32 %v5679_v60, %v3913_v51 }
0x10d0   : > { %v3967_v15 = vsub.f32 1.0, %v3958_v6 }
0x10d2   : > { %v3985_v38 = vsub.f32 0.0, %v3967_v15 }
0x10d4   : > { %v3994_v9 = vsel %vm3976_vm8, %v3985_v38, %v3967_v15 }
0x10d5   : > { %v4003_v31 = vadd.f32 1.0, %v3994_v9 }
0x10d7   : > { %v4012_v40 = vmul.f32 %v4003_v31, %v3778_v32 }
0x10d9   : > { %5401 = vmatmul.mubr.f32.gmra.mxu1 %v4012_v40 }
0x10da   : > { %5403 = vmatprep.mubr.msk.f32.mxu1 %vm5794_vm2, %v7987_v52 }
0x1107   : > { %v4155_v47 = vpop.xlane.xlu1 %4154 }
0x1108   : > { %v4156_v24 = vmul.f32 0.015625, %v4155_v47 }
0x110a   : > { %v4157_v22 = vadd.f32 64.0, %v4156_v24 }
0x110c   : > { %5680 = vrsqrt.f32 %v4157_v22 }
0x1119   : > { %v5681_v44 = vpop.eup %5680 }
0x111a   : > { %v4159_v10 = vmul.f32 %v5681_v44, %v7692_v57 }
0x111c   : > { %v4160_v17 = vmul.f32 %v4159_v10, %v4144_v19 }
0x111e   : > { %v4161_v30 = vadd.f32 %v4160_v17, %v4145_v49 }
0x1120   : > { %5441 = vmatmul.mubr.msk.f32.vlgmr.msra.gmra.mxu0 %vm502_vm0, %v4161_v30  ;;  %vm4244_vm0 = vcmask 73728  }
0x1153   : > { %v3743_v46 = vpop.f32.mrf.mxu0 }
0x1154   : > { %v7770_v48 = vadd.f32 %v7588_v13, %v3743_v46 }
0x1155   : > { %v5346_v11 = vpop.f32.mrf.mxu0 }
0x1156   : > { %v7773_v7 = vmul.f32 0.70710677, %v7770_v48 }
0x1157   : > { %v3748_v33 = vpop.f32.mrf.mxu0 }
0x1158   : > { %v3797_v36 = vand.u32 2147483647, %v7773_v7  ;;  %v7777_v57 = vadd.f32 %v7588_v13, %v3748_v33  ;;  %vm3977_vm9 = vcmp.lt.f32.partialorder %v7773_v7, 0.0 }
0x1159   : > { %v5349_v39 = vpop.f32.mrf.mxu0 }
0x115a   : > { %v3806_v0 = vmul.f32 0.3275911, %v3797_v36  ;;  %v7780_v42 = vmul.f32 0.70710677, %v7777_v57  ;;  %v3923_v21 = vsub.f32 0.0, %v3797_v36 }
0x115b   : > { %v3753_v54 = vpop.f32.mrf.mxu0 }
0x115c   : > { %v3815_v56 = vadd.f32 1.0, %v3806_v0  ;;  %v3798_v16 = vand.u32 2147483647, %v7780_v42  ;;  %v7784_v53 = vadd.f32 %v7588_v13, %v3753_v54  ;;  %v3932_v45 = vmul.f32 %v3923_v21, %v3797_v36 }
0x115d   : > { %v5352_v1 = vpop.f32.mrf.mxu0  ;;  %vm3978_vm10 = vcmp.lt.f32.partialorder %v7780_v42, 0.0 }
0x115e   : > { %5682 = vrcp.f32 %v3815_v56  ;;  %v3807_v26 = vmul.f32 0.3275911, %v3798_v16  ;;  %v7787_v23 = vmul.f32 0.70710677, %v7784_v53  ;;  %v3924_v37 = vsub.f32 0.0, %v3798_v16 }
0x115f   : > { %v3758_v34 = vpop.f32.mrf.mxu0  ;;  %v3943_v60 = vmul.f32 1.442695, %v3932_v45 }
0x1160   : > { %v3816_v58 = vadd.f32 1.0, %v3807_v26  ;;  %v7790_v18 = vadd.f32 %v7588_v13, %v3758_v34  ;;  %v3799_v28 = vand.u32 2147483647, %v7787_v23  ;;  %v3933_v6 = vmul.f32 %v3924_v37, %v3798_v16 }
0x1161   : > { %v5355_v43 = vpop.f32.mrf.mxu0  ;;  %vm3979_vm11 = vcmp.lt.f32.partialorder %v7787_v23, 0.0 }
0x1162   : > { %5684 = vrcp.f32 %v3816_v58  ;;  %v7794_v59 = vmul.f32 0.70710677, %v7790_v18  ;;  %v3808_v5 = vmul.f32 0.3275911, %v3799_v28  ;;  %v3925_v38 = vsub.f32 0.0, %v3799_v28 }
0x1163   : > { %v3763_v61 = vpop.f32.mrf.mxu0  ;;  %v3945_v49 = vmul.f32 1.442695, %v3933_v6 }
0x1164   : > { %v3800_v63 = vand.u32 2147483647, %v7794_v59  ;;  %v7798_v20 = vadd.f32 %v7588_v13, %v3763_v61  ;;  %v3817_v55 = vadd.f32 1.0, %v3808_v5  ;;  %v3934_v17 = vmul.f32 %v3925_v38, %v3799_v28 }
0x1165   : > { %v5358_v41 = vpop.f32.mrf.mxu0  ;;  %vm3980_vm12 = vcmp.lt.f32.partialorder %v7794_v59, 0.0 }
0x1166   : > { %v3809_v25 = vmul.f32 0.3275911, %v3800_v63  ;;  %v7801_v14 = vmul.f32 0.70710677, %v7798_v20  ;;  %5686 = vrcp.f32 %v3817_v55  ;;  %v3926_v47 = vsub.f32 0.0, %v3800_v63 }
0x1167   : > { %v3768_v12 = vpop.f32.mrf.mxu0  ;;  %v3947_v1 = vmul.f32 1.442695, %v3934_v17 }
0x1168   : > { %v3818_v29 = vadd.f32 1.0, %v3809_v25  ;;  %v3801_v3 = vand.u32 2147483647, %v7801_v14  ;;  %v7805_v50 = vadd.f32 %v7588_v13, %v3768_v12  ;;  %v3935_v33 = vmul.f32 %v3926_v47, %v3800_v63 }
0x1169   : > { %v5361_v35 = vpop.f32.mrf.mxu0  ;;  %vm3981_vm13 = vcmp.lt.f32.partialorder %v7801_v14, 0.0 }
0x116a   : > { %5688 = vrcp.f32 %v3818_v29  ;;  %v3810_v2 = vmul.f32 0.3275911, %v3801_v3  ;;  %v7808_v62 = vmul.f32 0.70710677, %v7805_v50  ;;  %v3927_v36 = vsub.f32 0.0, %v3801_v3 }
0x116b   : > { %v5683_v4 = vpop.eup %5682  ;;  %v3773_v8 = vpop.f32.mrf.mxu0  ;;  %v3949_v28 = vmul.f32 1.442695, %v3935_v33 }
0x116c   : > { %v3842_v51 = vmul.f32 1.0614054, %v5683_v4  ;;  %v3819_v15 = vadd.f32 1.0, %v3810_v2  ;;  %v3802_v9 = vand.u32 2147483647, %v7808_v62  ;;  %v7812_v32 = vadd.f32 %v7588_v13, %v3773_v8 }
0x116d   : > { %v5364_v31 = vpop.f32.mrf.mxu0  ;;  %v3936_v61 = vmul.f32 %v3927_v36, %v3801_v3  ;;  %vm3982_vm14 = vcmp.lt.f32.partialorder %v7808_v62, 0.0 }
0x116e   : > { %v3851_v40 = vadd.f32 -1.4531521, %v3842_v51  ;;  %5690 = vrcp.f32 %v3819_v15  ;;  %v3811_v22 = vmul.f32 0.3275911, %v3802_v9  ;;  %v7815_v44 = vmul.f32 0.70710677, %v7812_v32 }
0x116f   : > { %v5685_v24 = vpop.eup %5684  ;;  %5692 = vpow2.f32 %v3943_v60  ;;  %v3928_v21 = vsub.f32 0.0, %v3802_v9  ;;  %v3951_v2 = vmul.f32 1.442695, %v3936_v61  ;;  %v3779_v31 = vmul.f32 0.5, %v7770_v48 }
0x1170   : > { %v3860_v19 = vmul.f32 %v5683_v4, %v3851_v40  ;;  %v3843_v10 = vmul.f32 1.0614054, %v5685_v24  ;;  %v3820_v30 = vadd.f32 1.0, %v3811_v22  ;;  %v3803_v46 = vand.u32 2147483647, %v7815_v44 }
0x1171   : > { %v3937_v8 = vmul.f32 %v3928_v21, %v3802_v9  ;;  %v3780_v48 = vmul.f32 0.5, %v7777_v57  ;;  %vm3983_vm15 = vcmp.lt.f32.partialorder %v7815_v44, 0.0  ;;  %v3785_v62 = vmul.f32 0.5, %v7812_v32 }
0x1172   : > { %v3869_v11 = vadd.f32 1.4214138, %v3860_v19  ;;  %v3852_v13 = vadd.f32 -1.4531521, %v3843_v10  ;;  %5694 = vrcp.f32 %v3820_v30  ;;  %v3812_v39 = vmul.f32 0.3275911, %v3803_v46 }
0x1173   : > { %v7818_v0 = vpop.eup %5686  ;;  %5696 = vpow2.f32 %v3945_v49  ;;  %v3929_v51 = vsub.f32 0.0, %v3803_v46  ;;  %v3953_v17 = vmul.f32 1.442695, %v3937_v8 }
0x1174   : > { %v3878_v54 = vmul.f32 %v5683_v4, %v3869_v11  ;;  %v3861_v56 = vmul.f32 %v5685_v24, %v3852_v13  ;;  %v3844_v16 = vmul.f32 1.0614054, %v7818_v0  ;;  %v3821_v26 = vadd.f32 1.0, %v3812_v39 }
0x1175   : > { %v3938_v9 = vmul.f32 %v3929_v51, %v3803_v46 }
0x1176   : > { %v3887_v34 = vadd.f32 -0.28449672, %v3878_v54  ;;  %v3870_v58 = vadd.f32 1.4214138, %v3861_v56  ;;  %v3853_v5 = vadd.f32 -1.4531521, %v3844_v16  ;;  %5698 = vrcp.f32 %v3821_v26 }
0x1177   : > { %v7821_v43 = vpop.eup %5688  ;;  %5700 = vpow2.f32 %v3947_v1 }
0x1178   : > { %v3896_v63 = vmul.f32 %v5683_v4, %v3887_v34  ;;  %v3879_v55 = vmul.f32 %v5685_v24, %v3870_v58  ;;  %v3845_v41 = vmul.f32 1.0614054, %v7821_v43  ;;  %v3862_v25 = vmul.f32 %v7818_v0, %v3853_v5 }
0x1179   : > { %5702 = vpow2.f32 %v3949_v28 }
0x117a   : > { %v3905_v12 = vadd.f32 0.2548296, %v3896_v63  ;;  %v3888_v45 = vadd.f32 -0.28449672, %v3879_v55  ;;  %v3854_v37 = vadd.f32 -1.4531521, %v3845_v41  ;;  %5704 = vpow2.f32 %v3951_v2 }
0x117b   : > { %v7825_v29 = vpop.eup %5690  ;;  %v3871_v35 = vadd.f32 1.4214138, %v3862_v25  ;;  %5706 = vpow2.f32 %v3953_v17 }
0x117c   : > { %v3914_v3 = vmul.f32 %v5683_v4, %v3905_v12  ;;  %v3897_v60 = vmul.f32 %v5685_v24, %v3888_v45  ;;  %v3863_v6 = vmul.f32 %v7821_v43, %v3854_v37  ;;  %v3846_v15 = vmul.f32 1.0614054, %v7825_v29  ;;  %v5693_v38 = vpop.eup %5692 }
0x117d   : > { %v3880_v40 = vmul.f32 %v7818_v0, %v3871_v35 }
0x117e   : > { %v3959_v47 = vmul.f32 %v5693_v38, %v3914_v3  ;;  %v3906_v22 = vadd.f32 0.2548296, %v3897_v60  ;;  %v3872_v19 = vadd.f32 1.4214138, %v3863_v6  ;;  %v3855_v10 = vadd.f32 -1.4531521, %v3846_v15 }
0x117f   : > { %v3889_v49 = vadd.f32 -0.28449672, %v3880_v40  ;;  %v7831_v30 = vpop.eup %5694 }
0x1180   : > { %v3968_v4 = vsub.f32 1.0, %v3959_v47  ;;  %v3915_v11 = vmul.f32 %v5685_v24, %v3906_v22  ;;  %v3881_v13 = vmul.f32 %v7821_v43, %v3872_v19  ;;  %v3864_v33 = vmul.f32 %v7825_v29, %v3855_v10  ;;  %v5697_v36 = vpop.eup %5696 }
0x1181   : > { %v3898_v39 = vmul.f32 %v7818_v0, %v3889_v49  ;;  %v3847_v54 = vmul.f32 1.0614054, %v7831_v30  ;;  %v3955_v24 = vmul.f32 1.442695, %v3938_v9 }
0x1182   : > { %v3986_v56 = vsub.f32 0.0, %v3968_v4  ;;  %v3960_v16 = vmul.f32 %v5697_v36, %v3915_v11  ;;  %v3890_v46 = vadd.f32 -0.28449672, %v3881_v13  ;;  %v3873_v1 = vadd.f32 1.4214138, %v3864_v33 }
0x1183   : > { %v3907_v26 = vadd.f32 0.2548296, %v3898_v39  ;;  %v3856_v34 = vadd.f32 -1.4531521, %v3847_v54  ;;  %v7839_v58 = vpop.eup %5698  ;;  %5708 = vpow2.f32 %v3955_v24  ;;  %v3781_v13 = vmul.f32 0.5, %v7784_v53 }
0x1184   : > { %v3995_v28 = vsel %vm3977_vm9, %v3986_v56, %v3968_v4  ;;  %v3969_v5 = vsub.f32 1.0, %v3960_v16  ;;  %v3899_v7 = vmul.f32 %v7821_v43, %v3890_v46  ;;  %v3882_v57 = vmul.f32 %v7825_v29, %v3873_v1  ;;  %v5701_v41 = vpop.eup %5700 }
0x1185   : > { %v4004_v61 = vadd.f32 1.0, %v3995_v28  ;;  %v3916_v21 = vmul.f32 %v7818_v0, %v3907_v26  ;;  %v3865_v63 = vmul.f32 %v7831_v30, %v3856_v34  ;;  %v3848_v55 = vmul.f32 1.0614054, %v7839_v58 }
0x1186   : > { %v3987_v25 = vsub.f32 0.0, %v3969_v5  ;;  %v3908_v12 = vadd.f32 0.2548296, %v3899_v7  ;;  %v3891_v45 = vadd.f32 -0.28449672, %v3882_v57  ;;  %v5703_v37 = vpop.eup %5702  ;;  %v3782_v46 = vmul.f32 0.5, %v7790_v18 }
0x1187   : > { %v4013_v35 = vmul.f32 %v4004_v61, %v3779_v31  ;;  %v3961_v2 = vmul.f32 %v5701_v41, %v3916_v21  ;;  %v3874_v8 = vadd.f32 1.4214138, %v3865_v63  ;;  %v3857_v51 = vadd.f32 -1.4531521, %v3848_v55 }
0x1188   : > { %v3996_v3 = vsel %vm3978_vm10, %v3987_v25, %v3969_v5  ;;  %v3917_v60 = vmul.f32 %v7821_v43, %v3908_v12  ;;  %v3900_v0 = vmul.f32 %v7825_v29, %v3891_v45  ;;  %v5705_v43 = vpop.eup %5704  ;;  %v3783_v57 = vmul.f32 0.5, %v7798_v20 }
0x1189   : > { %v4005_v6 = vadd.f32 1.0, %v3996_v3  ;;  %v3970_v15 = vsub.f32 1.0, %v3961_v2  ;;  %v3883_v38 = vmul.f32 %v7831_v30, %v3874_v8  ;;  %v3866_v42 = vmul.f32 %v7839_v58, %v3857_v51  ;;  %5404 = vmatmul.mubr.f32.gmra.mxu1 %v4013_v35  ;;  %v5707_v54 = vpop.eup %5706  ;;  %v4170_v8 = vld [vmem:[%s7948_s13] sm:$0x1] }
0x118a   : > { %v3962_v40 = vmul.f32 %v5703_v37, %v3917_v60  ;;  %v3909_v47 = vadd.f32 0.2548296, %v3900_v0  ;;  %5406 = vmatprep.mubr.msk.f32.mxu1 %vm5794_vm2, %v7987_v52  ;;  %v3784_v12 = vmul.f32 0.5, %v7805_v50 }
0x118b   : > { %v4014_v31 = vmul.f32 %v4005_v6, %v3780_v48  ;;  %v3988_v22 = vsub.f32 0.0, %v3970_v15  ;;  %v3892_v19 = vadd.f32 -0.28449672, %v3883_v38  ;;  %v3875_v10 = vadd.f32 1.4214138, %v3866_v42 }
0x118c   : > { %v3971_v49 = vsub.f32 1.0, %v3962_v40  ;;  %v3918_v17 = vmul.f32 %v7825_v29, %v3909_v47 }
0x118d   : > { %v3997_v9 = vsel %vm3979_vm11, %v3988_v22, %v3970_v15  ;;  %v3901_v4 = vmul.f32 %v7831_v30, %v3892_v19  ;;  %v3884_v11 = vmul.f32 %v7839_v58, %v3875_v10  ;;  %5407 = vmatmul.mubr.f32.gmra.mxu1 %v4014_v31 }
0x118e   : > { %v4006_v33 = vadd.f32 1.0, %v3997_v9  ;;  %v3989_v36 = vsub.f32 0.0, %v3971_v49  ;;  %v3963_v48 = vmul.f32 %v5705_v43, %v3918_v17  ;;  %5409 = vmatprep.mubr.msk.f32.mxu1 %vm5794_vm2, %v7987_v52 }
0x118f   : > { %v3910_v23 = vadd.f32 0.2548296, %v3901_v4  ;;  %v3893_v39 = vadd.f32 -0.28449672, %v3884_v11 }
0x1190   : > { %v4015_v29 = vmul.f32 %v4006_v33, %v3781_v13  ;;  %v3998_v56 = vsel %vm3980_vm12, %v3989_v36, %v3971_v49  ;;  %v3972_v16 = vsub.f32 1.0, %v3963_v48  ;;  %v5709_v7 = vpop.eup %5708  ;;  %v4260_v36 = vstv %s4259_s27  ;;  %s5800_s27 = smov [#allocation4]  }
0x1191   : > { %v4007_v1 = vadd.f32 1.0, %v3998_v56  ;;  %v3919_v26 = vmul.f32 %v7831_v30, %v3910_v23  ;;  %v3902_v53 = vmul.f32 %v7839_v58, %v3893_v39  ;;  %vm4261_vm1 = vcmp.eq.s32.totalorder %v6448_v27, %v4260_v36  ;;  %s5730_s1 = sshll.u32 %s5800_s27, 4  ;;  %s5731_s1 = int_to_ptr.vmem [resolvable:$false] %s5730_s1 }
0x1192   : > { %v3990_v34 = vsub.f32 0.0, %v3972_v16  ;;  %5410 = vmatmul.mubr.f32.gmra.mxu1 %v4015_v29  ;;  %s5732_s2 = scalar_lea.vmem %s5731_s1, 32  ;;  %p5733_p5 = scmp.lt.s32.totalorder %s4288_s19, %s5731_s1 }
0x1193   : > { %v4016_v24 = vmul.f32 %v4007_v1, %v3782_v46  ;;  %v3964_v28 = vmul.f32 %v5707_v54, %v3919_v26  ;;  %v3911_v59 = vadd.f32 0.2548296, %v3902_v53  ;;  %5412 = vmatprep.mubr.msk.f32.mxu1 %vm5794_vm2, %v7987_v52  ;;  %v4550_v54 = vsel %vm4261_vm1, 1.0, %v7987_v52  ;;  %p5734_p6 = scmp.lt.s32.totalorder %s5732_s2, %s5726_s21 }
0x1194   : > { %v3999_v5 = vsel %vm3981_vm13, %v3990_v34, %v3972_v16 }
0x1195   : > { %v4008_v18 = vadd.f32 1.0, %v3999_v5  ;;  %v3973_v61 = vsub.f32 1.0, %v3964_v28  ;;  %v3920_v30 = vmul.f32 %v7839_v58, %v3911_v59  ;;  %p5735_p7 = por %p5734_p6, %p5733_p5 }
0x1196   : > { %5413 = vmatmul.mubr.f32.gmra.mxu1 %v4016_v24 }
0x1197   : > { %v4017_v21 = vmul.f32 %v4008_v18, %v3783_v57  ;;  %v3991_v63 = vsub.f32 0.0, %v3973_v61  ;;  %v3965_v55 = vmul.f32 %v5709_v7, %v3920_v30  ;;  %5415 = vmatprep.mubr.msk.f32.mxu1 %vm5794_vm2, %v7987_v52  ;;  %p5736_p8 = pnand %p5735_p7, %p5729_p4 }
0x1199   : > { %v4000_v14 = vsel %vm3982_vm14, %v3991_v63, %v3973_v61  ;;  %v3974_v41 = vsub.f32 1.0, %v3965_v55  ;;  %v4112_v25 = vpop.f32.mrf.mxu1 }
0x119a   : > { %v4009_v20 = vadd.f32 1.0, %v4000_v14  ;;  %5416 = vmatmul.mubr.f32.gmra.mxu1 %v4017_v21 }
0x119b   : > { %v3992_v45 = vsub.f32 0.0, %v3974_v41  ;;  %v5402_v37 = vpop.f32.mrf.mxu1  ;;  %5418 = vmatprep.mubr.msk.f32.mxu1 %vm5794_vm2, %v7987_v52 }
0x119c   : > { %v4018_v58 = vmul.f32 %v4009_v20, %v3784_v12 }
0x119d   : > { %v4001_v35 = vsel %vm3983_vm15, %v3992_v45, %v3974_v41 }
0x119e   : > { %v4010_v2 = vadd.f32 1.0, %v4001_v35  ;;  %5419 = vmatmul.mubr.f32.gmra.mxu1 %v4018_v58 }
0x119f   : > { %5421 = vmatprep.mubr.msk.f32.mxu1 %vm5794_vm2, %v7987_v52 }
0x11a0   : > { %v4019_v50 = vmul.f32 %v4010_v2, %v3785_v62 }
0x11a2   : > { %5422 = vmatmul.mubr.f32.gmra.mxu1 %v4019_v50 }
0x11e0   : > { %v4240_v51 = vpop.f32.mrf.mxu0 }
0x11e1   : > { %v4241_v3 = vadd.f32 %v4240_v51, %v4170_v8 }
0x11e2   : > { %v5442_v60 = vpop.f32.mrf.mxu0 }
0x11e3   : > { %v4246_v44 = vsel %vm4244_vm0, %v4241_v3, -inf  ;;  %4245 = vst.msk [vmem:[%s7886_s22] sm:$0x1] %vm4244_vm0, %v4241_v3 }
0x11e4   : > { %4247 = vmax.xlane.f32.xlu0 %v4246_v44 }
0x1249   : > { %v4116_v32 = vpop.f32.mrf.mxu1 }
0x124b   : > { %v5405_v0 = vpop.f32.mrf.mxu1 }
0x124d   : > { %v4120_v6 = vpop.f32.mrf.mxu1 }
0x124f   : > { %v5408_v15 = vpop.f32.mrf.mxu1 }
0x1252   : > { %v4124_v38 = vpop.f32.mrf.mxu1 }
0x1254   : > { %v5411_v42 = vpop.f32.mrf.mxu1 }
0x1256   : > { %v4128_v40 = vpop.f32.mrf.mxu1 }
0x1258   : > { %v5414_v47 = vpop.f32.mrf.mxu1 }
0x125a   : > { %v4132_v31 = vpop.f32.mrf.mxu1 }
0x125c   : > { %v5417_v22 = vpop.f32.mrf.mxu1 }
0x125e   : > { %v4136_v19 = vpop.f32.mrf.mxu1 }
0x1260   : > { %v5420_v10 = vpop.f32.mrf.mxu1 }
0x1262   : > { %v4140_v43 = vpop.f32.mrf.mxu1 }
0x1264   : > { %v5423_v49 = vpop.f32.mrf.mxu1 }
0x126d   : > { %v4248_v17 = vpop.xlane.xlu0 %4247 }
0x126e   : > { %v4249_v9 = vsub.f32 %v4241_v3, %v4248_v17 }
0x1270   : > { %v4250_v4 = vmul.f32 1.442695, %v4249_v9 }
0x1272   : > { %5710 = vpow2.f32 %v4250_v4 }
0x127f   : > { %v5711_v11 = vpop.eup %5710 }
0x1280   : > { %v4252_v13 = vsel %vm4244_vm0, %v5711_v11, 0.0 }
0x1281   : > { %4253 = vadd.xlane.f32.xlu1 %v4252_v13 }
0x130a   : > { %v4254_v33 = vpop.xlane.xlu1 %4253 }
0x130b   : > { %5712 = vlog2.f32 %v4254_v33 }
0x1318   : > { %v5713_v48 = vpop.eup %5712 }
0x1319   : > { %v4256_v23 = vmul.f32 0.6931472, %v5713_v48 }
0x131b   : > { %v4257_v39 = vadd.f32 %v4256_v23, %v4248_v17 }
0x131d   : > { %v4258_v29 = vsub.f32 %v4241_v3, %v4257_v39 }
0x131f   : > { %v4264_v56 = vmul.f32 %v4550_v54, %v4258_v29 }
0x1321   : > { %v4265_v16 = vsel %vm4244_vm0, %v4264_v56, 0.0 }
0x1322   : > { %4266 = vadd.xlane.f32.xlu0 %v4265_v16 }
0x1323   : > { %5739 = shalt.err (!%p5736_p8)
}
0x1324   : > { %s5740_s26 = scalar_lea.hbm %s4285_s0, 16  ;;  %s5744_s29 = scalar_lea.hbm %s7949_s14, 32 }
0x1325   : > { %p5741_p9 = scmp.ne.s32.totalorder %s4285_s0, %s5740_s26  ;;  %p5745_p0 = scmp.lt.s32.totalorder %s4285_s0, %s7949_s14 }
0x1326   : > { %p5746_p1 = scmp.lt.s32.totalorder %s5744_s29, %s5740_s26 }
0x1327   : > { %p5742_p12 = pnand %p5741_p9, %p5922_p10 }
0x1328   : > { %p5747_p2 = por %p5746_p1, %p5745_p0 }
0x1329   : > { %p5743_p13 = pneg %p5742_p12 }
0x132b   : > { %p5748_p3 = pnand %p5747_p2, %p5743_p13 }
0x132d   : > { %5751 = shalt.err (!%p5748_p3)
}
0x132e   : > { %5443 = dma.vmem_to_hbm [thread:$0]  (%p5922_p10), %s4288_s19, 16, %s4285_s0, %s4272_s18   ;;  %vm4269_vm2 = vcmask 0  }
0x132f   : > { %s480_s21 = scalar_lea.vmem %s7950_s15, %s5943_s30 }
0x13ab   : > { %v4267_v27 = vpop.xlane.xlu0 %4266 }
0x13ac   : > { %v4268_v52 = vsub.f32 0.0, %v4267_v27 }
0x13ae   : > { %4270 = vst.msk [vmem:[%s480_s21] sm:$0x1] %vm4269_vm2, %v4268_v52 }
0x13af PF: > { %p5449_p4 = scmp.ge.s32.totalorder %s5788_s25, 2  ;;  %s4302_s26 = sand.u32 1, %s5776_s23  }
0x13b0   : > { %s4303_s17 = scalar_lea.sflag [#allocation5], %s4302_s26 }
0x13b1   : > { %p5446_p5 = pnand %p5449_p4, %p5926_p11 }
0x13b3   : > { %p5447_p6 = pneg %p5446_p5 }
0x13b5   : > { %5771 = dma.done.wait (%p5447_p6), %s4303_s17, 16  }
0x13b6   : > { %5773 = vsyncadd (%p5447_p6), %s4303_s17, 4294967280  ;;  %s7999_s25 = sld [smem:[#allocation9_spill]]  ;;  %s8002_s23 = smov %s5780_s24 }
0x13b7   : > { %s8000_s19 = sld [smem:[#allocation8_spill]] }
0x13b8   : > { %s8001_s0 = sld [smem:[#allocation10_spill]] }
0x13bc   : > { %p32_p10 = scmp.ge.s32.totalorder %s7999_s25, 4  }
0x13bd   : > { %s8003_s24 = smov %s8000_s19 }
0x13be   :  { %34 = sbr.rel (!%p32_p10) target bundleno = 19 (0x13), region = 119 }
0x13c3   :  { %4313 = vsyncpa [#allocation5], 1 }
0x13c4   :  { %4315 = vsyncpa [#allocation5 + $0x1], 1 }

</bundles_post_ra>
